<compile_context>
chip_gen: v7x
topology: tpu7x:2x2x1
jax: 0.10.0
libtpu: 0.0.40
codegen_flags: <defaults>
</compile_context>

<pallas_src>
import numpy as np
import jax
import jax.numpy as jnp
from jax import lax
from jax.experimental import pallas as pl
from jax.experimental.pallas import tpu as pltpu


# ----------------------------- host-side helpers ---------------------------

def bilinear_weights_1d(in_size, out_size):
    """PyTorch bilinear (align_corners=False): per-output (i0, i1, lam)."""
    o = np.arange(out_size, dtype=np.float64)
    src = (o + 0.5) * (in_size / out_size) - 0.5
    src = np.maximum(src, 0.0)                      # PyTorch clamps negative src
    i0 = np.minimum(np.floor(src).astype(np.int64), in_size - 1)
    i1 = np.minimum(i0 + 1, in_size - 1)
    lam = src - i0
    return i0, i1, lam


def bilinear_matrix_1d(in_size, out_size):
    """(out, in) 1-D interpolation matrix (align_corners=False)."""
    i0, i1, lam = bilinear_weights_1d(in_size, out_size)
    M = np.zeros((out_size, in_size), np.float64)
    M[np.arange(out_size), i0] += (1.0 - lam)
    M[np.arange(out_size), i1] += lam
    return M


# ------------------------------- fused kernel ------------------------------

def make_hcolumns_kernel(meta, cmid, cx, n, Ho, Wo):
    """meta: per-hook dict of static ints (cin, H, W, HW, L, slab offsets,
    height-lerp tables)."""

    def kernel(*refs):
        hook_refs = refs[:n]
        x_ref = refs[n]
        w_ref = refs[n + 1]          # (cmid, WTOT)  bf16 packed conv weights
        b_ref = refs[n + 2]          # (cmid, 2n)    f32 packed biases
        mw_ref = refs[n + 3]         # (Wmax, n*Wo)  bf16 packed width matrices
        o_ref = refs[n + 4]          # (1, ctot, Ho*Wo) f32 output slab
        pad1_ref, pad2_ref, win_ref = refs[n + 5:n + 8]

        for i, m in enumerate(meta):
            cin, H, W = m['cin'], m['H'], m['W']
            HW, L = m['HW'], m['L']

            # wrap-column kill masks, built in-kernel (no HBM input, hoisted)
            col = lax.broadcasted_iota(jnp.int32, (1, HW), 1) % W
            mask_l = col != 0          # kills the x = -1 wrap (kw == 0 taps)
            mask_r = col != W - 1      # kills the x =  W wrap (kw == 2 taps)

            def conv3x3(pad_ref, c_in, w_off, b_col):
                # Build the 9 shifted windows stacked along sublanes, masking
                # the horizontally wrapped columns once during the build, then
                # one wide-K matmul on the MXU.
                for kh in range(3):
                    for kw in range(3):
                        t = kh * 3 + kw
                        s = kh * W + kw
                        win = pad_ref[0:c_in, s:s + HW]
                        if kw == 0:
                            win = jnp.where(mask_l, win, 0)
                        elif kw == 2:
                            win = jnp.where(mask_r, win, 0)
                        win_ref[t * c_in:(t + 1) * c_in, 0:HW] = win
                wmat = w_ref[:, w_off:w_off + 9 * c_in]               # (cmid, 9*c_in) bf16
                acc = jnp.dot(wmat, win_ref[0:9 * c_in, 0:HW],
                              preferred_element_type=jnp.float32)     # (cmid, HW) f32
                return acc + b_ref[:, b_col:b_col + 1]                # f32 bias add

            # ---- conv1 (cin -> cmid): pad the raw hook activation in VMEM ----
            pad1_ref[0:cin, 0:W + 1] = jnp.zeros((cin, W + 1), jnp.bfloat16)
            pad1_ref[0:cin, W + 1 + HW:L] = jnp.zeros((cin, W + 1), jnp.bfloat16)
            pad1_ref[0:cin, W + 1:W + 1 + HW] = hook_refs[i][0]
            c1 = conv3x3(pad1_ref, cin, m['w1_off'], 2 * i)

            # ---- conv2 (cmid -> cmid): re-pad conv1 output (bf16) in VMEM ----
            pad2_ref[0:cmid, 0:W + 1] = jnp.zeros((cmid, W + 1), jnp.bfloat16)
            pad2_ref[0:cmid, W + 1 + HW:L] = jnp.zeros((cmid, W + 1), jnp.bfloat16)
            pad2_ref[0:cmid, W + 1:W + 1 + HW] = c1.astype(jnp.bfloat16)
            c2 = conv3x3(pad2_ref, cmid, m['w2_off'], 2 * i + 1)      # (cmid, HW) f32

            # ---- separable bilinear upsample (align_corners=False) ----
            # width pass: per source row, (cmid, W) @ (W, Wo) small matmul
            mwT = mw_ref[0:W, m['mw_off']:m['mw_off'] + Wo]           # (W, Wo) bf16
            yw = [jnp.dot(c2[:, h * W:(h + 1) * W].astype(jnp.bfloat16), mwT,
                          preferred_element_type=jnp.float32)
                  for h in range(H)]                                  # H x (cmid, Wo)
            # height pass: static 2-tap lerp per output row; weights/indices
            # are compile-time constants, so this is pure VPU work.
            for ho in range(Ho):
                i0, i1, lam = m['h_i0'][ho], m['h_i1'][ho], m['h_lam'][ho]
                if i0 == i1 or lam == 0.0:
                    row = yw[i0]
                else:
                    row = (1.0 - lam) * yw[i0] + lam * yw[i1]
                o_ref[0, i * cmid:(i + 1) * cmid, ho * Wo:(ho + 1) * Wo] = (
                    row.astype(o_ref.dtype))

        # passthrough x into the trailing channel slice (torch.cat(..., dim=1)),
        # kept exact in f32.
        o_ref[0, n * cmid:n * cmid + cx, :] = x_ref[0].astype(o_ref.dtype)

    return kernel


# ------------------------------ Hcolumns forward ---------------------------

def hcolumns_forward(hooks_nchw, x_nchw, params):
    """Pallas version of Hcolumns.forward.

    hooks_nchw : list of n NCHW feature maps ('hook.stored')
    x_nchw     : NCHW input at the final resolution
    params     : list of (w1, b1, w2, b2) per hook; w in HWIO (3,3,Cin,Cout)
    returns    : NCHW == torch.cat([upsample(conv(conv(h_i))) ..., x], dim=1)
    """
    n = len(hooks_nchw)
    B, cx, Ho, Wo = x_nchw.shape
    cmid = params[0][0].shape[-1]

    meta, hook_inputs = [], []
    w_blocks, b_blocks, mw_blocks = [], [], []
    w_off = 0
    Wmax = max(int(h.shape[3]) for h in hooks_nchw)
    cin_max = max(int(h.shape[1]) for h in hooks_nchw)
    L_max, HW_max = 0, 0
    flops = 0

    for i in range(n):
        h = hooks_nchw[i]
        _, cin, H, W = h.shape
        scale = 2 ** (n - i - 1 + (1 if i > 2 else 0))
        assert (H * scale, W * scale) == (Ho, Wo)
        HW, L = H * W, (H + 2) * W + 2
        L_max, HW_max = max(L_max, L), max(HW_max, HW)

        # raw (unpadded) hook activation, bf16, flattened spatial on lanes
        hook_inputs.append(h.astype(jnp.bfloat16).reshape(B, cin, HW))

        w1, b1, w2, b2 = params[i]
        # HWIO (3,3,cin,cout) -> (cout, tap, cin) -> (cmid, 9*cin);
        # column index t*cin + c matches the in-kernel window stacking order.
        w1m = jnp.transpose(w1, (3, 0, 1, 2)).reshape(cmid, 9 * cin)
        w2m = jnp.transpose(w2, (3, 0, 1, 2)).reshape(cmid, 9 * cmid)
        w1_off = w_off; w_off += 9 * cin
        w2_off = w_off; w_off += 9 * cmid
        w_blocks += [w1m, w2m]
        b_blocks += [b1.reshape(cmid, 1), b2.reshape(cmid, 1)]

        # separable bilinear pieces
        mwT = np.asarray(bilinear_matrix_1d(W, Wo)).T                 # (W, Wo)
        mw_pad = np.zeros((Wmax, Wo), np.float32)
        mw_pad[:W] = mwT
        mw_blocks.append(mw_pad)
        i0, i1, lam = bilinear_weights_1d(H, Ho)

        meta.append(dict(cin=cin, H=H, W=W, HW=HW, L=L,
                         w1_off=w1_off, w2_off=w2_off, mw_off=i * Wo,
                         h_i0=[int(v) for v in i0],
                         h_i1=[int(v) for v in i1],
                         h_lam=[float(v) for v in lam]))

        flops += B * (2 * 9 * cin * cmid * HW + 2 * 9 * cmid * cmid * HW
                      + 2 * cmid * H * W * Wo + 3 * cmid * Ho * Wo)

    wslab = jnp.concatenate(w_blocks, axis=1).astype(jnp.bfloat16)      # (cmid, WTOT)
    bslab = jnp.concatenate(b_blocks, axis=1).astype(jnp.float32)       # (cmid, 2n)
    mwslab = jnp.asarray(np.concatenate(mw_blocks, axis=1),
                         jnp.bfloat16)                                  # (Wmax, n*Wo)
    x_in = x_nchw.astype(jnp.float32).reshape(B, cx, Ho * Wo)

    ctot = n * cmid + cx
    HoWo = Ho * Wo

    inputs = hook_inputs + [x_in, wslab, bslab, mwslab]
    in_specs = (
        [pl.BlockSpec((1, int(a.shape[1]), int(a.shape[2])), lambda b: (b, 0, 0))
         for a in hook_inputs]
        + [pl.BlockSpec((1, cx, HoWo), lambda b: (b, 0, 0)),
           pl.BlockSpec(tuple(wslab.shape), lambda b: (0, 0)),
           pl.BlockSpec(tuple(bslab.shape), lambda b: (0, 0)),
           pl.BlockSpec(tuple(mwslab.shape), lambda b: (0, 0))])

    scratch_shapes = [
        pltpu.VMEM((cin_max, L_max), jnp.bfloat16),       # padded conv1 input
        pltpu.VMEM((cmid, L_max), jnp.bfloat16),          # padded conv1 output
        pltpu.VMEM((9 * cin_max, HW_max), jnp.bfloat16),  # stacked 9-tap windows
    ]

    bytes_accessed = (sum(int(np.prod(a.shape)) * a.dtype.itemsize for a in inputs)
                      + B * ctot * HoWo * 4)

    out = pl.pallas_call(
        make_hcolumns_kernel(meta, cmid, cx, n, Ho, Wo),
        out_shape=jax.ShapeDtypeStruct((B, ctot, HoWo), jnp.float32),
        grid=(B,),
        in_specs=in_specs,
        out_specs=pl.BlockSpec((1, ctot, HoWo), lambda b: (b, 0, 0)),
        scratch_shapes=scratch_shapes,
        compiler_params=pltpu.CompilerParams(
            dimension_semantics=("parallel",),
            vmem_limit_bytes=32 * 1024 * 1024),
        cost_estimate=pl.CostEstimate(flops=int(flops), transcendentals=0,
                                      bytes_accessed=int(bytes_accessed)),
    )(*inputs)
    # output is already channel-major (NCHW); reshape is metadata-only
    return out.reshape(B, ctot, Ho, Wo)


# ------------------------------- pure-JAX reference ------------------------

def ref_conv3x3(x_nhwc, w, b):
    y = lax.conv_general_dilated(
        x_nhwc, w, window_strides=(1, 1), padding="SAME",
        dimension_numbers=("NHWC", "HWIO", "NHWC"))
    return y + b.reshape(1, 1, 1, -1)


def ref_bilinear(x_nhwc, scale):
    B, H, W, C = x_nhwc.shape
    Mh = jnp.asarray(bilinear_matrix_1d(H, H * scale), jnp.float32)
    Mw = jnp.asarray(bilinear_matrix_1d(W, W * scale), jnp.float32)
    return jnp.einsum('ph,bhwc,qw->bpqc', Mh, x_nhwc, Mw)


def hcolumns_reference(hooks_nchw, x_nchw, params):
    n = len(hooks_nchw)
    outs = []
    for i in range(n):
        scale = 2 ** (n - i - 1 + (1 if i > 2 else 0))
        h = jnp.transpose(hooks_nchw[i], (0, 2, 3, 1))
        w1, b1, w2, b2 = params[i]
        h2 = ref_conv3x3(ref_conv3x3(h, w1, b1), w2, b2)
        outs.append(ref_bilinear(h2, scale))
    x_nhwc = jnp.transpose(x_nchw, (0, 2, 3, 1))
    out = jnp.concatenate(outs + [x_nhwc], axis=-1)
    return jnp.transpose(out, (0, 3, 1, 2))


# ------------------------------------ main ---------------------------------

if __name__ == "__main__":
    # n = 4 hooks, nc = [16, 12, 8, 8], batch = 2.
    # scale factors 2**(n-i-1 + (1 if i>2 else 0)) = [8, 4, 2, 2]
    #   -> hook spatial sizes [2, 4, 8, 8] all upsample to 16 = x spatial size.
    B = 2
    nc = [16, 12, 8, 8]
    hook_hw = [2, 4, 8, 8]
    n = len(nc)
    X_HW = 16
    X_C = 4

    key = jax.random.PRNGKey(0)
    hooks = []
    for i in range(n):
        key, k = jax.random.split(key)
        hooks.append(jax.random.normal(k, (B, nc[i], hook_hw[i], hook_hw[i]),
                                       jnp.float32))
    key, kx = jax.random.split(key)
    x = jax.random.normal(kx, (B, X_C, X_HW, X_HW), jnp.float32)

    # factorization params: conv(nc[i]->nc[-1], 3) then conv(nc[-1]->nc[-1], 3)
    params = []
    for i in range(n):
        cin, cout = nc[i], nc[-1]
        key, k1, k2, k3, k4 = jax.random.split(key, 5)
        w1 = jax.random.normal(k1, (3, 3, cin, cout), jnp.float32) / np.sqrt(9.0 * cin)
        b1 = jax.random.normal(k2, (cout,), jnp.float32) * 0.01
        w2 = jax.random.normal(k3, (3, 3, cout, cout), jnp.float32) / np.sqrt(9.0 * cout)
        b2 = jax.random.normal(k4, (cout,), jnp.float32) * 0.01
        params.append((w1, b1, w2, b2))

    # The kernel uses bf16 MXU operands; quantize hook activations and conv
    # weights through bf16 once so kernel and reference see identical operands
    # (reference still accumulates in f32).
    hooks = [h.astype(jnp.bfloat16).astype(jnp.float32) for h in hooks]
    params = [(w1.astype(jnp.bfloat16).astype(jnp.float32), b1,
               w2.astype(jnp.bfloat16).astype(jnp.float32), b2)
              for (w1, b1, w2, b2) in params]

    fwd = jax.jit(hcolumns_forward)
    out = jax.block_until_ready(fwd(hooks, x, params))

    expected_shape = (B, n * nc[-1] + X_C, X_HW, X_HW)
    assert out.shape == expected_shape, (out.shape, expected_shape)

    ref = jax.block_until_ready(hcolumns_reference(hooks, x, params))
    # Tolerance set by bf16 matmul operands (f32 accumulation) vs f32 reference.
    np.testing.assert_allclose(np.asarray(out), np.asarray(ref),
                               rtol=3e-2, atol=3e-2)

    print("KERNEL_OK")
</pallas_src>

<mosaic_0001>
module attributes {stable_mosaic.version = 11 : i64} {
  func.func @kernel(%arg0: i32, %arg1: memref<1x16x4xbf16, #tpu.memory_space<vmem>>, %arg2: memref<1x12x16xbf16, #tpu.memory_space<vmem>>, %arg3: memref<1x8x64xbf16, #tpu.memory_space<vmem>>, %arg4: memref<1x8x64xbf16, #tpu.memory_space<vmem>>, %arg5: memref<1x4x256xf32, #tpu.memory_space<vmem>>, %arg6: memref<8x684xbf16, #tpu.memory_space<vmem>>, %arg7: memref<8x8xf32, #tpu.memory_space<vmem>>, %arg8: memref<8x64xbf16, #tpu.memory_space<vmem>>, %arg9: memref<1x36x256xf32, #tpu.memory_space<vmem>>, %arg10: memref<16x82xbf16, #tpu.memory_space<vmem>>, %arg11: memref<8x82xbf16, #tpu.memory_space<vmem>>, %arg12: memref<144x64xbf16, #tpu.memory_space<vmem>>) attributes {dimension_semantics = [#tpu.dimension_semantics<parallel>], iteration_bounds = array<i64: 2>, scalar_prefetch = 0 : i64, scratch_operands = 3 : i64, tpu.core_type = #tpu.core_type<tc>, window_params = [{transform_indices = @transform_0, window_bounds = array<i64: 1, 16, 4>}, {transform_indices = @transform_1, window_bounds = array<i64: 1, 12, 16>}, {transform_indices = @transform_2, window_bounds = array<i64: 1, 8, 64>}, {transform_indices = @transform_3, window_bounds = array<i64: 1, 8, 64>}, {transform_indices = @transform_4, window_bounds = array<i64: 1, 4, 256>}, {pipeline_mode = #tpu.pipeline_mode<synchronous>, transform_indices = @transform_5, window_bounds = array<i64: 8, 684>}, {pipeline_mode = #tpu.pipeline_mode<synchronous>, transform_indices = @transform_6, window_bounds = array<i64: 8, 8>}, {pipeline_mode = #tpu.pipeline_mode<synchronous>, transform_indices = @transform_7, window_bounds = array<i64: 8, 64>}, {transform_indices = @transform_8, window_bounds = array<i64: 1, 36, 256>}]} {
    %0 = tpu.iota {dimensions = array<i32: 1>} : vector<1x4xi32>
    %c2_i32 = arith.constant 2 : i32
    %c0_i32 = arith.constant 0 : i32
    %1 = arith.cmpi eq, %c2_i32, %c0_i32 : i32
    %c1_i32 = arith.constant 1 : i32
    %2 = arith.select %1, %c1_i32, %c2_i32 : i32
    %3 = vector.broadcast %2 : i32 to vector<1x4xi32>
    %4 = arith.remsi %0, %3 : vector<1x4xi32>
    %c0_i32_0 = arith.constant 0 : i32
    %5 = vector.broadcast %c0_i32_0 : i32 to vector<1x4xi32>
    %6 = arith.cmpi ne, %4, %5 : vector<1x4xi32>
    %c0_i32_1 = arith.constant 0 : i32
    %7 = vector.broadcast %c0_i32_1 : i32 to vector<1x4xi32>
    %8 = arith.cmpi slt, %4, %7 : vector<1x4xi32>
    %c0_i32_2 = arith.constant 0 : i32
    %9 = arith.cmpi slt, %2, %c0_i32_2 : i32
    %10 = vector.broadcast %9 : i1 to vector<1x4xi1>
    %11 = vector.broadcast %10 : vector<1x4xi1> to vector<1x4xi1>
    %12 = arith.xori %8, %11 : vector<1x4xi1>
    %13 = arith.andi %12, %6 : vector<1x4xi1>
    %14 = vector.broadcast %2 : i32 to vector<1x4xi32>
    %15 = arith.addi %4, %14 : vector<1x4xi32>
    %16 = arith.select %13, %15, %4 : vector<1x4xi1>, vector<1x4xi32>
    %c0_i32_3 = arith.constant 0 : i32
    %17 = vector.broadcast %c0_i32_3 : i32 to vector<1x4xi32>
    %18 = arith.cmpi ne, %16, %17 : vector<1x4xi32>
    %c1_i32_4 = arith.constant 1 : i32
    %19 = vector.broadcast %c1_i32_4 : i32 to vector<1x4xi32>
    %20 = arith.cmpi ne, %16, %19 : vector<1x4xi32>
    %cst = arith.constant 0.000000e+00 : bf16
    %21 = vector.broadcast %cst : bf16 to vector<16x3xbf16>
    %c0 = arith.constant 0 : index
    %c0_5 = arith.constant 0 : index
    %22 = vector.load %arg10[%c0, %c0_5] : memref<16x82xbf16, #tpu.memory_space<vmem>>, vector<16x3xbf16>
    tpu.vector_store %arg10[%c0, %c0_5], %21 {strides = array<i32>} : memref<16x82xbf16, #tpu.memory_space<vmem>>, vector<16x3xbf16>,
    %cst_6 = arith.constant 0.000000e+00 : bf16
    %23 = vector.broadcast %cst_6 : bf16 to vector<16x3xbf16>
    %c0_7 = arith.constant 0 : index
    %c7 = arith.constant 7 : index
    %24 = vector.load %arg10[%c0_7, %c7] : memref<16x82xbf16, #tpu.memory_space<vmem>>, vector<16x3xbf16>
    tpu.vector_store %arg10[%c0_7, %c7], %23 {strides = array<i32>} : memref<16x82xbf16, #tpu.memory_space<vmem>>, vector<16x3xbf16>,
    %c0_8 = arith.constant 0 : index
    %c0_9 = arith.constant 0 : index
    %c0_10 = arith.constant 0 : index
    %25 = vector.load %arg1[%c0_8, %c0_9, %c0_10] : memref<1x16x4xbf16, #tpu.memory_space<vmem>>, vector<1x16x4xbf16>
    %26 = vector.shape_cast %25 : vector<1x16x4xbf16> to vector<16x4xbf16>
    %c0_11 = arith.constant 0 : index
    %c3 = arith.constant 3 : index
    %27 = vector.load %arg10[%c0_11, %c3] : memref<16x82xbf16, #tpu.memory_space<vmem>>, vector<16x4xbf16>
    tpu.vector_store %arg10[%c0_11, %c3], %26 {strides = array<i32>} : memref<16x82xbf16, #tpu.memory_space<vmem>>, vector<16x4xbf16>,
    %c0_12 = arith.constant 0 : index
    %c0_13 = arith.constant 0 : index
    %28 = vector.load %arg10[%c0_12, %c0_13] : memref<16x82xbf16, #tpu.memory_space<vmem>>, vector<16x4xbf16>
    %c0_i32_14 = arith.constant 0 : i32
    %29 = arith.sitofp %c0_i32_14 : i32 to bf16
    %30 = vector.shape_cast %18 : vector<1x4xi1> to vector<1x4xi1>
    %31 = vector.broadcast %30 : vector<1x4xi1> to vector<16x4xi1>
    %32 = vector.broadcast %29 : bf16 to vector<16x4xbf16>
    %33 = arith.select %31, %28, %32 : vector<16x4xi1>, vector<16x4xbf16>
    %c0_15 = arith.constant 0 : index
    %c0_16 = arith.constant 0 : index
    %34 = vector.load %arg12[%c0_15, %c0_16] : memref<144x64xbf16, #tpu.memory_space<vmem>>, vector<16x4xbf16>
    tpu.vector_store %arg12[%c0_15, %c0_16], %33 {strides = array<i32>} : memref<144x64xbf16, #tpu.memory_space<vmem>>, vector<16x4xbf16>,
    %c0_17 = arith.constant 0 : index
    %c1 = arith.constant 1 : index
    %35 = vector.load %arg10[%c0_17, %c1] : memref<16x82xbf16, #tpu.memory_space<vmem>>, vector<16x4xbf16>
    %c16 = arith.constant 16 : index
    %c0_18 = arith.constant 0 : index
    %36 = vector.load %arg12[%c16, %c0_18] : memref<144x64xbf16, #tpu.memory_space<vmem>>, vector<16x4xbf16>
    tpu.vector_store %arg12[%c16, %c0_18], %35 {strides = array<i32>} : memref<144x64xbf16, #tpu.memory_space<vmem>>, vector<16x4xbf16>,
    %c0_19 = arith.constant 0 : index
    %c2 = arith.constant 2 : index
    %37 = vector.load %arg10[%c0_19, %c2] : memref<16x82xbf16, #tpu.memory_space<vmem>>, vector<16x4xbf16>
    %c0_i32_20 = arith.constant 0 : i32
    %38 = arith.sitofp %c0_i32_20 : i32 to bf16
    %39 = vector.shape_cast %20 : vector<1x4xi1> to vector<1x4xi1>
    %40 = vector.broadcast %39 : vector<1x4xi1> to vector<16x4xi1>
    %41 = vector.broadcast %38 : bf16 to vector<16x4xbf16>
    %42 = arith.select %40, %37, %41 : vector<16x4xi1>, vector<16x4xbf16>
    %c32 = arith.constant 32 : index
    %c0_21 = arith.constant 0 : index
    %43 = vector.load %arg12[%c32, %c0_21] : memref<144x64xbf16, #tpu.memory_space<vmem>>, vector<16x4xbf16>
    tpu.vector_store %arg12[%c32, %c0_21], %42 {strides = array<i32>} : memref<144x64xbf16, #tpu.memory_space<vmem>>, vector<16x4xbf16>,
    %c0_22 = arith.constant 0 : index
    %c2_23 = arith.constant 2 : index
    %44 = vector.load %arg10[%c0_22, %c2_23] : memref<16x82xbf16, #tpu.memory_space<vmem>>, vector<16x4xbf16>
    %c0_i32_24 = arith.constant 0 : i32
    %45 = arith.sitofp %c0_i32_24 : i32 to bf16
    %46 = vector.shape_cast %18 : vector<1x4xi1> to vector<1x4xi1>
    %47 = vector.broadcast %46 : vector<1x4xi1> to vector<16x4xi1>
    %48 = vector.broadcast %45 : bf16 to vector<16x4xbf16>
    %49 = arith.select %47, %44, %48 : vector<16x4xi1>, vector<16x4xbf16>
    %c48 = arith.constant 48 : index
    %c0_25 = arith.constant 0 : index
    %50 = vector.load %arg12[%c48, %c0_25] : memref<144x64xbf16, #tpu.memory_space<vmem>>, vector<16x4xbf16>
    tpu.vector_store %arg12[%c48, %c0_25], %49 {strides = array<i32>} : memref<144x64xbf16, #tpu.memory_space<vmem>>, vector<16x4xbf16>,
    %c0_26 = arith.constant 0 : index
    %c3_27 = arith.constant 3 : index
    %51 = vector.load %arg10[%c0_26, %c3_27] : memref<16x82xbf16, #tpu.memory_space<vmem>>, vector<16x4xbf16>
    %c64 = arith.constant 64 : index
    %c0_28 = arith.constant 0 : index
    %52 = vector.load %arg12[%c64, %c0_28] : memref<144x64xbf16, #tpu.memory_space<vmem>>, vector<16x4xbf16>
    tpu.vector_store %arg12[%c64, %c0_28], %51 {strides = array<i32>} : memref<144x64xbf16, #tpu.memory_space<vmem>>, vector<16x4xbf16>,
    %c0_29 = arith.constant 0 : index
    %c4 = arith.constant 4 : index
    %53 = vector.load %arg10[%c0_29, %c4] : memref<16x82xbf16, #tpu.memory_space<vmem>>, vector<16x4xbf16>
    %c0_i32_30 = arith.constant 0 : i32
    %54 = arith.sitofp %c0_i32_30 : i32 to bf16
    %55 = vector.shape_cast %20 : vector<1x4xi1> to vector<1x4xi1>
    %56 = vector.broadcast %55 : vector<1x4xi1> to vector<16x4xi1>
    %57 = vector.broadcast %54 : bf16 to vector<16x4xbf16>
    %58 = arith.select %56, %53, %57 : vector<16x4xi1>, vector<16x4xbf16>
    %c80 = arith.constant 80 : index
    %c0_31 = arith.constant 0 : index
    %59 = vector.load %arg12[%c80, %c0_31] : memref<144x64xbf16, #tpu.memory_space<vmem>>, vector<16x4xbf16>
    tpu.vector_store %arg12[%c80, %c0_31], %58 {strides = array<i32>} : memref<144x64xbf16, #tpu.memory_space<vmem>>, vector<16x4xbf16>,
    %c0_32 = arith.constant 0 : index
    %c4_33 = arith.constant 4 : index
    %60 = vector.load %arg10[%c0_32, %c4_33] : memref<16x82xbf16, #tpu.memory_space<vmem>>, vector<16x4xbf16>
    %c0_i32_34 = arith.constant 0 : i32
    %61 = arith.sitofp %c0_i32_34 : i32 to bf16
    %62 = vector.shape_cast %18 : vector<1x4xi1> to vector<1x4xi1>
    %63 = vector.broadcast %62 : vector<1x4xi1> to vector<16x4xi1>
    %64 = vector.broadcast %61 : bf16 to vector<16x4xbf16>
    %65 = arith.select %63, %60, %64 : vector<16x4xi1>, vector<16x4xbf16>
    %c96 = arith.constant 96 : index
    %c0_35 = arith.constant 0 : index
    %66 = vector.load %arg12[%c96, %c0_35] : memref<144x64xbf16, #tpu.memory_space<vmem>>, vector<16x4xbf16>
    tpu.vector_store %arg12[%c96, %c0_35], %65 {strides = array<i32>} : memref<144x64xbf16, #tpu.memory_space<vmem>>, vector<16x4xbf16>,
    %c0_36 = arith.constant 0 : index
    %c5 = arith.constant 5 : index
    %67 = vector.load %arg10[%c0_36, %c5] : memref<16x82xbf16, #tpu.memory_space<vmem>>, vector<16x4xbf16>
    %c112 = arith.constant 112 : index
    %c0_37 = arith.constant 0 : index
    %68 = vector.load %arg12[%c112, %c0_37] : memref<144x64xbf16, #tpu.memory_space<vmem>>, vector<16x4xbf16>
    tpu.vector_store %arg12[%c112, %c0_37], %67 {strides = array<i32>} : memref<144x64xbf16, #tpu.memory_space<vmem>>, vector<16x4xbf16>,
    %c0_38 = arith.constant 0 : index
    %c6 = arith.constant 6 : index
    %69 = vector.load %arg10[%c0_38, %c6] : memref<16x82xbf16, #tpu.memory_space<vmem>>, vector<16x4xbf16>
    %c0_i32_39 = arith.constant 0 : i32
    %70 = arith.sitofp %c0_i32_39 : i32 to bf16
    %71 = vector.shape_cast %20 : vector<1x4xi1> to vector<1x4xi1>
    %72 = vector.broadcast %71 : vector<1x4xi1> to vector<16x4xi1>
    %73 = vector.broadcast %70 : bf16 to vector<16x4xbf16>
    %74 = arith.select %72, %69, %73 : vector<16x4xi1>, vector<16x4xbf16>
    %c128 = arith.constant 128 : index
    %c0_40 = arith.constant 0 : index
    %75 = vector.load %arg12[%c128, %c0_40] : memref<144x64xbf16, #tpu.memory_space<vmem>>, vector<16x4xbf16>
    tpu.vector_store %arg12[%c128, %c0_40], %74 {strides = array<i32>} : memref<144x64xbf16, #tpu.memory_space<vmem>>, vector<16x4xbf16>,
    %c0_41 = arith.constant 0 : index
    %c0_42 = arith.constant 0 : index
    %76 = vector.load %arg6[%c0_41, %c0_42] : memref<8x684xbf16, #tpu.memory_space<vmem>>, vector<8x144xbf16>
    %c0_43 = arith.constant 0 : index
    %c0_44 = arith.constant 0 : index
    %77 = vector.load %arg12[%c0_43, %c0_44] : memref<144x64xbf16, #tpu.memory_space<vmem>>, vector<144x4xbf16>
    %cst_45 = arith.constant dense<0.000000e+00> : vector<8x4xf32>
    %78 = tpu.matmul %76, %77, %cst_45 {dimension_numbers = #tpu.dot_dimension_numbers<[1], [0], [0], [1], [0, 0, 1, 1], [], []>} : vector<8x144xbf16>, vector<144x4xbf16>, vector<8x4xf32> -> vector<8x4xf32>
    %c0_46 = arith.constant 0 : index
    %c0_47 = arith.constant 0 : index
    %79 = vector.load %arg7[%c0_46, %c0_47] : memref<8x8xf32, #tpu.memory_space<vmem>>, vector<8x1xf32>
    %80 = vector.broadcast %79 : vector<8x1xf32> to vector<8x4xf32>
    %81 = arith.addf %78, %80 : vector<8x4xf32>
    %cst_48 = arith.constant 0.000000e+00 : bf16
    %82 = vector.broadcast %cst_48 : bf16 to vector<8x3xbf16>
    %c0_49 = arith.constant 0 : index
    %c0_50 = arith.constant 0 : index
    %83 = vector.load %arg11[%c0_49, %c0_50] : memref<8x82xbf16, #tpu.memory_space<vmem>>, vector<8x3xbf16>
    tpu.vector_store %arg11[%c0_49, %c0_50], %82 {strides = array<i32>} : memref<8x82xbf16, #tpu.memory_space<vmem>>, vector<8x3xbf16>,
    %cst_51 = arith.constant 0.000000e+00 : bf16
    %84 = vector.broadcast %cst_51 : bf16 to vector<8x3xbf16>
    %c0_52 = arith.constant 0 : index
    %c7_53 = arith.constant 7 : index
    %85 = vector.load %arg11[%c0_52, %c7_53] : memref<8x82xbf16, #tpu.memory_space<vmem>>, vector<8x3xbf16>
    tpu.vector_store %arg11[%c0_52, %c7_53], %84 {strides = array<i32>} : memref<8x82xbf16, #tpu.memory_space<vmem>>, vector<8x3xbf16>,
    %86 = arith.truncf %81 : vector<8x4xf32> to vector<8x4xbf16>
    %c0_54 = arith.constant 0 : index
    %c3_55 = arith.constant 3 : index
    %87 = vector.load %arg11[%c0_54, %c3_55] : memref<8x82xbf16, #tpu.memory_space<vmem>>, vector<8x4xbf16>
    tpu.vector_store %arg11[%c0_54, %c3_55], %86 {strides = array<i32>} : memref<8x82xbf16, #tpu.memory_space<vmem>>, vector<8x4xbf16>,
    %c0_56 = arith.constant 0 : index
    %c0_57 = arith.constant 0 : index
    %88 = vector.load %arg11[%c0_56, %c0_57] : memref<8x82xbf16, #tpu.memory_space<vmem>>, vector<8x4xbf16>
    %c0_i32_58 = arith.constant 0 : i32
    %89 = arith.sitofp %c0_i32_58 : i32 to bf16
    %90 = vector.shape_cast %18 : vector<1x4xi1> to vector<1x4xi1>
    %91 = vector.broadcast %90 : vector<1x4xi1> to vector<8x4xi1>
    %92 = vector.broadcast %89 : bf16 to vector<8x4xbf16>
    %93 = arith.select %91, %88, %92 : vector<8x4xi1>, vector<8x4xbf16>
    %c0_59 = arith.constant 0 : index
    %c0_60 = arith.constant 0 : index
    %94 = vector.load %arg12[%c0_59, %c0_60] : memref<144x64xbf16, #tpu.memory_space<vmem>>, vector<8x4xbf16>
    tpu.vector_store %arg12[%c0_59, %c0_60], %93 {strides = array<i32>} : memref<144x64xbf16, #tpu.memory_space<vmem>>, vector<8x4xbf16>,
    %c0_61 = arith.constant 0 : index
    %c1_62 = arith.constant 1 : index
    %95 = vector.load %arg11[%c0_61, %c1_62] : memref<8x82xbf16, #tpu.memory_space<vmem>>, vector<8x4xbf16>
    %c8 = arith.constant 8 : index
    %c0_63 = arith.constant 0 : index
    %96 = vector.load %arg12[%c8, %c0_63] : memref<144x64xbf16, #tpu.memory_space<vmem>>, vector<8x4xbf16>
    tpu.vector_store %arg12[%c8, %c0_63], %95 {strides = array<i32>} : memref<144x64xbf16, #tpu.memory_space<vmem>>, vector<8x4xbf16>,
    %c0_64 = arith.constant 0 : index
    %c2_65 = arith.constant 2 : index
    %97 = vector.load %arg11[%c0_64, %c2_65] : memref<8x82xbf16, #tpu.memory_space<vmem>>, vector<8x4xbf16>
    %c0_i32_66 = arith.constant 0 : i32
    %98 = arith.sitofp %c0_i32_66 : i32 to bf16
    %99 = vector.shape_cast %20 : vector<1x4xi1> to vector<1x4xi1>
    %100 = vector.broadcast %99 : vector<1x4xi1> to vector<8x4xi1>
    %101 = vector.broadcast %98 : bf16 to vector<8x4xbf16>
    %102 = arith.select %100, %97, %101 : vector<8x4xi1>, vector<8x4xbf16>
    %c16_67 = arith.constant 16 : index
    %c0_68 = arith.constant 0 : index
    %103 = vector.load %arg12[%c16_67, %c0_68] : memref<144x64xbf16, #tpu.memory_space<vmem>>, vector<8x4xbf16>
    tpu.vector_store %arg12[%c16_67, %c0_68], %102 {strides = array<i32>} : memref<144x64xbf16, #tpu.memory_space<vmem>>, vector<8x4xbf16>,
    %c0_69 = arith.constant 0 : index
    %c2_70 = arith.constant 2 : index
    %104 = vector.load %arg11[%c0_69, %c2_70] : memref<8x82xbf16, #tpu.memory_space<vmem>>, vector<8x4xbf16>
    %c0_i32_71 = arith.constant 0 : i32
    %105 = arith.sitofp %c0_i32_71 : i32 to bf16
    %106 = vector.shape_cast %18 : vector<1x4xi1> to vector<1x4xi1>
    %107 = vector.broadcast %106 : vector<1x4xi1> to vector<8x4xi1>
    %108 = vector.broadcast %105 : bf16 to vector<8x4xbf16>
    %109 = arith.select %107, %104, %108 : vector<8x4xi1>, vector<8x4xbf16>
    %c24 = arith.constant 24 : index
    %c0_72 = arith.constant 0 : index
    %110 = vector.load %arg12[%c24, %c0_72] : memref<144x64xbf16, #tpu.memory_space<vmem>>, vector<8x4xbf16>
    tpu.vector_store %arg12[%c24, %c0_72], %109 {strides = array<i32>} : memref<144x64xbf16, #tpu.memory_space<vmem>>, vector<8x4xbf16>,
    %c0_73 = arith.constant 0 : index
    %c3_74 = arith.constant 3 : index
    %111 = vector.load %arg11[%c0_73, %c3_74] : memref<8x82xbf16, #tpu.memory_space<vmem>>, vector<8x4xbf16>
    %c32_75 = arith.constant 32 : index
    %c0_76 = arith.constant 0 : index
    %112 = vector.load %arg12[%c32_75, %c0_76] : memref<144x64xbf16, #tpu.memory_space<vmem>>, vector<8x4xbf16>
    tpu.vector_store %arg12[%c32_75, %c0_76], %111 {strides = array<i32>} : memref<144x64xbf16, #tpu.memory_space<vmem>>, vector<8x4xbf16>,
    %c0_77 = arith.constant 0 : index
    %c4_78 = arith.constant 4 : index
    %113 = vector.load %arg11[%c0_77, %c4_78] : memref<8x82xbf16, #tpu.memory_space<vmem>>, vector<8x4xbf16>
    %c0_i32_79 = arith.constant 0 : i32
    %114 = arith.sitofp %c0_i32_79 : i32 to bf16
    %115 = vector.shape_cast %20 : vector<1x4xi1> to vector<1x4xi1>
    %116 = vector.broadcast %115 : vector<1x4xi1> to vector<8x4xi1>
    %117 = vector.broadcast %114 : bf16 to vector<8x4xbf16>
    %118 = arith.select %116, %113, %117 : vector<8x4xi1>, vector<8x4xbf16>
    %c40 = arith.constant 40 : index
    %c0_80 = arith.constant 0 : index
    %119 = vector.load %arg12[%c40, %c0_80] : memref<144x64xbf16, #tpu.memory_space<vmem>>, vector<8x4xbf16>
    tpu.vector_store %arg12[%c40, %c0_80], %118 {strides = array<i32>} : memref<144x64xbf16, #tpu.memory_space<vmem>>, vector<8x4xbf16>,
    %c0_81 = arith.constant 0 : index
    %c4_82 = arith.constant 4 : index
    %120 = vector.load %arg11[%c0_81, %c4_82] : memref<8x82xbf16, #tpu.memory_space<vmem>>, vector<8x4xbf16>
    %c0_i32_83 = arith.constant 0 : i32
    %121 = arith.sitofp %c0_i32_83 : i32 to bf16
    %122 = vector.shape_cast %18 : vector<1x4xi1> to vector<1x4xi1>
    %123 = vector.broadcast %122 : vector<1x4xi1> to vector<8x4xi1>
    %124 = vector.broadcast %121 : bf16 to vector<8x4xbf16>
    %125 = arith.select %123, %120, %124 : vector<8x4xi1>, vector<8x4xbf16>
    %c48_84 = arith.constant 48 : index
    %c0_85 = arith.constant 0 : index
    %126 = vector.load %arg12[%c48_84, %c0_85] : memref<144x64xbf16, #tpu.memory_space<vmem>>, vector<8x4xbf16>
    tpu.vector_store %arg12[%c48_84, %c0_85], %125 {strides = array<i32>} : memref<144x64xbf16, #tpu.memory_space<vmem>>, vector<8x4xbf16>,
    %c0_86 = arith.constant 0 : index
    %c5_87 = arith.constant 5 : index
    %127 = vector.load %arg11[%c0_86, %c5_87] : memref<8x82xbf16, #tpu.memory_space<vmem>>, vector<8x4xbf16>
    %c56 = arith.constant 56 : index
    %c0_88 = arith.constant 0 : index
    %128 = vector.load %arg12[%c56, %c0_88] : memref<144x64xbf16, #tpu.memory_space<vmem>>, vector<8x4xbf16>
    tpu.vector_store %arg12[%c56, %c0_88], %127 {strides = array<i32>} : memref<144x64xbf16, #tpu.memory_space<vmem>>, vector<8x4xbf16>,
    %c0_89 = arith.constant 0 : index
    %c6_90 = arith.constant 6 : index
    %129 = vector.load %arg11[%c0_89, %c6_90] : memref<8x82xbf16, #tpu.memory_space<vmem>>, vector<8x4xbf16>
    %c0_i32_91 = arith.constant 0 : i32
    %130 = arith.sitofp %c0_i32_91 : i32 to bf16
    %131 = vector.shape_cast %20 : vector<1x4xi1> to vector<1x4xi1>
    %132 = vector.broadcast %131 : vector<1x4xi1> to vector<8x4xi1>
    %133 = vector.broadcast %130 : bf16 to vector<8x4xbf16>
    %134 = arith.select %132, %129, %133 : vector<8x4xi1>, vector<8x4xbf16>
    %c64_92 = arith.constant 64 : index
    %c0_93 = arith.constant 0 : index
    %135 = vector.load %arg12[%c64_92, %c0_93] : memref<144x64xbf16, #tpu.memory_space<vmem>>, vector<8x4xbf16>
    tpu.vector_store %arg12[%c64_92, %c0_93], %134 {strides = array<i32>} : memref<144x64xbf16, #tpu.memory_space<vmem>>, vector<8x4xbf16>,
    %c0_94 = arith.constant 0 : index
    %c144 = arith.constant 144 : index
    %136 = vector.load %arg6[%c0_94, %c144] : memref<8x684xbf16, #tpu.memory_space<vmem>>, vector<8x72xbf16>
    %c0_95 = arith.constant 0 : index
    %c0_96 = arith.constant 0 : index
    %137 = vector.load %arg12[%c0_95, %c0_96] : memref<144x64xbf16, #tpu.memory_space<vmem>>, vector<72x4xbf16>
    %cst_97 = arith.constant dense<0.000000e+00> : vector<8x4xf32>
    %138 = tpu.matmul %136, %137, %cst_97 {dimension_numbers = #tpu.dot_dimension_numbers<[1], [0], [0], [1], [0, 0, 1, 1], [], []>} : vector<8x72xbf16>, vector<72x4xbf16>, vector<8x4xf32> -> vector<8x4xf32>
    %c0_98 = arith.constant 0 : index
    %c1_99 = arith.constant 1 : index
    %139 = vector.load %arg7[%c0_98, %c1_99] : memref<8x8xf32, #tpu.memory_space<vmem>>, vector<8x1xf32>
    %140 = vector.broadcast %139 : vector<8x1xf32> to vector<8x4xf32>
    %141 = arith.addf %138, %140 : vector<8x4xf32>
    %c0_100 = arith.constant 0 : index
    %c0_101 = arith.constant 0 : index
    %142 = vector.load %arg8[%c0_100, %c0_101] : memref<8x64xbf16, #tpu.memory_space<vmem>>, vector<2x16xbf16>
    %143 = vector.extract_strided_slice %141 {offsets = [0, 0], sizes = [8, 2], strides = [1, 1]} : vector<8x4xf32> to vector<8x2xf32>
    %144 = arith.truncf %143 : vector<8x2xf32> to vector<8x2xbf16>
    %cst_102 = arith.constant dense<0.000000e+00> : vector<8x16xf32>
    %145 = tpu.matmul %144, %142, %cst_102 {dimension_numbers = #tpu.dot_dimension_numbers<[1], [0], [0], [1], [0, 0, 1, 1], [], []>} : vector<8x2xbf16>, vector<2x16xbf16>, vector<8x16xf32> -> vector<8x16xf32>
    %146 = vector.extract_strided_slice %141 {offsets = [0, 2], sizes = [8, 2], strides = [1, 1]} : vector<8x4xf32> to vector<8x2xf32>
    %147 = arith.truncf %146 : vector<8x2xf32> to vector<8x2xbf16>
    %cst_103 = arith.constant dense<0.000000e+00> : vector<8x16xf32>
    %148 = tpu.matmul %147, %142, %cst_103 {dimension_numbers = #tpu.dot_dimension_numbers<[1], [0], [0], [1], [0, 0, 1, 1], [], []>} : vector<8x2xbf16>, vector<2x16xbf16>, vector<8x16xf32> -> vector<8x16xf32>
    %c0_104 = arith.constant 0 : index
    %c0_105 = arith.constant 0 : index
    %c0_106 = arith.constant 0 : index
    %149 = vector.load %arg9[%c0_104, %c0_105, %c0_106] : memref<1x36x256xf32, #tpu.memory_space<vmem>>, vector<1x8x16xf32>
    %150 = vector.shape_cast %149 : vector<1x8x16xf32> to vector<8x16xf32>
    %151 = vector.shape_cast %145 : vector<8x16xf32> to vector<1x8x16xf32>
    tpu.vector_store %arg9[%c0_104, %c0_105, %c0_106], %151 {strides = array<i32>} : memref<1x36x256xf32, #tpu.memory_space<vmem>>, vector<1x8x16xf32>,
    %c0_107 = arith.constant 0 : index
    %c0_108 = arith.constant 0 : index
    %c16_109 = arith.constant 16 : index
    %152 = vector.load %arg9[%c0_107, %c0_108, %c16_109] : memref<1x36x256xf32, #tpu.memory_space<vmem>>, vector<1x8x16xf32>
    %153 = vector.shape_cast %152 : vector<1x8x16xf32> to vector<8x16xf32>
    %154 = vector.shape_cast %145 : vector<8x16xf32> to vector<1x8x16xf32>
    tpu.vector_store %arg9[%c0_107, %c0_108, %c16_109], %154 {strides = array<i32>} : memref<1x36x256xf32, #tpu.memory_space<vmem>>, vector<1x8x16xf32>,
    %c0_110 = arith.constant 0 : index
    %c0_111 = arith.constant 0 : index
    %c32_112 = arith.constant 32 : index
    %155 = vector.load %arg9[%c0_110, %c0_111, %c32_112] : memref<1x36x256xf32, #tpu.memory_space<vmem>>, vector<1x8x16xf32>
    %156 = vector.shape_cast %155 : vector<1x8x16xf32> to vector<8x16xf32>
    %157 = vector.shape_cast %145 : vector<8x16xf32> to vector<1x8x16xf32>
    tpu.vector_store %arg9[%c0_110, %c0_111, %c32_112], %157 {strides = array<i32>} : memref<1x36x256xf32, #tpu.memory_space<vmem>>, vector<1x8x16xf32>,
    %c0_113 = arith.constant 0 : index
    %c0_114 = arith.constant 0 : index
    %c48_115 = arith.constant 48 : index
    %158 = vector.load %arg9[%c0_113, %c0_114, %c48_115] : memref<1x36x256xf32, #tpu.memory_space<vmem>>, vector<1x8x16xf32>
    %159 = vector.shape_cast %158 : vector<1x8x16xf32> to vector<8x16xf32>
    %160 = vector.shape_cast %145 : vector<8x16xf32> to vector<1x8x16xf32>
    tpu.vector_store %arg9[%c0_113, %c0_114, %c48_115], %160 {strides = array<i32>} : memref<1x36x256xf32, #tpu.memory_space<vmem>>, vector<1x8x16xf32>,
    %cst_116 = arith.constant 9.375000e-01 : f32
    %161 = vector.broadcast %cst_116 : f32 to vector<8x16xf32>
    %162 = arith.mulf %161, %145 : vector<8x16xf32>
    %cst_117 = arith.constant 6.250000e-02 : f32
    %163 = vector.broadcast %cst_117 : f32 to vector<8x16xf32>
    %164 = arith.mulf %163, %148 : vector<8x16xf32>
    %165 = arith.addf %162, %164 : vector<8x16xf32>
    %c0_118 = arith.constant 0 : index
    %c0_119 = arith.constant 0 : index
    %c64_120 = arith.constant 64 : index
    %166 = vector.load %arg9[%c0_118, %c0_119, %c64_120] : memref<1x36x256xf32, #tpu.memory_space<vmem>>, vector<1x8x16xf32>
    %167 = vector.shape_cast %166 : vector<1x8x16xf32> to vector<8x16xf32>
    %168 = vector.shape_cast %165 : vector<8x16xf32> to vector<1x8x16xf32>
    tpu.vector_store %arg9[%c0_118, %c0_119, %c64_120], %168 {strides = array<i32>} : memref<1x36x256xf32, #tpu.memory_space<vmem>>, vector<1x8x16xf32>,
    %cst_121 = arith.constant 8.125000e-01 : f32
    %169 = vector.broadcast %cst_121 : f32 to vector<8x16xf32>
    %170 = arith.mulf %169, %145 : vector<8x16xf32>
    %cst_122 = arith.constant 1.875000e-01 : f32
    %171 = vector.broadcast %cst_122 : f32 to vector<8x16xf32>
    %172 = arith.mulf %171, %148 : vector<8x16xf32>
    %173 = arith.addf %170, %172 : vector<8x16xf32>
    %c0_123 = arith.constant 0 : index
    %c0_124 = arith.constant 0 : index
    %c80_125 = arith.constant 80 : index
    %174 = vector.load %arg9[%c0_123, %c0_124, %c80_125] : memref<1x36x256xf32, #tpu.memory_space<vmem>>, vector<1x8x16xf32>
    %175 = vector.shape_cast %174 : vector<1x8x16xf32> to vector<8x16xf32>
    %176 = vector.shape_cast %173 : vector<8x16xf32> to vector<1x8x16xf32>
    tpu.vector_store %arg9[%c0_123, %c0_124, %c80_125], %176 {strides = array<i32>} : memref<1x36x256xf32, #tpu.memory_space<vmem>>, vector<1x8x16xf32>,
    %cst_126 = arith.constant 6.875000e-01 : f32
    %177 = vector.broadcast %cst_126 : f32 to vector<8x16xf32>
    %178 = arith.mulf %177, %145 : vector<8x16xf32>
    %cst_127 = arith.constant 3.125000e-01 : f32
    %179 = vector.broadcast %cst_127 : f32 to vector<8x16xf32>
    %180 = arith.mulf %179, %148 : vector<8x16xf32>
    %181 = arith.addf %178, %180 : vector<8x16xf32>
    %c0_128 = arith.constant 0 : index
    %c0_129 = arith.constant 0 : index
    %c96_130 = arith.constant 96 : index
    %182 = vector.load %arg9[%c0_128, %c0_129, %c96_130] : memref<1x36x256xf32, #tpu.memory_space<vmem>>, vector<1x8x16xf32>
    %183 = vector.shape_cast %182 : vector<1x8x16xf32> to vector<8x16xf32>
    %184 = vector.shape_cast %181 : vector<8x16xf32> to vector<1x8x16xf32>
    tpu.vector_store %arg9[%c0_128, %c0_129, %c96_130], %184 {strides = array<i32>} : memref<1x36x256xf32, #tpu.memory_space<vmem>>, vector<1x8x16xf32>,
    %cst_131 = arith.constant 5.625000e-01 : f32
    %185 = vector.broadcast %cst_131 : f32 to vector<8x16xf32>
    %186 = arith.mulf %185, %145 : vector<8x16xf32>
    %cst_132 = arith.constant 4.375000e-01 : f32
    %187 = vector.broadcast %cst_132 : f32 to vector<8x16xf32>
    %188 = arith.mulf %187, %148 : vector<8x16xf32>
    %189 = arith.addf %186, %188 : vector<8x16xf32>
    %c0_133 = arith.constant 0 : index
    %c0_134 = arith.constant 0 : index
    %c112_135 = arith.constant 112 : index
    %190 = vector.load %arg9[%c0_133, %c0_134, %c112_135] : memref<1x36x256xf32, #tpu.memory_space<vmem>>, vector<1x8x16xf32>
    %191 = vector.shape_cast %190 : vector<1x8x16xf32> to vector<8x16xf32>
    %192 = vector.shape_cast %189 : vector<8x16xf32> to vector<1x8x16xf32>
    tpu.vector_store %arg9[%c0_133, %c0_134, %c112_135], %192 {strides = array<i32>} : memref<1x36x256xf32, #tpu.memory_space<vmem>>, vector<1x8x16xf32>,
    %cst_136 = arith.constant 4.375000e-01 : f32
    %193 = vector.broadcast %cst_136 : f32 to vector<8x16xf32>
    %194 = arith.mulf %193, %145 : vector<8x16xf32>
    %cst_137 = arith.constant 5.625000e-01 : f32
    %195 = vector.broadcast %cst_137 : f32 to vector<8x16xf32>
    %196 = arith.mulf %195, %148 : vector<8x16xf32>
    %197 = arith.addf %194, %196 : vector<8x16xf32>
    %c0_138 = arith.constant 0 : index
    %c0_139 = arith.constant 0 : index
    %c128_140 = arith.constant 128 : index
    %198 = vector.load %arg9[%c0_138, %c0_139, %c128_140] : memref<1x36x256xf32, #tpu.memory_space<vmem>>, vector<1x8x16xf32>
    %199 = vector.shape_cast %198 : vector<1x8x16xf32> to vector<8x16xf32>
    %200 = vector.shape_cast %197 : vector<8x16xf32> to vector<1x8x16xf32>
    tpu.vector_store %arg9[%c0_138, %c0_139, %c128_140], %200 {strides = array<i32>} : memref<1x36x256xf32, #tpu.memory_space<vmem>>, vector<1x8x16xf32>,
    %cst_141 = arith.constant 3.125000e-01 : f32
    %201 = vector.broadcast %cst_141 : f32 to vector<8x16xf32>
    %202 = arith.mulf %201, %145 : vector<8x16xf32>
    %cst_142 = arith.constant 6.875000e-01 : f32
    %203 = vector.broadcast %cst_142 : f32 to vector<8x16xf32>
    %204 = arith.mulf %203, %148 : vector<8x16xf32>
    %205 = arith.addf %202, %204 : vector<8x16xf32>
    %c0_143 = arith.constant 0 : index
    %c0_144 = arith.constant 0 : index
    %c144_145 = arith.constant 144 : index
    %206 = vector.load %arg9[%c0_143, %c0_144, %c144_145] : memref<1x36x256xf32, #tpu.memory_space<vmem>>, vector<1x8x16xf32>
    %207 = vector.shape_cast %206 : vector<1x8x16xf32> to vector<8x16xf32>
    %208 = vector.shape_cast %205 : vector<8x16xf32> to vector<1x8x16xf32>
    tpu.vector_store %arg9[%c0_143, %c0_144, %c144_145], %208 {strides = array<i32>} : memref<1x36x256xf32, #tpu.memory_space<vmem>>, vector<1x8x16xf32>,
    %cst_146 = arith.constant 1.875000e-01 : f32
    %209 = vector.broadcast %cst_146 : f32 to vector<8x16xf32>
    %210 = arith.mulf %209, %145 : vector<8x16xf32>
    %cst_147 = arith.constant 8.125000e-01 : f32
    %211 = vector.broadcast %cst_147 : f32 to vector<8x16xf32>
    %212 = arith.mulf %211, %148 : vector<8x16xf32>
    %213 = arith.addf %210, %212 : vector<8x16xf32>
    %c0_148 = arith.constant 0 : index
    %c0_149 = arith.constant 0 : index
    %c160 = arith.constant 160 : index
    %214 = vector.load %arg9[%c0_148, %c0_149, %c160] : memref<1x36x256xf32, #tpu.memory_space<vmem>>, vector<1x8x16xf32>
    %215 = vector.shape_cast %214 : vector<1x8x16xf32> to vector<8x16xf32>
    %216 = vector.shape_cast %213 : vector<8x16xf32> to vector<1x8x16xf32>
    tpu.vector_store %arg9[%c0_148, %c0_149, %c160], %216 {strides = array<i32>} : memref<1x36x256xf32, #tpu.memory_space<vmem>>, vector<1x8x16xf32>,
    %cst_150 = arith.constant 6.250000e-02 : f32
    %217 = vector.broadcast %cst_150 : f32 to vector<8x16xf32>
    %218 = arith.mulf %217, %145 : vector<8x16xf32>
    %cst_151 = arith.constant 9.375000e-01 : f32
    %219 = vector.broadcast %cst_151 : f32 to vector<8x16xf32>
    %220 = arith.mulf %219, %148 : vector<8x16xf32>
    %221 = arith.addf %218, %220 : vector<8x16xf32>
    %c0_152 = arith.constant 0 : index
    %c0_153 = arith.constant 0 : index
    %c176 = arith.constant 176 : index
    %222 = vector.load %arg9[%c0_152, %c0_153, %c176] : memref<1x36x256xf32, #tpu.memory_space<vmem>>, vector<1x8x16xf32>
    %223 = vector.shape_cast %222 : vector<1x8x16xf32> to vector<8x16xf32>
    %224 = vector.shape_cast %221 : vector<8x16xf32> to vector<1x8x16xf32>
    tpu.vector_store %arg9[%c0_152, %c0_153, %c176], %224 {strides = array<i32>} : memref<1x36x256xf32, #tpu.memory_space<vmem>>, vector<1x8x16xf32>,
    %c0_154 = arith.constant 0 : index
    %c0_155 = arith.constant 0 : index
    %c192 = arith.constant 192 : index
    %225 = vector.load %arg9[%c0_154, %c0_155, %c192] : memref<1x36x256xf32, #tpu.memory_space<vmem>>, vector<1x8x16xf32>
    %226 = vector.shape_cast %225 : vector<1x8x16xf32> to vector<8x16xf32>
    %227 = vector.shape_cast %148 : vector<8x16xf32> to vector<1x8x16xf32>
    tpu.vector_store %arg9[%c0_154, %c0_155, %c192], %227 {strides = array<i32>} : memref<1x36x256xf32, #tpu.memory_space<vmem>>, vector<1x8x16xf32>,
    %c0_156 = arith.constant 0 : index
    %c0_157 = arith.constant 0 : index
    %c208 = arith.constant 208 : index
    %228 = vector.load %arg9[%c0_156, %c0_157, %c208] : memref<1x36x256xf32, #tpu.memory_space<vmem>>, vector<1x8x16xf32>
    %229 = vector.shape_cast %228 : vector<1x8x16xf32> to vector<8x16xf32>
    %230 = vector.shape_cast %148 : vector<8x16xf32> to vector<1x8x16xf32>
    tpu.vector_store %arg9[%c0_156, %c0_157, %c208], %230 {strides = array<i32>} : memref<1x36x256xf32, #tpu.memory_space<vmem>>, vector<1x8x16xf32>,
    %c0_158 = arith.constant 0 : index
    %c0_159 = arith.constant 0 : index
    %c224 = arith.constant 224 : index
    %231 = vector.load %arg9[%c0_158, %c0_159, %c224] : memref<1x36x256xf32, #tpu.memory_space<vmem>>, vector<1x8x16xf32>
    %232 = vector.shape_cast %231 : vector<1x8x16xf32> to vector<8x16xf32>
    %233 = vector.shape_cast %148 : vector<8x16xf32> to vector<1x8x16xf32>
    tpu.vector_store %arg9[%c0_158, %c0_159, %c224], %233 {strides = array<i32>} : memref<1x36x256xf32, #tpu.memory_space<vmem>>, vector<1x8x16xf32>,
    %c0_160 = arith.constant 0 : index
    %c0_161 = arith.constant 0 : index
    %c240 = arith.constant 240 : index
    %234 = vector.load %arg9[%c0_160, %c0_161, %c240] : memref<1x36x256xf32, #tpu.memory_space<vmem>>, vector<1x8x16xf32>
    %235 = vector.shape_cast %234 : vector<1x8x16xf32> to vector<8x16xf32>
    %236 = vector.shape_cast %148 : vector<8x16xf32> to vector<1x8x16xf32>
    tpu.vector_store %arg9[%c0_160, %c0_161, %c240], %236 {strides = array<i32>} : memref<1x36x256xf32, #tpu.memory_space<vmem>>, vector<1x8x16xf32>,
    %237 = tpu.iota {dimensions = array<i32: 1>} : vector<1x16xi32>
    %c4_i32 = arith.constant 4 : i32
    %c0_i32_162 = arith.constant 0 : i32
    %238 = arith.cmpi eq, %c4_i32, %c0_i32_162 : i32
    %c1_i32_163 = arith.constant 1 : i32
    %239 = arith.select %238, %c1_i32_163, %c4_i32 : i32
    %240 = vector.broadcast %239 : i32 to vector<1x16xi32>
    %241 = arith.remsi %237, %240 : vector<1x16xi32>
    %c0_i32_164 = arith.constant 0 : i32
    %242 = vector.broadcast %c0_i32_164 : i32 to vector<1x16xi32>
    %243 = arith.cmpi ne, %241, %242 : vector<1x16xi32>
    %c0_i32_165 = arith.constant 0 : i32
    %244 = vector.broadcast %c0_i32_165 : i32 to vector<1x16xi32>
    %245 = arith.cmpi slt, %241, %244 : vector<1x16xi32>
    %c0_i32_166 = arith.constant 0 : i32
    %246 = arith.cmpi slt, %239, %c0_i32_166 : i32
    %247 = vector.broadcast %246 : i1 to vector<1x16xi1>
    %248 = vector.broadcast %247 : vector<1x16xi1> to vector<1x16xi1>
    %249 = arith.xori %245, %248 : vector<1x16xi1>
    %250 = arith.andi %249, %243 : vector<1x16xi1>
    %251 = vector.broadcast %239 : i32 to vector<1x16xi32>
    %252 = arith.addi %241, %251 : vector<1x16xi32>
    %253 = arith.select %250, %252, %241 : vector<1x16xi1>, vector<1x16xi32>
    %c0_i32_167 = arith.constant 0 : i32
    %254 = vector.broadcast %c0_i32_167 : i32 to vector<1x16xi32>
    %255 = arith.cmpi ne, %253, %254 : vector<1x16xi32>
    %c3_i32 = arith.constant 3 : i32
    %256 = vector.broadcast %c3_i32 : i32 to vector<1x16xi32>
    %257 = arith.cmpi ne, %253, %256 : vector<1x16xi32>
    %cst_168 = arith.constant 0.000000e+00 : bf16
    %258 = vector.broadcast %cst_168 : bf16 to vector<12x5xbf16>
    %c0_169 = arith.constant 0 : index
    %c0_170 = arith.constant 0 : index
    %259 = vector.load %arg10[%c0_169, %c0_170] : memref<16x82xbf16, #tpu.memory_space<vmem>>, vector<12x5xbf16>
    tpu.vector_store %arg10[%c0_169, %c0_170], %258 {strides = array<i32>} : memref<16x82xbf16, #tpu.memory_space<vmem>>, vector<12x5xbf16>,
    %cst_171 = arith.constant 0.000000e+00 : bf16
    %260 = vector.broadcast %cst_171 : bf16 to vector<12x5xbf16>
    %c0_172 = arith.constant 0 : index
    %c21 = arith.constant 21 : index
    %261 = vector.load %arg10[%c0_172, %c21] : memref<16x82xbf16, #tpu.memory_space<vmem>>, vector<12x5xbf16>
    tpu.vector_store %arg10[%c0_172, %c21], %260 {strides = array<i32>} : memref<16x82xbf16, #tpu.memory_space<vmem>>, vector<12x5xbf16>,
    %c0_173 = arith.constant 0 : index
    %c0_174 = arith.constant 0 : index
    %c0_175 = arith.constant 0 : index
    %262 = vector.load %arg2[%c0_173, %c0_174, %c0_175] : memref<1x12x16xbf16, #tpu.memory_space<vmem>>, vector<1x12x16xbf16>
    %263 = vector.shape_cast %262 : vector<1x12x16xbf16> to vector<12x16xbf16>
    %c0_176 = arith.constant 0 : index
    %c5_177 = arith.constant 5 : index
    %264 = vector.load %arg10[%c0_176, %c5_177] : memref<16x82xbf16, #tpu.memory_space<vmem>>, vector<12x16xbf16>
    tpu.vector_store %arg10[%c0_176, %c5_177], %263 {strides = array<i32>} : memref<16x82xbf16, #tpu.memory_space<vmem>>, vector<12x16xbf16>,
    %c0_178 = arith.constant 0 : index
    %c0_179 = arith.constant 0 : index
    %265 = vector.load %arg10[%c0_178, %c0_179] : memref<16x82xbf16, #tpu.memory_space<vmem>>, vector<12x16xbf16>
    %c0_i32_180 = arith.constant 0 : i32
    %266 = arith.sitofp %c0_i32_180 : i32 to bf16
    %267 = vector.shape_cast %255 : vector<1x16xi1> to vector<1x16xi1>
    %268 = vector.broadcast %267 : vector<1x16xi1> to vector<12x16xi1>
    %269 = vector.broadcast %266 : bf16 to vector<12x16xbf16>
    %270 = arith.select %268, %265, %269 : vector<12x16xi1>, vector<12x16xbf16>
    %c0_181 = arith.constant 0 : index
    %c0_182 = arith.constant 0 : index
    %271 = vector.load %arg12[%c0_181, %c0_182] : memref<144x64xbf16, #tpu.memory_space<vmem>>, vector<12x16xbf16>
    tpu.vector_store %arg12[%c0_181, %c0_182], %270 {strides = array<i32>} : memref<144x64xbf16, #tpu.memory_space<vmem>>, vector<12x16xbf16>,
    %c0_183 = arith.constant 0 : index
    %c1_184 = arith.constant 1 : index
    %272 = vector.load %arg10[%c0_183, %c1_184] : memref<16x82xbf16, #tpu.memory_space<vmem>>, vector<12x16xbf16>
    %c12 = arith.constant 12 : index
    %c0_185 = arith.constant 0 : index
    %273 = vector.load %arg12[%c12, %c0_185] : memref<144x64xbf16, #tpu.memory_space<vmem>>, vector<12x16xbf16>
    tpu.vector_store %arg12[%c12, %c0_185], %272 {strides = array<i32>} : memref<144x64xbf16, #tpu.memory_space<vmem>>, vector<12x16xbf16>,
    %c0_186 = arith.constant 0 : index
    %c2_187 = arith.constant 2 : index
    %274 = vector.load %arg10[%c0_186, %c2_187] : memref<16x82xbf16, #tpu.memory_space<vmem>>, vector<12x16xbf16>
    %c0_i32_188 = arith.constant 0 : i32
    %275 = arith.sitofp %c0_i32_188 : i32 to bf16
    %276 = vector.shape_cast %257 : vector<1x16xi1> to vector<1x16xi1>
    %277 = vector.broadcast %276 : vector<1x16xi1> to vector<12x16xi1>
    %278 = vector.broadcast %275 : bf16 to vector<12x16xbf16>
    %279 = arith.select %277, %274, %278 : vector<12x16xi1>, vector<12x16xbf16>
    %c24_189 = arith.constant 24 : index
    %c0_190 = arith.constant 0 : index
    %280 = vector.load %arg12[%c24_189, %c0_190] : memref<144x64xbf16, #tpu.memory_space<vmem>>, vector<12x16xbf16>
    tpu.vector_store %arg12[%c24_189, %c0_190], %279 {strides = array<i32>} : memref<144x64xbf16, #tpu.memory_space<vmem>>, vector<12x16xbf16>,
    %c0_191 = arith.constant 0 : index
    %c4_192 = arith.constant 4 : index
    %281 = vector.load %arg10[%c0_191, %c4_192] : memref<16x82xbf16, #tpu.memory_space<vmem>>, vector<12x16xbf16>
    %c0_i32_193 = arith.constant 0 : i32
    %282 = arith.sitofp %c0_i32_193 : i32 to bf16
    %283 = vector.shape_cast %255 : vector<1x16xi1> to vector<1x16xi1>
    %284 = vector.broadcast %283 : vector<1x16xi1> to vector<12x16xi1>
    %285 = vector.broadcast %282 : bf16 to vector<12x16xbf16>
    %286 = arith.select %284, %281, %285 : vector<12x16xi1>, vector<12x16xbf16>
    %c36 = arith.constant 36 : index
    %c0_194 = arith.constant 0 : index
    %287 = vector.load %arg12[%c36, %c0_194] : memref<144x64xbf16, #tpu.memory_space<vmem>>, vector<12x16xbf16>
    tpu.vector_store %arg12[%c36, %c0_194], %286 {strides = array<i32>} : memref<144x64xbf16, #tpu.memory_space<vmem>>, vector<12x16xbf16>,
    %c0_195 = arith.constant 0 : index
    %c5_196 = arith.constant 5 : index
    %288 = vector.load %arg10[%c0_195, %c5_196] : memref<16x82xbf16, #tpu.memory_space<vmem>>, vector<12x16xbf16>
    %c48_197 = arith.constant 48 : index
    %c0_198 = arith.constant 0 : index
    %289 = vector.load %arg12[%c48_197, %c0_198] : memref<144x64xbf16, #tpu.memory_space<vmem>>, vector<12x16xbf16>
    tpu.vector_store %arg12[%c48_197, %c0_198], %288 {strides = array<i32>} : memref<144x64xbf16, #tpu.memory_space<vmem>>, vector<12x16xbf16>,
    %c0_199 = arith.constant 0 : index
    %c6_200 = arith.constant 6 : index
    %290 = vector.load %arg10[%c0_199, %c6_200] : memref<16x82xbf16, #tpu.memory_space<vmem>>, vector<12x16xbf16>
    %c0_i32_201 = arith.constant 0 : i32
    %291 = arith.sitofp %c0_i32_201 : i32 to bf16
    %292 = vector.shape_cast %257 : vector<1x16xi1> to vector<1x16xi1>
    %293 = vector.broadcast %292 : vector<1x16xi1> to vector<12x16xi1>
    %294 = vector.broadcast %291 : bf16 to vector<12x16xbf16>
    %295 = arith.select %293, %290, %294 : vector<12x16xi1>, vector<12x16xbf16>
    %c60 = arith.constant 60 : index
    %c0_202 = arith.constant 0 : index
    %296 = vector.load %arg12[%c60, %c0_202] : memref<144x64xbf16, #tpu.memory_space<vmem>>, vector<12x16xbf16>
    tpu.vector_store %arg12[%c60, %c0_202], %295 {strides = array<i32>} : memref<144x64xbf16, #tpu.memory_space<vmem>>, vector<12x16xbf16>,
    %c0_203 = arith.constant 0 : index
    %c8_204 = arith.constant 8 : index
    %297 = vector.load %arg10[%c0_203, %c8_204] : memref<16x82xbf16, #tpu.memory_space<vmem>>, vector<12x16xbf16>
    %c0_i32_205 = arith.constant 0 : i32
    %298 = arith.sitofp %c0_i32_205 : i32 to bf16
    %299 = vector.shape_cast %255 : vector<1x16xi1> to vector<1x16xi1>
    %300 = vector.broadcast %299 : vector<1x16xi1> to vector<12x16xi1>
    %301 = vector.broadcast %298 : bf16 to vector<12x16xbf16>
    %302 = arith.select %300, %297, %301 : vector<12x16xi1>, vector<12x16xbf16>
    %c72 = arith.constant 72 : index
    %c0_206 = arith.constant 0 : index
    %303 = vector.load %arg12[%c72, %c0_206] : memref<144x64xbf16, #tpu.memory_space<vmem>>, vector<12x16xbf16>
    tpu.vector_store %arg12[%c72, %c0_206], %302 {strides = array<i32>} : memref<144x64xbf16, #tpu.memory_space<vmem>>, vector<12x16xbf16>,
    %c0_207 = arith.constant 0 : index
    %c9 = arith.constant 9 : index
    %304 = vector.load %arg10[%c0_207, %c9] : memref<16x82xbf16, #tpu.memory_space<vmem>>, vector<12x16xbf16>
    %c84 = arith.constant 84 : index
    %c0_208 = arith.constant 0 : index
    %305 = vector.load %arg12[%c84, %c0_208] : memref<144x64xbf16, #tpu.memory_space<vmem>>, vector<12x16xbf16>
    tpu.vector_store %arg12[%c84, %c0_208], %304 {strides = array<i32>} : memref<144x64xbf16, #tpu.memory_space<vmem>>, vector<12x16xbf16>,
    %c0_209 = arith.constant 0 : index
    %c10 = arith.constant 10 : index
    %306 = vector.load %arg10[%c0_209, %c10] : memref<16x82xbf16, #tpu.memory_space<vmem>>, vector<12x16xbf16>
    %c0_i32_210 = arith.constant 0 : i32
    %307 = arith.sitofp %c0_i32_210 : i32 to bf16
    %308 = vector.shape_cast %257 : vector<1x16xi1> to vector<1x16xi1>
    %309 = vector.broadcast %308 : vector<1x16xi1> to vector<12x16xi1>
    %310 = vector.broadcast %307 : bf16 to vector<12x16xbf16>
    %311 = arith.select %309, %306, %310 : vector<12x16xi1>, vector<12x16xbf16>
    %c96_211 = arith.constant 96 : index
    %c0_212 = arith.constant 0 : index
    %312 = vector.load %arg12[%c96_211, %c0_212] : memref<144x64xbf16, #tpu.memory_space<vmem>>, vector<12x16xbf16>
    tpu.vector_store %arg12[%c96_211, %c0_212], %311 {strides = array<i32>} : memref<144x64xbf16, #tpu.memory_space<vmem>>, vector<12x16xbf16>,
    %c0_213 = arith.constant 0 : index
    %c216 = arith.constant 216 : index
    %313 = vector.load %arg6[%c0_213, %c216] : memref<8x684xbf16, #tpu.memory_space<vmem>>, vector<8x108xbf16>
    %c0_214 = arith.constant 0 : index
    %c0_215 = arith.constant 0 : index
    %314 = vector.load %arg12[%c0_214, %c0_215] : memref<144x64xbf16, #tpu.memory_space<vmem>>, vector<108x16xbf16>
    %cst_216 = arith.constant dense<0.000000e+00> : vector<8x16xf32>
    %315 = tpu.matmul %313, %314, %cst_216 {dimension_numbers = #tpu.dot_dimension_numbers<[1], [0], [0], [1], [0, 0, 1, 1], [], []>} : vector<8x108xbf16>, vector<108x16xbf16>, vector<8x16xf32> -> vector<8x16xf32>
    %c0_217 = arith.constant 0 : index
    %c2_218 = arith.constant 2 : index
    %316 = vector.load %arg7[%c0_217, %c2_218] : memref<8x8xf32, #tpu.memory_space<vmem>>, vector<8x1xf32>
    %317 = vector.broadcast %316 : vector<8x1xf32> to vector<8x16xf32>
    %318 = arith.addf %315, %317 : vector<8x16xf32>
    %cst_219 = arith.constant 0.000000e+00 : bf16
    %319 = vector.broadcast %cst_219 : bf16 to vector<8x5xbf16>
    %c0_220 = arith.constant 0 : index
    %c0_221 = arith.constant 0 : index
    %320 = vector.load %arg11[%c0_220, %c0_221] : memref<8x82xbf16, #tpu.memory_space<vmem>>, vector<8x5xbf16>
    tpu.vector_store %arg11[%c0_220, %c0_221], %319 {strides = array<i32>} : memref<8x82xbf16, #tpu.memory_space<vmem>>, vector<8x5xbf16>,
    %cst_222 = arith.constant 0.000000e+00 : bf16
    %321 = vector.broadcast %cst_222 : bf16 to vector<8x5xbf16>
    %c0_223 = arith.constant 0 : index
    %c21_224 = arith.constant 21 : index
    %322 = vector.load %arg11[%c0_223, %c21_224] : memref<8x82xbf16, #tpu.memory_space<vmem>>, vector<8x5xbf16>
    tpu.vector_store %arg11[%c0_223, %c21_224], %321 {strides = array<i32>} : memref<8x82xbf16, #tpu.memory_space<vmem>>, vector<8x5xbf16>,
    %323 = arith.truncf %318 : vector<8x16xf32> to vector<8x16xbf16>
    %c0_225 = arith.constant 0 : index
    %c5_226 = arith.constant 5 : index
    %324 = vector.load %arg11[%c0_225, %c5_226] : memref<8x82xbf16, #tpu.memory_space<vmem>>, vector<8x16xbf16>
    tpu.vector_store %arg11[%c0_225, %c5_226], %323 {strides = array<i32>} : memref<8x82xbf16, #tpu.memory_space<vmem>>, vector<8x16xbf16>,
    %c0_227 = arith.constant 0 : index
    %c0_228 = arith.constant 0 : index
    %325 = vector.load %arg11[%c0_227, %c0_228] : memref<8x82xbf16, #tpu.memory_space<vmem>>, vector<8x16xbf16>
    %c0_i32_229 = arith.constant 0 : i32
    %326 = arith.sitofp %c0_i32_229 : i32 to bf16
    %327 = vector.shape_cast %255 : vector<1x16xi1> to vector<1x16xi1>
    %328 = vector.broadcast %327 : vector<1x16xi1> to vector<8x16xi1>
    %329 = vector.broadcast %326 : bf16 to vector<8x16xbf16>
    %330 = arith.select %328, %325, %329 : vector<8x16xi1>, vector<8x16xbf16>
    %c0_230 = arith.constant 0 : index
    %c0_231 = arith.constant 0 : index
    %331 = vector.load %arg12[%c0_230, %c0_231] : memref<144x64xbf16, #tpu.memory_space<vmem>>, vector<8x16xbf16>
    tpu.vector_store %arg12[%c0_230, %c0_231], %330 {strides = array<i32>} : memref<144x64xbf16, #tpu.memory_space<vmem>>, vector<8x16xbf16>,
    %c0_232 = arith.constant 0 : index
    %c1_233 = arith.constant 1 : index
    %332 = vector.load %arg11[%c0_232, %c1_233] : memref<8x82xbf16, #tpu.memory_space<vmem>>, vector<8x16xbf16>
    %c8_234 = arith.constant 8 : index
    %c0_235 = arith.constant 0 : index
    %333 = vector.load %arg12[%c8_234, %c0_235] : memref<144x64xbf16, #tpu.memory_space<vmem>>, vector<8x16xbf16>
    tpu.vector_store %arg12[%c8_234, %c0_235], %332 {strides = array<i32>} : memref<144x64xbf16, #tpu.memory_space<vmem>>, vector<8x16xbf16>,
    %c0_236 = arith.constant 0 : index
    %c2_237 = arith.constant 2 : index
    %334 = vector.load %arg11[%c0_236, %c2_237] : memref<8x82xbf16, #tpu.memory_space<vmem>>, vector<8x16xbf16>
    %c0_i32_238 = arith.constant 0 : i32
    %335 = arith.sitofp %c0_i32_238 : i32 to bf16
    %336 = vector.shape_cast %257 : vector<1x16xi1> to vector<1x16xi1>
    %337 = vector.broadcast %336 : vector<1x16xi1> to vector<8x16xi1>
    %338 = vector.broadcast %335 : bf16 to vector<8x16xbf16>
    %339 = arith.select %337, %334, %338 : vector<8x16xi1>, vector<8x16xbf16>
    %c16_239 = arith.constant 16 : index
    %c0_240 = arith.constant 0 : index
    %340 = vector.load %arg12[%c16_239, %c0_240] : memref<144x64xbf16, #tpu.memory_space<vmem>>, vector<8x16xbf16>
    tpu.vector_store %arg12[%c16_239, %c0_240], %339 {strides = array<i32>} : memref<144x64xbf16, #tpu.memory_space<vmem>>, vector<8x16xbf16>,
    %c0_241 = arith.constant 0 : index
    %c4_242 = arith.constant 4 : index
    %341 = vector.load %arg11[%c0_241, %c4_242] : memref<8x82xbf16, #tpu.memory_space<vmem>>, vector<8x16xbf16>
    %c0_i32_243 = arith.constant 0 : i32
    %342 = arith.sitofp %c0_i32_243 : i32 to bf16
    %343 = vector.shape_cast %255 : vector<1x16xi1> to vector<1x16xi1>
    %344 = vector.broadcast %343 : vector<1x16xi1> to vector<8x16xi1>
    %345 = vector.broadcast %342 : bf16 to vector<8x16xbf16>
    %346 = arith.select %344, %341, %345 : vector<8x16xi1>, vector<8x16xbf16>
    %c24_244 = arith.constant 24 : index
    %c0_245 = arith.constant 0 : index
    %347 = vector.load %arg12[%c24_244, %c0_245] : memref<144x64xbf16, #tpu.memory_space<vmem>>, vector<8x16xbf16>
    tpu.vector_store %arg12[%c24_244, %c0_245], %346 {strides = array<i32>} : memref<144x64xbf16, #tpu.memory_space<vmem>>, vector<8x16xbf16>,
    %c0_246 = arith.constant 0 : index
    %c5_247 = arith.constant 5 : index
    %348 = vector.load %arg11[%c0_246, %c5_247] : memref<8x82xbf16, #tpu.memory_space<vmem>>, vector<8x16xbf16>
    %c32_248 = arith.constant 32 : index
    %c0_249 = arith.constant 0 : index
    %349 = vector.load %arg12[%c32_248, %c0_249] : memref<144x64xbf16, #tpu.memory_space<vmem>>, vector<8x16xbf16>
    tpu.vector_store %arg12[%c32_248, %c0_249], %348 {strides = array<i32>} : memref<144x64xbf16, #tpu.memory_space<vmem>>, vector<8x16xbf16>,
    %c0_250 = arith.constant 0 : index
    %c6_251 = arith.constant 6 : index
    %350 = vector.load %arg11[%c0_250, %c6_251] : memref<8x82xbf16, #tpu.memory_space<vmem>>, vector<8x16xbf16>
    %c0_i32_252 = arith.constant 0 : i32
    %351 = arith.sitofp %c0_i32_252 : i32 to bf16
    %352 = vector.shape_cast %257 : vector<1x16xi1> to vector<1x16xi1>
    %353 = vector.broadcast %352 : vector<1x16xi1> to vector<8x16xi1>
    %354 = vector.broadcast %351 : bf16 to vector<8x16xbf16>
    %355 = arith.select %353, %350, %354 : vector<8x16xi1>, vector<8x16xbf16>
    %c40_253 = arith.constant 40 : index
    %c0_254 = arith.constant 0 : index
    %356 = vector.load %arg12[%c40_253, %c0_254] : memref<144x64xbf16, #tpu.memory_space<vmem>>, vector<8x16xbf16>
    tpu.vector_store %arg12[%c40_253, %c0_254], %355 {strides = array<i32>} : memref<144x64xbf16, #tpu.memory_space<vmem>>, vector<8x16xbf16>,
    %c0_255 = arith.constant 0 : index
    %c8_256 = arith.constant 8 : index
    %357 = vector.load %arg11[%c0_255, %c8_256] : memref<8x82xbf16, #tpu.memory_space<vmem>>, vector<8x16xbf16>
    %c0_i32_257 = arith.constant 0 : i32
    %358 = arith.sitofp %c0_i32_257 : i32 to bf16
    %359 = vector.shape_cast %255 : vector<1x16xi1> to vector<1x16xi1>
    %360 = vector.broadcast %359 : vector<1x16xi1> to vector<8x16xi1>
    %361 = vector.broadcast %358 : bf16 to vector<8x16xbf16>
    %362 = arith.select %360, %357, %361 : vector<8x16xi1>, vector<8x16xbf16>
    %c48_258 = arith.constant 48 : index
    %c0_259 = arith.constant 0 : index
    %363 = vector.load %arg12[%c48_258, %c0_259] : memref<144x64xbf16, #tpu.memory_space<vmem>>, vector<8x16xbf16>
    tpu.vector_store %arg12[%c48_258, %c0_259], %362 {strides = array<i32>} : memref<144x64xbf16, #tpu.memory_space<vmem>>, vector<8x16xbf16>,
    %c0_260 = arith.constant 0 : index
    %c9_261 = arith.constant 9 : index
    %364 = vector.load %arg11[%c0_260, %c9_261] : memref<8x82xbf16, #tpu.memory_space<vmem>>, vector<8x16xbf16>
    %c56_262 = arith.constant 56 : index
    %c0_263 = arith.constant 0 : index
    %365 = vector.load %arg12[%c56_262, %c0_263] : memref<144x64xbf16, #tpu.memory_space<vmem>>, vector<8x16xbf16>
    tpu.vector_store %arg12[%c56_262, %c0_263], %364 {strides = array<i32>} : memref<144x64xbf16, #tpu.memory_space<vmem>>, vector<8x16xbf16>,
    %c0_264 = arith.constant 0 : index
    %c10_265 = arith.constant 10 : index
    %366 = vector.load %arg11[%c0_264, %c10_265] : memref<8x82xbf16, #tpu.memory_space<vmem>>, vector<8x16xbf16>
    %c0_i32_266 = arith.constant 0 : i32
    %367 = arith.sitofp %c0_i32_266 : i32 to bf16
    %368 = vector.shape_cast %257 : vector<1x16xi1> to vector<1x16xi1>
    %369 = vector.broadcast %368 : vector<1x16xi1> to vector<8x16xi1>
    %370 = vector.broadcast %367 : bf16 to vector<8x16xbf16>
    %371 = arith.select %369, %366, %370 : vector<8x16xi1>, vector<8x16xbf16>
    %c64_267 = arith.constant 64 : index
    %c0_268 = arith.constant 0 : index
    %372 = vector.load %arg12[%c64_267, %c0_268] : memref<144x64xbf16, #tpu.memory_space<vmem>>, vector<8x16xbf16>
    tpu.vector_store %arg12[%c64_267, %c0_268], %371 {strides = array<i32>} : memref<144x64xbf16, #tpu.memory_space<vmem>>, vector<8x16xbf16>,
    %c0_269 = arith.constant 0 : index
    %c324 = arith.constant 324 : index
    %373 = vector.load %arg6[%c0_269, %c324] : memref<8x684xbf16, #tpu.memory_space<vmem>>, vector<8x72xbf16>
    %c0_270 = arith.constant 0 : index
    %c0_271 = arith.constant 0 : index
    %374 = vector.load %arg12[%c0_270, %c0_271] : memref<144x64xbf16, #tpu.memory_space<vmem>>, vector<72x16xbf16>
    %cst_272 = arith.constant dense<0.000000e+00> : vector<8x16xf32>
    %375 = tpu.matmul %373, %374, %cst_272 {dimension_numbers = #tpu.dot_dimension_numbers<[1], [0], [0], [1], [0, 0, 1, 1], [], []>} : vector<8x72xbf16>, vector<72x16xbf16>, vector<8x16xf32> -> vector<8x16xf32>
    %c0_273 = arith.constant 0 : index
    %c3_274 = arith.constant 3 : index
    %376 = vector.load %arg7[%c0_273, %c3_274] : memref<8x8xf32, #tpu.memory_space<vmem>>, vector<8x1xf32>
    %377 = vector.broadcast %376 : vector<8x1xf32> to vector<8x16xf32>
    %378 = arith.addf %375, %377 : vector<8x16xf32>
    %c0_275 = arith.constant 0 : index
    %c16_276 = arith.constant 16 : index
    %379 = vector.load %arg8[%c0_275, %c16_276] : memref<8x64xbf16, #tpu.memory_space<vmem>>, vector<4x16xbf16>
    %380 = vector.extract_strided_slice %378 {offsets = [0, 0], sizes = [8, 4], strides = [1, 1]} : vector<8x16xf32> to vector<8x4xf32>
    %381 = arith.truncf %380 : vector<8x4xf32> to vector<8x4xbf16>
    %cst_277 = arith.constant dense<0.000000e+00> : vector<8x16xf32>
    %382 = tpu.matmul %381, %379, %cst_277 {dimension_numbers = #tpu.dot_dimension_numbers<[1], [0], [0], [1], [0, 0, 1, 1], [], []>} : vector<8x4xbf16>, vector<4x16xbf16>, vector<8x16xf32> -> vector<8x16xf32>
    %383 = vector.extract_strided_slice %378 {offsets = [0, 4], sizes = [8, 4], strides = [1, 1]} : vector<8x16xf32> to vector<8x4xf32>
    %384 = arith.truncf %383 : vector<8x4xf32> to vector<8x4xbf16>
    %cst_278 = arith.constant dense<0.000000e+00> : vector<8x16xf32>
    %385 = tpu.matmul %384, %379, %cst_278 {dimension_numbers = #tpu.dot_dimension_numbers<[1], [0], [0], [1], [0, 0, 1, 1], [], []>} : vector<8x4xbf16>, vector<4x16xbf16>, vector<8x16xf32> -> vector<8x16xf32>
    %386 = vector.extract_strided_slice %378 {offsets = [0, 8], sizes = [8, 4], strides = [1, 1]} : vector<8x16xf32> to vector<8x4xf32>
    %387 = arith.truncf %386 : vector<8x4xf32> to vector<8x4xbf16>
    %cst_279 = arith.constant dense<0.000000e+00> : vector<8x16xf32>
    %388 = tpu.matmul %387, %379, %cst_279 {dimension_numbers = #tpu.dot_dimension_numbers<[1], [0], [0], [1], [0, 0, 1, 1], [], []>} : vector<8x4xbf16>, vector<4x16xbf16>, vector<8x16xf32> -> vector<8x16xf32>
    %389 = vector.extract_strided_slice %378 {offsets = [0, 12], sizes = [8, 4], strides = [1, 1]} : vector<8x16xf32> to vector<8x4xf32>
    %390 = arith.truncf %389 : vector<8x4xf32> to vector<8x4xbf16>
    %cst_280 = arith.constant dense<0.000000e+00> : vector<8x16xf32>
    %391 = tpu.matmul %390, %379, %cst_280 {dimension_numbers = #tpu.dot_dimension_numbers<[1], [0], [0], [1], [0, 0, 1, 1], [], []>} : vector<8x4xbf16>, vector<4x16xbf16>, vector<8x16xf32> -> vector<8x16xf32>
    %c0_281 = arith.constant 0 : index
    %c8_282 = arith.constant 8 : index
    %c0_283 = arith.constant 0 : index
    %392 = vector.load %arg9[%c0_281, %c8_282, %c0_283] : memref<1x36x256xf32, #tpu.memory_space<vmem>>, vector<1x8x16xf32>
    %393 = vector.shape_cast %392 : vector<1x8x16xf32> to vector<8x16xf32>
    %394 = vector.shape_cast %382 : vector<8x16xf32> to vector<1x8x16xf32>
    tpu.vector_store %arg9[%c0_281, %c8_282, %c0_283], %394 {strides = array<i32>} : memref<1x36x256xf32, #tpu.memory_space<vmem>>, vector<1x8x16xf32>,
    %c0_284 = arith.constant 0 : index
    %c8_285 = arith.constant 8 : index
    %c16_286 = arith.constant 16 : index
    %395 = vector.load %arg9[%c0_284, %c8_285, %c16_286] : memref<1x36x256xf32, #tpu.memory_space<vmem>>, vector<1x8x16xf32>
    %396 = vector.shape_cast %395 : vector<1x8x16xf32> to vector<8x16xf32>
    %397 = vector.shape_cast %382 : vector<8x16xf32> to vector<1x8x16xf32>
    tpu.vector_store %arg9[%c0_284, %c8_285, %c16_286], %397 {strides = array<i32>} : memref<1x36x256xf32, #tpu.memory_space<vmem>>, vector<1x8x16xf32>,
    %cst_287 = arith.constant 8.750000e-01 : f32
    %398 = vector.broadcast %cst_287 : f32 to vector<8x16xf32>
    %399 = arith.mulf %398, %382 : vector<8x16xf32>
    %cst_288 = arith.constant 1.250000e-01 : f32
    %400 = vector.broadcast %cst_288 : f32 to vector<8x16xf32>
    %401 = arith.mulf %400, %385 : vector<8x16xf32>
    %402 = arith.addf %399, %401 : vector<8x16xf32>
    %c0_289 = arith.constant 0 : index
    %c8_290 = arith.constant 8 : index
    %c32_291 = arith.constant 32 : index
    %403 = vector.load %arg9[%c0_289, %c8_290, %c32_291] : memref<1x36x256xf32, #tpu.memory_space<vmem>>, vector<1x8x16xf32>
    %404 = vector.shape_cast %403 : vector<1x8x16xf32> to vector<8x16xf32>
    %405 = vector.shape_cast %402 : vector<8x16xf32> to vector<1x8x16xf32>
    tpu.vector_store %arg9[%c0_289, %c8_290, %c32_291], %405 {strides = array<i32>} : memref<1x36x256xf32, #tpu.memory_space<vmem>>, vector<1x8x16xf32>,
    %cst_292 = arith.constant 6.250000e-01 : f32
    %406 = vector.broadcast %cst_292 : f32 to vector<8x16xf32>
    %407 = arith.mulf %406, %382 : vector<8x16xf32>
    %cst_293 = arith.constant 3.750000e-01 : f32
    %408 = vector.broadcast %cst_293 : f32 to vector<8x16xf32>
    %409 = arith.mulf %408, %385 : vector<8x16xf32>
    %410 = arith.addf %407, %409 : vector<8x16xf32>
    %c0_294 = arith.constant 0 : index
    %c8_295 = arith.constant 8 : index
    %c48_296 = arith.constant 48 : index
    %411 = vector.load %arg9[%c0_294, %c8_295, %c48_296] : memref<1x36x256xf32, #tpu.memory_space<vmem>>, vector<1x8x16xf32>
    %412 = vector.shape_cast %411 : vector<1x8x16xf32> to vector<8x16xf32>
    %413 = vector.shape_cast %410 : vector<8x16xf32> to vector<1x8x16xf32>
    tpu.vector_store %arg9[%c0_294, %c8_295, %c48_296], %413 {strides = array<i32>} : memref<1x36x256xf32, #tpu.memory_space<vmem>>, vector<1x8x16xf32>,
    %cst_297 = arith.constant 3.750000e-01 : f32
    %414 = vector.broadcast %cst_297 : f32 to vector<8x16xf32>
    %415 = arith.mulf %414, %382 : vector<8x16xf32>
    %cst_298 = arith.constant 6.250000e-01 : f32
    %416 = vector.broadcast %cst_298 : f32 to vector<8x16xf32>
    %417 = arith.mulf %416, %385 : vector<8x16xf32>
    %418 = arith.addf %415, %417 : vector<8x16xf32>
    %c0_299 = arith.constant 0 : index
    %c8_300 = arith.constant 8 : index
    %c64_301 = arith.constant 64 : index
    %419 = vector.load %arg9[%c0_299, %c8_300, %c64_301] : memref<1x36x256xf32, #tpu.memory_space<vmem>>, vector<1x8x16xf32>
    %420 = vector.shape_cast %419 : vector<1x8x16xf32> to vector<8x16xf32>
    %421 = vector.shape_cast %418 : vector<8x16xf32> to vector<1x8x16xf32>
    tpu.vector_store %arg9[%c0_299, %c8_300, %c64_301], %421 {strides = array<i32>} : memref<1x36x256xf32, #tpu.memory_space<vmem>>, vector<1x8x16xf32>,
    %cst_302 = arith.constant 1.250000e-01 : f32
    %422 = vector.broadcast %cst_302 : f32 to vector<8x16xf32>
    %423 = arith.mulf %422, %382 : vector<8x16xf32>
    %cst_303 = arith.constant 8.750000e-01 : f32
    %424 = vector.broadcast %cst_303 : f32 to vector<8x16xf32>
    %425 = arith.mulf %424, %385 : vector<8x16xf32>
    %426 = arith.addf %423, %425 : vector<8x16xf32>
    %c0_304 = arith.constant 0 : index
    %c8_305 = arith.constant 8 : index
    %c80_306 = arith.constant 80 : index
    %427 = vector.load %arg9[%c0_304, %c8_305, %c80_306] : memref<1x36x256xf32, #tpu.memory_space<vmem>>, vector<1x8x16xf32>
    %428 = vector.shape_cast %427 : vector<1x8x16xf32> to vector<8x16xf32>
    %429 = vector.shape_cast %426 : vector<8x16xf32> to vector<1x8x16xf32>
    tpu.vector_store %arg9[%c0_304, %c8_305, %c80_306], %429 {strides = array<i32>} : memref<1x36x256xf32, #tpu.memory_space<vmem>>, vector<1x8x16xf32>,
    %cst_307 = arith.constant 8.750000e-01 : f32
    %430 = vector.broadcast %cst_307 : f32 to vector<8x16xf32>
    %431 = arith.mulf %430, %385 : vector<8x16xf32>
    %cst_308 = arith.constant 1.250000e-01 : f32
    %432 = vector.broadcast %cst_308 : f32 to vector<8x16xf32>
    %433 = arith.mulf %432, %388 : vector<8x16xf32>
    %434 = arith.addf %431, %433 : vector<8x16xf32>
    %c0_309 = arith.constant 0 : index
    %c8_310 = arith.constant 8 : index
    %c96_311 = arith.constant 96 : index
    %435 = vector.load %arg9[%c0_309, %c8_310, %c96_311] : memref<1x36x256xf32, #tpu.memory_space<vmem>>, vector<1x8x16xf32>
    %436 = vector.shape_cast %435 : vector<1x8x16xf32> to vector<8x16xf32>
    %437 = vector.shape_cast %434 : vector<8x16xf32> to vector<1x8x16xf32>
    tpu.vector_store %arg9[%c0_309, %c8_310, %c96_311], %437 {strides = array<i32>} : memref<1x36x256xf32, #tpu.memory_space<vmem>>, vector<1x8x16xf32>,
    %cst_312 = arith.constant 6.250000e-01 : f32
    %438 = vector.broadcast %cst_312 : f32 to vector<8x16xf32>
    %439 = arith.mulf %438, %385 : vector<8x16xf32>
    %cst_313 = arith.constant 3.750000e-01 : f32
    %440 = vector.broadcast %cst_313 : f32 to vector<8x16xf32>
    %441 = arith.mulf %440, %388 : vector<8x16xf32>
    %442 = arith.addf %439, %441 : vector<8x16xf32>
    %c0_314 = arith.constant 0 : index
    %c8_315 = arith.constant 8 : index
    %c112_316 = arith.constant 112 : index
    %443 = vector.load %arg9[%c0_314, %c8_315, %c112_316] : memref<1x36x256xf32, #tpu.memory_space<vmem>>, vector<1x8x16xf32>
    %444 = vector.shape_cast %443 : vector<1x8x16xf32> to vector<8x16xf32>
    %445 = vector.shape_cast %442 : vector<8x16xf32> to vector<1x8x16xf32>
    tpu.vector_store %arg9[%c0_314, %c8_315, %c112_316], %445 {strides = array<i32>} : memref<1x36x256xf32, #tpu.memory_space<vmem>>, vector<1x8x16xf32>,
    %cst_317 = arith.constant 3.750000e-01 : f32
    %446 = vector.broadcast %cst_317 : f32 to vector<8x16xf32>
    %447 = arith.mulf %446, %385 : vector<8x16xf32>
    %cst_318 = arith.constant 6.250000e-01 : f32
    %448 = vector.broadcast %cst_318 : f32 to vector<8x16xf32>
    %449 = arith.mulf %448, %388 : vector<8x16xf32>
    %450 = arith.addf %447, %449 : vector<8x16xf32>
    %c0_319 = arith.constant 0 : index
    %c8_320 = arith.constant 8 : index
    %c128_321 = arith.constant 128 : index
    %451 = vector.load %arg9[%c0_319, %c8_320, %c128_321] : memref<1x36x256xf32, #tpu.memory_space<vmem>>, vector<1x8x16xf32>
    %452 = vector.shape_cast %451 : vector<1x8x16xf32> to vector<8x16xf32>
    %453 = vector.shape_cast %450 : vector<8x16xf32> to vector<1x8x16xf32>
    tpu.vector_store %arg9[%c0_319, %c8_320, %c128_321], %453 {strides = array<i32>} : memref<1x36x256xf32, #tpu.memory_space<vmem>>, vector<1x8x16xf32>,
    %cst_322 = arith.constant 1.250000e-01 : f32
    %454 = vector.broadcast %cst_322 : f32 to vector<8x16xf32>
    %455 = arith.mulf %454, %385 : vector<8x16xf32>
    %cst_323 = arith.constant 8.750000e-01 : f32
    %456 = vector.broadcast %cst_323 : f32 to vector<8x16xf32>
    %457 = arith.mulf %456, %388 : vector<8x16xf32>
    %458 = arith.addf %455, %457 : vector<8x16xf32>
    %c0_324 = arith.constant 0 : index
    %c8_325 = arith.constant 8 : index
    %c144_326 = arith.constant 144 : index
    %459 = vector.load %arg9[%c0_324, %c8_325, %c144_326] : memref<1x36x256xf32, #tpu.memory_space<vmem>>, vector<1x8x16xf32>
    %460 = vector.shape_cast %459 : vector<1x8x16xf32> to vector<8x16xf32>
    %461 = vector.shape_cast %458 : vector<8x16xf32> to vector<1x8x16xf32>
    tpu.vector_store %arg9[%c0_324, %c8_325, %c144_326], %461 {strides = array<i32>} : memref<1x36x256xf32, #tpu.memory_space<vmem>>, vector<1x8x16xf32>,
    %cst_327 = arith.constant 8.750000e-01 : f32
    %462 = vector.broadcast %cst_327 : f32 to vector<8x16xf32>
    %463 = arith.mulf %462, %388 : vector<8x16xf32>
    %cst_328 = arith.constant 1.250000e-01 : f32
    %464 = vector.broadcast %cst_328 : f32 to vector<8x16xf32>
    %465 = arith.mulf %464, %391 : vector<8x16xf32>
    %466 = arith.addf %463, %465 : vector<8x16xf32>
    %c0_329 = arith.constant 0 : index
    %c8_330 = arith.constant 8 : index
    %c160_331 = arith.constant 160 : index
    %467 = vector.load %arg9[%c0_329, %c8_330, %c160_331] : memref<1x36x256xf32, #tpu.memory_space<vmem>>, vector<1x8x16xf32>
    %468 = vector.shape_cast %467 : vector<1x8x16xf32> to vector<8x16xf32>
    %469 = vector.shape_cast %466 : vector<8x16xf32> to vector<1x8x16xf32>
    tpu.vector_store %arg9[%c0_329, %c8_330, %c160_331], %469 {strides = array<i32>} : memref<1x36x256xf32, #tpu.memory_space<vmem>>, vector<1x8x16xf32>,
    %cst_332 = arith.constant 6.250000e-01 : f32
    %470 = vector.broadcast %cst_332 : f32 to vector<8x16xf32>
    %471 = arith.mulf %470, %388 : vector<8x16xf32>
    %cst_333 = arith.constant 3.750000e-01 : f32
    %472 = vector.broadcast %cst_333 : f32 to vector<8x16xf32>
    %473 = arith.mulf %472, %391 : vector<8x16xf32>
    %474 = arith.addf %471, %473 : vector<8x16xf32>
    %c0_334 = arith.constant 0 : index
    %c8_335 = arith.constant 8 : index
    %c176_336 = arith.constant 176 : index
    %475 = vector.load %arg9[%c0_334, %c8_335, %c176_336] : memref<1x36x256xf32, #tpu.memory_space<vmem>>, vector<1x8x16xf32>
    %476 = vector.shape_cast %475 : vector<1x8x16xf32> to vector<8x16xf32>
    %477 = vector.shape_cast %474 : vector<8x16xf32> to vector<1x8x16xf32>
    tpu.vector_store %arg9[%c0_334, %c8_335, %c176_336], %477 {strides = array<i32>} : memref<1x36x256xf32, #tpu.memory_space<vmem>>, vector<1x8x16xf32>,
    %cst_337 = arith.constant 3.750000e-01 : f32
    %478 = vector.broadcast %cst_337 : f32 to vector<8x16xf32>
    %479 = arith.mulf %478, %388 : vector<8x16xf32>
    %cst_338 = arith.constant 6.250000e-01 : f32
    %480 = vector.broadcast %cst_338 : f32 to vector<8x16xf32>
    %481 = arith.mulf %480, %391 : vector<8x16xf32>
    %482 = arith.addf %479, %481 : vector<8x16xf32>
    %c0_339 = arith.constant 0 : index
    %c8_340 = arith.constant 8 : index
    %c192_341 = arith.constant 192 : index
    %483 = vector.load %arg9[%c0_339, %c8_340, %c192_341] : memref<1x36x256xf32, #tpu.memory_space<vmem>>, vector<1x8x16xf32>
    %484 = vector.shape_cast %483 : vector<1x8x16xf32> to vector<8x16xf32>
    %485 = vector.shape_cast %482 : vector<8x16xf32> to vector<1x8x16xf32>
    tpu.vector_store %arg9[%c0_339, %c8_340, %c192_341], %485 {strides = array<i32>} : memref<1x36x256xf32, #tpu.memory_space<vmem>>, vector<1x8x16xf32>,
    %cst_342 = arith.constant 1.250000e-01 : f32
    %486 = vector.broadcast %cst_342 : f32 to vector<8x16xf32>
    %487 = arith.mulf %486, %388 : vector<8x16xf32>
    %cst_343 = arith.constant 8.750000e-01 : f32
    %488 = vector.broadcast %cst_343 : f32 to vector<8x16xf32>
    %489 = arith.mulf %488, %391 : vector<8x16xf32>
    %490 = arith.addf %487, %489 : vector<8x16xf32>
    %c0_344 = arith.constant 0 : index
    %c8_345 = arith.constant 8 : index
    %c208_346 = arith.constant 208 : index
    %491 = vector.load %arg9[%c0_344, %c8_345, %c208_346] : memref<1x36x256xf32, #tpu.memory_space<vmem>>, vector<1x8x16xf32>
    %492 = vector.shape_cast %491 : vector<1x8x16xf32> to vector<8x16xf32>
    %493 = vector.shape_cast %490 : vector<8x16xf32> to vector<1x8x16xf32>
    tpu.vector_store %arg9[%c0_344, %c8_345, %c208_346], %493 {strides = array<i32>} : memref<1x36x256xf32, #tpu.memory_space<vmem>>, vector<1x8x16xf32>,
    %c0_347 = arith.constant 0 : index
    %c8_348 = arith.constant 8 : index
    %c224_349 = arith.constant 224 : index
    %494 = vector.load %arg9[%c0_347, %c8_348, %c224_349] : memref<1x36x256xf32, #tpu.memory_space<vmem>>, vector<1x8x16xf32>
    %495 = vector.shape_cast %494 : vector<1x8x16xf32> to vector<8x16xf32>
    %496 = vector.shape_cast %391 : vector<8x16xf32> to vector<1x8x16xf32>
    tpu.vector_store %arg9[%c0_347, %c8_348, %c224_349], %496 {strides = array<i32>} : memref<1x36x256xf32, #tpu.memory_space<vmem>>, vector<1x8x16xf32>,
    %c0_350 = arith.constant 0 : index
    %c8_351 = arith.constant 8 : index
    %c240_352 = arith.constant 240 : index
    %497 = vector.load %arg9[%c0_350, %c8_351, %c240_352] : memref<1x36x256xf32, #tpu.memory_space<vmem>>, vector<1x8x16xf32>
    %498 = vector.shape_cast %497 : vector<1x8x16xf32> to vector<8x16xf32>
    %499 = vector.shape_cast %391 : vector<8x16xf32> to vector<1x8x16xf32>
    tpu.vector_store %arg9[%c0_350, %c8_351, %c240_352], %499 {strides = array<i32>} : memref<1x36x256xf32, #tpu.memory_space<vmem>>, vector<1x8x16xf32>,
    %500 = tpu.iota {dimensions = array<i32: 1>} : vector<1x64xi32>
    %c8_i32 = arith.constant 8 : i32
    %c0_i32_353 = arith.constant 0 : i32
    %501 = arith.cmpi eq, %c8_i32, %c0_i32_353 : i32
    %c1_i32_354 = arith.constant 1 : i32
    %502 = arith.select %501, %c1_i32_354, %c8_i32 : i32
    %503 = vector.broadcast %502 : i32 to vector<1x64xi32>
    %504 = arith.remsi %500, %503 : vector<1x64xi32>
    %c0_i32_355 = arith.constant 0 : i32
    %505 = vector.broadcast %c0_i32_355 : i32 to vector<1x64xi32>
    %506 = arith.cmpi ne, %504, %505 : vector<1x64xi32>
    %c0_i32_356 = arith.constant 0 : i32
    %507 = vector.broadcast %c0_i32_356 : i32 to vector<1x64xi32>
    %508 = arith.cmpi slt, %504, %507 : vector<1x64xi32>
    %c0_i32_357 = arith.constant 0 : i32
    %509 = arith.cmpi slt, %502, %c0_i32_357 : i32
    %510 = vector.broadcast %509 : i1 to vector<1x64xi1>
    %511 = vector.broadcast %510 : vector<1x64xi1> to vector<1x64xi1>
    %512 = arith.xori %508, %511 : vector<1x64xi1>
    %513 = arith.andi %512, %506 : vector<1x64xi1>
    %514 = vector.broadcast %502 : i32 to vector<1x64xi32>
    %515 = arith.addi %504, %514 : vector<1x64xi32>
    %516 = arith.select %513, %515, %504 : vector<1x64xi1>, vector<1x64xi32>
    %c0_i32_358 = arith.constant 0 : i32
    %517 = vector.broadcast %c0_i32_358 : i32 to vector<1x64xi32>
    %518 = arith.cmpi ne, %516, %517 : vector<1x64xi32>
    %c7_i32 = arith.constant 7 : i32
    %519 = vector.broadcast %c7_i32 : i32 to vector<1x64xi32>
    %520 = arith.cmpi ne, %516, %519 : vector<1x64xi32>
    %cst_359 = arith.constant 0.000000e+00 : bf16
    %521 = vector.broadcast %cst_359 : bf16 to vector<8x9xbf16>
    %c0_360 = arith.constant 0 : index
    %c0_361 = arith.constant 0 : index
    %522 = vector.load %arg10[%c0_360, %c0_361] : memref<16x82xbf16, #tpu.memory_space<vmem>>, vector<8x9xbf16>
    tpu.vector_store %arg10[%c0_360, %c0_361], %521 {strides = array<i32>} : memref<16x82xbf16, #tpu.memory_space<vmem>>, vector<8x9xbf16>,
    %cst_362 = arith.constant 0.000000e+00 : bf16
    %523 = vector.broadcast %cst_362 : bf16 to vector<8x9xbf16>
    %c0_363 = arith.constant 0 : index
    %c73 = arith.constant 73 : index
    %524 = vector.load %arg10[%c0_363, %c73] : memref<16x82xbf16, #tpu.memory_space<vmem>>, vector<8x9xbf16>
    tpu.vector_store %arg10[%c0_363, %c73], %523 {strides = array<i32>} : memref<16x82xbf16, #tpu.memory_space<vmem>>, vector<8x9xbf16>,
    %c0_364 = arith.constant 0 : index
    %c0_365 = arith.constant 0 : index
    %c0_366 = arith.constant 0 : index
    %525 = vector.load %arg3[%c0_364, %c0_365, %c0_366] : memref<1x8x64xbf16, #tpu.memory_space<vmem>>, vector<1x8x64xbf16>
    %526 = vector.shape_cast %525 : vector<1x8x64xbf16> to vector<8x64xbf16>
    %c0_367 = arith.constant 0 : index
    %c9_368 = arith.constant 9 : index
    %527 = vector.load %arg10[%c0_367, %c9_368] : memref<16x82xbf16, #tpu.memory_space<vmem>>, vector<8x64xbf16>
    tpu.vector_store %arg10[%c0_367, %c9_368], %526 {strides = array<i32>} : memref<16x82xbf16, #tpu.memory_space<vmem>>, vector<8x64xbf16>,
    %c0_369 = arith.constant 0 : index
    %c0_370 = arith.constant 0 : index
    %528 = vector.load %arg10[%c0_369, %c0_370] : memref<16x82xbf16, #tpu.memory_space<vmem>>, vector<8x64xbf16>
    %c0_i32_371 = arith.constant 0 : i32
    %529 = arith.sitofp %c0_i32_371 : i32 to bf16
    %530 = vector.shape_cast %518 : vector<1x64xi1> to vector<1x64xi1>
    %531 = vector.broadcast %530 : vector<1x64xi1> to vector<8x64xi1>
    %532 = vector.broadcast %529 : bf16 to vector<8x64xbf16>
    %533 = arith.select %531, %528, %532 : vector<8x64xi1>, vector<8x64xbf16>
    %c0_372 = arith.constant 0 : index
    %c0_373 = arith.constant 0 : index
    %534 = vector.load %arg12[%c0_372, %c0_373] : memref<144x64xbf16, #tpu.memory_space<vmem>>, vector<8x64xbf16>
    tpu.vector_store %arg12[%c0_372, %c0_373], %533 {strides = array<i32>} : memref<144x64xbf16, #tpu.memory_space<vmem>>, vector<8x64xbf16>,
    %c0_374 = arith.constant 0 : index
    %c1_375 = arith.constant 1 : index
    %535 = vector.load %arg10[%c0_374, %c1_375] : memref<16x82xbf16, #tpu.memory_space<vmem>>, vector<8x64xbf16>
    %c8_376 = arith.constant 8 : index
    %c0_377 = arith.constant 0 : index
    %536 = vector.load %arg12[%c8_376, %c0_377] : memref<144x64xbf16, #tpu.memory_space<vmem>>, vector<8x64xbf16>
    tpu.vector_store %arg12[%c8_376, %c0_377], %535 {strides = array<i32>} : memref<144x64xbf16, #tpu.memory_space<vmem>>, vector<8x64xbf16>,
    %c0_378 = arith.constant 0 : index
    %c2_379 = arith.constant 2 : index
    %537 = vector.load %arg10[%c0_378, %c2_379] : memref<16x82xbf16, #tpu.memory_space<vmem>>, vector<8x64xbf16>
    %c0_i32_380 = arith.constant 0 : i32
    %538 = arith.sitofp %c0_i32_380 : i32 to bf16
    %539 = vector.shape_cast %520 : vector<1x64xi1> to vector<1x64xi1>
    %540 = vector.broadcast %539 : vector<1x64xi1> to vector<8x64xi1>
    %541 = vector.broadcast %538 : bf16 to vector<8x64xbf16>
    %542 = arith.select %540, %537, %541 : vector<8x64xi1>, vector<8x64xbf16>
    %c16_381 = arith.constant 16 : index
    %c0_382 = arith.constant 0 : index
    %543 = vector.load %arg12[%c16_381, %c0_382] : memref<144x64xbf16, #tpu.memory_space<vmem>>, vector<8x64xbf16>
    tpu.vector_store %arg12[%c16_381, %c0_382], %542 {strides = array<i32>} : memref<144x64xbf16, #tpu.memory_space<vmem>>, vector<8x64xbf16>,
    %c0_383 = arith.constant 0 : index
    %c8_384 = arith.constant 8 : index
    %544 = vector.load %arg10[%c0_383, %c8_384] : memref<16x82xbf16, #tpu.memory_space<vmem>>, vector<8x64xbf16>
    %c0_i32_385 = arith.constant 0 : i32
    %545 = arith.sitofp %c0_i32_385 : i32 to bf16
    %546 = vector.shape_cast %518 : vector<1x64xi1> to vector<1x64xi1>
    %547 = vector.broadcast %546 : vector<1x64xi1> to vector<8x64xi1>
    %548 = vector.broadcast %545 : bf16 to vector<8x64xbf16>
    %549 = arith.select %547, %544, %548 : vector<8x64xi1>, vector<8x64xbf16>
    %c24_386 = arith.constant 24 : index
    %c0_387 = arith.constant 0 : index
    %550 = vector.load %arg12[%c24_386, %c0_387] : memref<144x64xbf16, #tpu.memory_space<vmem>>, vector<8x64xbf16>
    tpu.vector_store %arg12[%c24_386, %c0_387], %549 {strides = array<i32>} : memref<144x64xbf16, #tpu.memory_space<vmem>>, vector<8x64xbf16>,
    %c0_388 = arith.constant 0 : index
    %c9_389 = arith.constant 9 : index
    %551 = vector.load %arg10[%c0_388, %c9_389] : memref<16x82xbf16, #tpu.memory_space<vmem>>, vector<8x64xbf16>
    %c32_390 = arith.constant 32 : index
    %c0_391 = arith.constant 0 : index
    %552 = vector.load %arg12[%c32_390, %c0_391] : memref<144x64xbf16, #tpu.memory_space<vmem>>, vector<8x64xbf16>
    tpu.vector_store %arg12[%c32_390, %c0_391], %551 {strides = array<i32>} : memref<144x64xbf16, #tpu.memory_space<vmem>>, vector<8x64xbf16>,
    %c0_392 = arith.constant 0 : index
    %c10_393 = arith.constant 10 : index
    %553 = vector.load %arg10[%c0_392, %c10_393] : memref<16x82xbf16, #tpu.memory_space<vmem>>, vector<8x64xbf16>
    %c0_i32_394 = arith.constant 0 : i32
    %554 = arith.sitofp %c0_i32_394 : i32 to bf16
    %555 = vector.shape_cast %520 : vector<1x64xi1> to vector<1x64xi1>
    %556 = vector.broadcast %555 : vector<1x64xi1> to vector<8x64xi1>
    %557 = vector.broadcast %554 : bf16 to vector<8x64xbf16>
    %558 = arith.select %556, %553, %557 : vector<8x64xi1>, vector<8x64xbf16>
    %c40_395 = arith.constant 40 : index
    %c0_396 = arith.constant 0 : index
    %559 = vector.load %arg12[%c40_395, %c0_396] : memref<144x64xbf16, #tpu.memory_space<vmem>>, vector<8x64xbf16>
    tpu.vector_store %arg12[%c40_395, %c0_396], %558 {strides = array<i32>} : memref<144x64xbf16, #tpu.memory_space<vmem>>, vector<8x64xbf16>,
    %c0_397 = arith.constant 0 : index
    %c16_398 = arith.constant 16 : index
    %560 = vector.load %arg10[%c0_397, %c16_398] : memref<16x82xbf16, #tpu.memory_space<vmem>>, vector<8x64xbf16>
    %c0_i32_399 = arith.constant 0 : i32
    %561 = arith.sitofp %c0_i32_399 : i32 to bf16
    %562 = vector.shape_cast %518 : vector<1x64xi1> to vector<1x64xi1>
    %563 = vector.broadcast %562 : vector<1x64xi1> to vector<8x64xi1>
    %564 = vector.broadcast %561 : bf16 to vector<8x64xbf16>
    %565 = arith.select %563, %560, %564 : vector<8x64xi1>, vector<8x64xbf16>
    %c48_400 = arith.constant 48 : index
    %c0_401 = arith.constant 0 : index
    %566 = vector.load %arg12[%c48_400, %c0_401] : memref<144x64xbf16, #tpu.memory_space<vmem>>, vector<8x64xbf16>
    tpu.vector_store %arg12[%c48_400, %c0_401], %565 {strides = array<i32>} : memref<144x64xbf16, #tpu.memory_space<vmem>>, vector<8x64xbf16>,
    %c0_402 = arith.constant 0 : index
    %c17 = arith.constant 17 : index
    %567 = vector.load %arg10[%c0_402, %c17] : memref<16x82xbf16, #tpu.memory_space<vmem>>, vector<8x64xbf16>
    %c56_403 = arith.constant 56 : index
    %c0_404 = arith.constant 0 : index
    %568 = vector.load %arg12[%c56_403, %c0_404] : memref<144x64xbf16, #tpu.memory_space<vmem>>, vector<8x64xbf16>
    tpu.vector_store %arg12[%c56_403, %c0_404], %567 {strides = array<i32>} : memref<144x64xbf16, #tpu.memory_space<vmem>>, vector<8x64xbf16>,
    %c0_405 = arith.constant 0 : index
    %c18 = arith.constant 18 : index
    %569 = vector.load %arg10[%c0_405, %c18] : memref<16x82xbf16, #tpu.memory_space<vmem>>, vector<8x64xbf16>
    %c0_i32_406 = arith.constant 0 : i32
    %570 = arith.sitofp %c0_i32_406 : i32 to bf16
    %571 = vector.shape_cast %520 : vector<1x64xi1> to vector<1x64xi1>
    %572 = vector.broadcast %571 : vector<1x64xi1> to vector<8x64xi1>
    %573 = vector.broadcast %570 : bf16 to vector<8x64xbf16>
    %574 = arith.select %572, %569, %573 : vector<8x64xi1>, vector<8x64xbf16>
    %c64_407 = arith.constant 64 : index
    %c0_408 = arith.constant 0 : index
    %575 = vector.load %arg12[%c64_407, %c0_408] : memref<144x64xbf16, #tpu.memory_space<vmem>>, vector<8x64xbf16>
    tpu.vector_store %arg12[%c64_407, %c0_408], %574 {strides = array<i32>} : memref<144x64xbf16, #tpu.memory_space<vmem>>, vector<8x64xbf16>,
    %c0_409 = arith.constant 0 : index
    %c396 = arith.constant 396 : index
    %576 = vector.load %arg6[%c0_409, %c396] : memref<8x684xbf16, #tpu.memory_space<vmem>>, vector<8x72xbf16>
    %c0_410 = arith.constant 0 : index
    %c0_411 = arith.constant 0 : index
    %577 = vector.load %arg12[%c0_410, %c0_411] : memref<144x64xbf16, #tpu.memory_space<vmem>>, vector<72x64xbf16>
    %cst_412 = arith.constant dense<0.000000e+00> : vector<8x64xf32>
    %578 = tpu.matmul %576, %577, %cst_412 {dimension_numbers = #tpu.dot_dimension_numbers<[1], [0], [0], [1], [0, 0, 1, 1], [], []>} : vector<8x72xbf16>, vector<72x64xbf16>, vector<8x64xf32> -> vector<8x64xf32>
    %c0_413 = arith.constant 0 : index
    %c4_414 = arith.constant 4 : index
    %579 = vector.load %arg7[%c0_413, %c4_414] : memref<8x8xf32, #tpu.memory_space<vmem>>, vector<8x1xf32>
    %580 = vector.broadcast %579 : vector<8x1xf32> to vector<8x64xf32>
    %581 = arith.addf %578, %580 : vector<8x64xf32>
    %cst_415 = arith.constant 0.000000e+00 : bf16
    %582 = vector.broadcast %cst_415 : bf16 to vector<8x9xbf16>
    %c0_416 = arith.constant 0 : index
    %c0_417 = arith.constant 0 : index
    %583 = vector.load %arg11[%c0_416, %c0_417] : memref<8x82xbf16, #tpu.memory_space<vmem>>, vector<8x9xbf16>
    tpu.vector_store %arg11[%c0_416, %c0_417], %582 {strides = array<i32>} : memref<8x82xbf16, #tpu.memory_space<vmem>>, vector<8x9xbf16>,
    %cst_418 = arith.constant 0.000000e+00 : bf16
    %584 = vector.broadcast %cst_418 : bf16 to vector<8x9xbf16>
    %c0_419 = arith.constant 0 : index
    %c73_420 = arith.constant 73 : index
    %585 = vector.load %arg11[%c0_419, %c73_420] : memref<8x82xbf16, #tpu.memory_space<vmem>>, vector<8x9xbf16>
    tpu.vector_store %arg11[%c0_419, %c73_420], %584 {strides = array<i32>} : memref<8x82xbf16, #tpu.memory_space<vmem>>, vector<8x9xbf16>,
    %586 = arith.truncf %581 : vector<8x64xf32> to vector<8x64xbf16>
    %c0_421 = arith.constant 0 : index
    %c9_422 = arith.constant 9 : index
    %587 = vector.load %arg11[%c0_421, %c9_422] : memref<8x82xbf16, #tpu.memory_space<vmem>>, vector<8x64xbf16>
    tpu.vector_store %arg11[%c0_421, %c9_422], %586 {strides = array<i32>} : memref<8x82xbf16, #tpu.memory_space<vmem>>, vector<8x64xbf16>,
    %c0_423 = arith.constant 0 : index
    %c0_424 = arith.constant 0 : index
    %588 = vector.load %arg11[%c0_423, %c0_424] : memref<8x82xbf16, #tpu.memory_space<vmem>>, vector<8x64xbf16>
    %c0_i32_425 = arith.constant 0 : i32
    %589 = arith.sitofp %c0_i32_425 : i32 to bf16
    %590 = vector.shape_cast %518 : vector<1x64xi1> to vector<1x64xi1>
    %591 = vector.broadcast %590 : vector<1x64xi1> to vector<8x64xi1>
    %592 = vector.broadcast %589 : bf16 to vector<8x64xbf16>
    %593 = arith.select %591, %588, %592 : vector<8x64xi1>, vector<8x64xbf16>
    %c0_426 = arith.constant 0 : index
    %c0_427 = arith.constant 0 : index
    %594 = vector.load %arg12[%c0_426, %c0_427] : memref<144x64xbf16, #tpu.memory_space<vmem>>, vector<8x64xbf16>
    tpu.vector_store %arg12[%c0_426, %c0_427], %593 {strides = array<i32>} : memref<144x64xbf16, #tpu.memory_space<vmem>>, vector<8x64xbf16>,
    %c0_428 = arith.constant 0 : index
    %c1_429 = arith.constant 1 : index
    %595 = vector.load %arg11[%c0_428, %c1_429] : memref<8x82xbf16, #tpu.memory_space<vmem>>, vector<8x64xbf16>
    %c8_430 = arith.constant 8 : index
    %c0_431 = arith.constant 0 : index
    %596 = vector.load %arg12[%c8_430, %c0_431] : memref<144x64xbf16, #tpu.memory_space<vmem>>, vector<8x64xbf16>
    tpu.vector_store %arg12[%c8_430, %c0_431], %595 {strides = array<i32>} : memref<144x64xbf16, #tpu.memory_space<vmem>>, vector<8x64xbf16>,
    %c0_432 = arith.constant 0 : index
    %c2_433 = arith.constant 2 : index
    %597 = vector.load %arg11[%c0_432, %c2_433] : memref<8x82xbf16, #tpu.memory_space<vmem>>, vector<8x64xbf16>
    %c0_i32_434 = arith.constant 0 : i32
    %598 = arith.sitofp %c0_i32_434 : i32 to bf16
    %599 = vector.shape_cast %520 : vector<1x64xi1> to vector<1x64xi1>
    %600 = vector.broadcast %599 : vector<1x64xi1> to vector<8x64xi1>
    %601 = vector.broadcast %598 : bf16 to vector<8x64xbf16>
    %602 = arith.select %600, %597, %601 : vector<8x64xi1>, vector<8x64xbf16>
    %c16_435 = arith.constant 16 : index
    %c0_436 = arith.constant 0 : index
    %603 = vector.load %arg12[%c16_435, %c0_436] : memref<144x64xbf16, #tpu.memory_space<vmem>>, vector<8x64xbf16>
    tpu.vector_store %arg12[%c16_435, %c0_436], %602 {strides = array<i32>} : memref<144x64xbf16, #tpu.memory_space<vmem>>, vector<8x64xbf16>,
    %c0_437 = arith.constant 0 : index
    %c8_438 = arith.constant 8 : index
    %604 = vector.load %arg11[%c0_437, %c8_438] : memref<8x82xbf16, #tpu.memory_space<vmem>>, vector<8x64xbf16>
    %c0_i32_439 = arith.constant 0 : i32
    %605 = arith.sitofp %c0_i32_439 : i32 to bf16
    %606 = vector.shape_cast %518 : vector<1x64xi1> to vector<1x64xi1>
    %607 = vector.broadcast %606 : vector<1x64xi1> to vector<8x64xi1>
    %608 = vector.broadcast %605 : bf16 to vector<8x64xbf16>
    %609 = arith.select %607, %604, %608 : vector<8x64xi1>, vector<8x64xbf16>
    %c24_440 = arith.constant 24 : index
    %c0_441 = arith.constant 0 : index
    %610 = vector.load %arg12[%c24_440, %c0_441] : memref<144x64xbf16, #tpu.memory_space<vmem>>, vector<8x64xbf16>
    tpu.vector_store %arg12[%c24_440, %c0_441], %609 {strides = array<i32>} : memref<144x64xbf16, #tpu.memory_space<vmem>>, vector<8x64xbf16>,
    %c0_442 = arith.constant 0 : index
    %c9_443 = arith.constant 9 : index
    %611 = vector.load %arg11[%c0_442, %c9_443] : memref<8x82xbf16, #tpu.memory_space<vmem>>, vector<8x64xbf16>
    %c32_444 = arith.constant 32 : index
    %c0_445 = arith.constant 0 : index
    %612 = vector.load %arg12[%c32_444, %c0_445] : memref<144x64xbf16, #tpu.memory_space<vmem>>, vector<8x64xbf16>
    tpu.vector_store %arg12[%c32_444, %c0_445], %611 {strides = array<i32>} : memref<144x64xbf16, #tpu.memory_space<vmem>>, vector<8x64xbf16>,
    %c0_446 = arith.constant 0 : index
    %c10_447 = arith.constant 10 : index
    %613 = vector.load %arg11[%c0_446, %c10_447] : memref<8x82xbf16, #tpu.memory_space<vmem>>, vector<8x64xbf16>
    %c0_i32_448 = arith.constant 0 : i32
    %614 = arith.sitofp %c0_i32_448 : i32 to bf16
    %615 = vector.shape_cast %520 : vector<1x64xi1> to vector<1x64xi1>
    %616 = vector.broadcast %615 : vector<1x64xi1> to vector<8x64xi1>
    %617 = vector.broadcast %614 : bf16 to vector<8x64xbf16>
    %618 = arith.select %616, %613, %617 : vector<8x64xi1>, vector<8x64xbf16>
    %c40_449 = arith.constant 40 : index
    %c0_450 = arith.constant 0 : index
    %619 = vector.load %arg12[%c40_449, %c0_450] : memref<144x64xbf16, #tpu.memory_space<vmem>>, vector<8x64xbf16>
    tpu.vector_store %arg12[%c40_449, %c0_450], %618 {strides = array<i32>} : memref<144x64xbf16, #tpu.memory_space<vmem>>, vector<8x64xbf16>,
    %c0_451 = arith.constant 0 : index
    %c16_452 = arith.constant 16 : index
    %620 = vector.load %arg11[%c0_451, %c16_452] : memref<8x82xbf16, #tpu.memory_space<vmem>>, vector<8x64xbf16>
    %c0_i32_453 = arith.constant 0 : i32
    %621 = arith.sitofp %c0_i32_453 : i32 to bf16
    %622 = vector.shape_cast %518 : vector<1x64xi1> to vector<1x64xi1>
    %623 = vector.broadcast %622 : vector<1x64xi1> to vector<8x64xi1>
    %624 = vector.broadcast %621 : bf16 to vector<8x64xbf16>
    %625 = arith.select %623, %620, %624 : vector<8x64xi1>, vector<8x64xbf16>
    %c48_454 = arith.constant 48 : index
    %c0_455 = arith.constant 0 : index
    %626 = vector.load %arg12[%c48_454, %c0_455] : memref<144x64xbf16, #tpu.memory_space<vmem>>, vector<8x64xbf16>
    tpu.vector_store %arg12[%c48_454, %c0_455], %625 {strides = array<i32>} : memref<144x64xbf16, #tpu.memory_space<vmem>>, vector<8x64xbf16>,
    %c0_456 = arith.constant 0 : index
    %c17_457 = arith.constant 17 : index
    %627 = vector.load %arg11[%c0_456, %c17_457] : memref<8x82xbf16, #tpu.memory_space<vmem>>, vector<8x64xbf16>
    %c56_458 = arith.constant 56 : index
    %c0_459 = arith.constant 0 : index
    %628 = vector.load %arg12[%c56_458, %c0_459] : memref<144x64xbf16, #tpu.memory_space<vmem>>, vector<8x64xbf16>
    tpu.vector_store %arg12[%c56_458, %c0_459], %627 {strides = array<i32>} : memref<144x64xbf16, #tpu.memory_space<vmem>>, vector<8x64xbf16>,
    %c0_460 = arith.constant 0 : index
    %c18_461 = arith.constant 18 : index
    %629 = vector.load %arg11[%c0_460, %c18_461] : memref<8x82xbf16, #tpu.memory_space<vmem>>, vector<8x64xbf16>
    %c0_i32_462 = arith.constant 0 : i32
    %630 = arith.sitofp %c0_i32_462 : i32 to bf16
    %631 = vector.shape_cast %520 : vector<1x64xi1> to vector<1x64xi1>
    %632 = vector.broadcast %631 : vector<1x64xi1> to vector<8x64xi1>
    %633 = vector.broadcast %630 : bf16 to vector<8x64xbf16>
    %634 = arith.select %632, %629, %633 : vector<8x64xi1>, vector<8x64xbf16>
    %c64_463 = arith.constant 64 : index
    %c0_464 = arith.constant 0 : index
    %635 = vector.load %arg12[%c64_463, %c0_464] : memref<144x64xbf16, #tpu.memory_space<vmem>>, vector<8x64xbf16>
    tpu.vector_store %arg12[%c64_463, %c0_464], %634 {strides = array<i32>} : memref<144x64xbf16, #tpu.memory_space<vmem>>, vector<8x64xbf16>,
    %c0_465 = arith.constant 0 : index
    %c468 = arith.constant 468 : index
    %636 = vector.load %arg6[%c0_465, %c468] : memref<8x684xbf16, #tpu.memory_space<vmem>>, vector<8x72xbf16>
    %c0_466 = arith.constant 0 : index
    %c0_467 = arith.constant 0 : index
    %637 = vector.load %arg12[%c0_466, %c0_467] : memref<144x64xbf16, #tpu.memory_space<vmem>>, vector<72x64xbf16>
    %cst_468 = arith.constant dense<0.000000e+00> : vector<8x64xf32>
    %638 = tpu.matmul %636, %637, %cst_468 {dimension_numbers = #tpu.dot_dimension_numbers<[1], [0], [0], [1], [0, 0, 1, 1], [], []>} : vector<8x72xbf16>, vector<72x64xbf16>, vector<8x64xf32> -> vector<8x64xf32>
    %c0_469 = arith.constant 0 : index
    %c5_470 = arith.constant 5 : index
    %639 = vector.load %arg7[%c0_469, %c5_470] : memref<8x8xf32, #tpu.memory_space<vmem>>, vector<8x1xf32>
    %640 = vector.broadcast %639 : vector<8x1xf32> to vector<8x64xf32>
    %641 = arith.addf %638, %640 : vector<8x64xf32>
    %c0_471 = arith.constant 0 : index
    %c32_472 = arith.constant 32 : index
    %642 = vector.load %arg8[%c0_471, %c32_472] : memref<8x64xbf16, #tpu.memory_space<vmem>>, vector<8x16xbf16>
    %643 = vector.extract_strided_slice %641 {offsets = [0, 0], sizes = [8, 8], strides = [1, 1]} : vector<8x64xf32> to vector<8x8xf32>
    %644 = arith.truncf %643 : vector<8x8xf32> to vector<8x8xbf16>
    %cst_473 = arith.constant dense<0.000000e+00> : vector<8x16xf32>
    %645 = tpu.matmul %644, %642, %cst_473 {dimension_numbers = #tpu.dot_dimension_numbers<[1], [0], [0], [1], [0, 0, 1, 1], [], []>} : vector<8x8xbf16>, vector<8x16xbf16>, vector<8x16xf32> -> vector<8x16xf32>
    %646 = vector.extract_strided_slice %641 {offsets = [0, 8], sizes = [8, 8], strides = [1, 1]} : vector<8x64xf32> to vector<8x8xf32>
    %647 = arith.truncf %646 : vector<8x8xf32> to vector<8x8xbf16>
    %cst_474 = arith.constant dense<0.000000e+00> : vector<8x16xf32>
    %648 = tpu.matmul %647, %642, %cst_474 {dimension_numbers = #tpu.dot_dimension_numbers<[1], [0], [0], [1], [0, 0, 1, 1], [], []>} : vector<8x8xbf16>, vector<8x16xbf16>, vector<8x16xf32> -> vector<8x16xf32>
    %649 = vector.extract_strided_slice %641 {offsets = [0, 16], sizes = [8, 8], strides = [1, 1]} : vector<8x64xf32> to vector<8x8xf32>
    %650 = arith.truncf %649 : vector<8x8xf32> to vector<8x8xbf16>
    %cst_475 = arith.constant dense<0.000000e+00> : vector<8x16xf32>
    %651 = tpu.matmul %650, %642, %cst_475 {dimension_numbers = #tpu.dot_dimension_numbers<[1], [0], [0], [1], [0, 0, 1, 1], [], []>} : vector<8x8xbf16>, vector<8x16xbf16>, vector<8x16xf32> -> vector<8x16xf32>
    %652 = vector.extract_strided_slice %641 {offsets = [0, 24], sizes = [8, 8], strides = [1, 1]} : vector<8x64xf32> to vector<8x8xf32>
    %653 = arith.truncf %652 : vector<8x8xf32> to vector<8x8xbf16>
    %cst_476 = arith.constant dense<0.000000e+00> : vector<8x16xf32>
    %654 = tpu.matmul %653, %642, %cst_476 {dimension_numbers = #tpu.dot_dimension_numbers<[1], [0], [0], [1], [0, 0, 1, 1], [], []>} : vector<8x8xbf16>, vector<8x16xbf16>, vector<8x16xf32> -> vector<8x16xf32>
    %655 = vector.extract_strided_slice %641 {offsets = [0, 32], sizes = [8, 8], strides = [1, 1]} : vector<8x64xf32> to vector<8x8xf32>
    %656 = arith.truncf %655 : vector<8x8xf32> to vector<8x8xbf16>
    %cst_477 = arith.constant dense<0.000000e+00> : vector<8x16xf32>
    %657 = tpu.matmul %656, %642, %cst_477 {dimension_numbers = #tpu.dot_dimension_numbers<[1], [0], [0], [1], [0, 0, 1, 1], [], []>} : vector<8x8xbf16>, vector<8x16xbf16>, vector<8x16xf32> -> vector<8x16xf32>
    %658 = vector.extract_strided_slice %641 {offsets = [0, 40], sizes = [8, 8], strides = [1, 1]} : vector<8x64xf32> to vector<8x8xf32>
    %659 = arith.truncf %658 : vector<8x8xf32> to vector<8x8xbf16>
    %cst_478 = arith.constant dense<0.000000e+00> : vector<8x16xf32>
    %660 = tpu.matmul %659, %642, %cst_478 {dimension_numbers = #tpu.dot_dimension_numbers<[1], [0], [0], [1], [0, 0, 1, 1], [], []>} : vector<8x8xbf16>, vector<8x16xbf16>, vector<8x16xf32> -> vector<8x16xf32>
    %661 = vector.extract_strided_slice %641 {offsets = [0, 48], sizes = [8, 8], strides = [1, 1]} : vector<8x64xf32> to vector<8x8xf32>
    %662 = arith.truncf %661 : vector<8x8xf32> to vector<8x8xbf16>
    %cst_479 = arith.constant dense<0.000000e+00> : vector<8x16xf32>
    %663 = tpu.matmul %662, %642, %cst_479 {dimension_numbers = #tpu.dot_dimension_numbers<[1], [0], [0], [1], [0, 0, 1, 1], [], []>} : vector<8x8xbf16>, vector<8x16xbf16>, vector<8x16xf32> -> vector<8x16xf32>
    %664 = vector.extract_strided_slice %641 {offsets = [0, 56], sizes = [8, 8], strides = [1, 1]} : vector<8x64xf32> to vector<8x8xf32>
    %665 = arith.truncf %664 : vector<8x8xf32> to vector<8x8xbf16>
    %cst_480 = arith.constant dense<0.000000e+00> : vector<8x16xf32>
    %666 = tpu.matmul %665, %642, %cst_480 {dimension_numbers = #tpu.dot_dimension_numbers<[1], [0], [0], [1], [0, 0, 1, 1], [], []>} : vector<8x8xbf16>, vector<8x16xbf16>, vector<8x16xf32> -> vector<8x16xf32>
    %c0_481 = arith.constant 0 : index
    %c16_482 = arith.constant 16 : index
    %c0_483 = arith.constant 0 : index
    %667 = vector.load %arg9[%c0_481, %c16_482, %c0_483] : memref<1x36x256xf32, #tpu.memory_space<vmem>>, vector<1x8x16xf32>
    %668 = vector.shape_cast %667 : vector<1x8x16xf32> to vector<8x16xf32>
    %669 = vector.shape_cast %645 : vector<8x16xf32> to vector<1x8x16xf32>
    tpu.vector_store %arg9[%c0_481, %c16_482, %c0_483], %669 {strides = array<i32>} : memref<1x36x256xf32, #tpu.memory_space<vmem>>, vector<1x8x16xf32>,
    %cst_484 = arith.constant 7.500000e-01 : f32
    %670 = vector.broadcast %cst_484 : f32 to vector<8x16xf32>
    %671 = arith.mulf %670, %645 : vector<8x16xf32>
    %cst_485 = arith.constant 2.500000e-01 : f32
    %672 = vector.broadcast %cst_485 : f32 to vector<8x16xf32>
    %673 = arith.mulf %672, %648 : vector<8x16xf32>
    %674 = arith.addf %671, %673 : vector<8x16xf32>
    %c0_486 = arith.constant 0 : index
    %c16_487 = arith.constant 16 : index
    %c16_488 = arith.constant 16 : index
    %675 = vector.load %arg9[%c0_486, %c16_487, %c16_488] : memref<1x36x256xf32, #tpu.memory_space<vmem>>, vector<1x8x16xf32>
    %676 = vector.shape_cast %675 : vector<1x8x16xf32> to vector<8x16xf32>
    %677 = vector.shape_cast %674 : vector<8x16xf32> to vector<1x8x16xf32>
    tpu.vector_store %arg9[%c0_486, %c16_487, %c16_488], %677 {strides = array<i32>} : memref<1x36x256xf32, #tpu.memory_space<vmem>>, vector<1x8x16xf32>,
    %cst_489 = arith.constant 2.500000e-01 : f32
    %678 = vector.broadcast %cst_489 : f32 to vector<8x16xf32>
    %679 = arith.mulf %678, %645 : vector<8x16xf32>
    %cst_490 = arith.constant 7.500000e-01 : f32
    %680 = vector.broadcast %cst_490 : f32 to vector<8x16xf32>
    %681 = arith.mulf %680, %648 : vector<8x16xf32>
    %682 = arith.addf %679, %681 : vector<8x16xf32>
    %c0_491 = arith.constant 0 : index
    %c16_492 = arith.constant 16 : index
    %c32_493 = arith.constant 32 : index
    %683 = vector.load %arg9[%c0_491, %c16_492, %c32_493] : memref<1x36x256xf32, #tpu.memory_space<vmem>>, vector<1x8x16xf32>
    %684 = vector.shape_cast %683 : vector<1x8x16xf32> to vector<8x16xf32>
    %685 = vector.shape_cast %682 : vector<8x16xf32> to vector<1x8x16xf32>
    tpu.vector_store %arg9[%c0_491, %c16_492, %c32_493], %685 {strides = array<i32>} : memref<1x36x256xf32, #tpu.memory_space<vmem>>, vector<1x8x16xf32>,
    %cst_494 = arith.constant 7.500000e-01 : f32
    %686 = vector.broadcast %cst_494 : f32 to vector<8x16xf32>
    %687 = arith.mulf %686, %648 : vector<8x16xf32>
    %cst_495 = arith.constant 2.500000e-01 : f32
    %688 = vector.broadcast %cst_495 : f32 to vector<8x16xf32>
    %689 = arith.mulf %688, %651 : vector<8x16xf32>
    %690 = arith.addf %687, %689 : vector<8x16xf32>
    %c0_496 = arith.constant 0 : index
    %c16_497 = arith.constant 16 : index
    %c48_498 = arith.constant 48 : index
    %691 = vector.load %arg9[%c0_496, %c16_497, %c48_498] : memref<1x36x256xf32, #tpu.memory_space<vmem>>, vector<1x8x16xf32>
    %692 = vector.shape_cast %691 : vector<1x8x16xf32> to vector<8x16xf32>
    %693 = vector.shape_cast %690 : vector<8x16xf32> to vector<1x8x16xf32>
    tpu.vector_store %arg9[%c0_496, %c16_497, %c48_498], %693 {strides = array<i32>} : memref<1x36x256xf32, #tpu.memory_space<vmem>>, vector<1x8x16xf32>,
    %cst_499 = arith.constant 2.500000e-01 : f32
    %694 = vector.broadcast %cst_499 : f32 to vector<8x16xf32>
    %695 = arith.mulf %694, %648 : vector<8x16xf32>
    %cst_500 = arith.constant 7.500000e-01 : f32
    %696 = vector.broadcast %cst_500 : f32 to vector<8x16xf32>
    %697 = arith.mulf %696, %651 : vector<8x16xf32>
    %698 = arith.addf %695, %697 : vector<8x16xf32>
    %c0_501 = arith.constant 0 : index
    %c16_502 = arith.constant 16 : index
    %c64_503 = arith.constant 64 : index
    %699 = vector.load %arg9[%c0_501, %c16_502, %c64_503] : memref<1x36x256xf32, #tpu.memory_space<vmem>>, vector<1x8x16xf32>
    %700 = vector.shape_cast %699 : vector<1x8x16xf32> to vector<8x16xf32>
    %701 = vector.shape_cast %698 : vector<8x16xf32> to vector<1x8x16xf32>
    tpu.vector_store %arg9[%c0_501, %c16_502, %c64_503], %701 {strides = array<i32>} : memref<1x36x256xf32, #tpu.memory_space<vmem>>, vector<1x8x16xf32>,
    %cst_504 = arith.constant 7.500000e-01 : f32
    %702 = vector.broadcast %cst_504 : f32 to vector<8x16xf32>
    %703 = arith.mulf %702, %651 : vector<8x16xf32>
    %cst_505 = arith.constant 2.500000e-01 : f32
    %704 = vector.broadcast %cst_505 : f32 to vector<8x16xf32>
    %705 = arith.mulf %704, %654 : vector<8x16xf32>
    %706 = arith.addf %703, %705 : vector<8x16xf32>
    %c0_506 = arith.constant 0 : index
    %c16_507 = arith.constant 16 : index
    %c80_508 = arith.constant 80 : index
    %707 = vector.load %arg9[%c0_506, %c16_507, %c80_508] : memref<1x36x256xf32, #tpu.memory_space<vmem>>, vector<1x8x16xf32>
    %708 = vector.shape_cast %707 : vector<1x8x16xf32> to vector<8x16xf32>
    %709 = vector.shape_cast %706 : vector<8x16xf32> to vector<1x8x16xf32>
    tpu.vector_store %arg9[%c0_506, %c16_507, %c80_508], %709 {strides = array<i32>} : memref<1x36x256xf32, #tpu.memory_space<vmem>>, vector<1x8x16xf32>,
    %cst_509 = arith.constant 2.500000e-01 : f32
    %710 = vector.broadcast %cst_509 : f32 to vector<8x16xf32>
    %711 = arith.mulf %710, %651 : vector<8x16xf32>
    %cst_510 = arith.constant 7.500000e-01 : f32
    %712 = vector.broadcast %cst_510 : f32 to vector<8x16xf32>
    %713 = arith.mulf %712, %654 : vector<8x16xf32>
    %714 = arith.addf %711, %713 : vector<8x16xf32>
    %c0_511 = arith.constant 0 : index
    %c16_512 = arith.constant 16 : index
    %c96_513 = arith.constant 96 : index
    %715 = vector.load %arg9[%c0_511, %c16_512, %c96_513] : memref<1x36x256xf32, #tpu.memory_space<vmem>>, vector<1x8x16xf32>
    %716 = vector.shape_cast %715 : vector<1x8x16xf32> to vector<8x16xf32>
    %717 = vector.shape_cast %714 : vector<8x16xf32> to vector<1x8x16xf32>
    tpu.vector_store %arg9[%c0_511, %c16_512, %c96_513], %717 {strides = array<i32>} : memref<1x36x256xf32, #tpu.memory_space<vmem>>, vector<1x8x16xf32>,
    %cst_514 = arith.constant 7.500000e-01 : f32
    %718 = vector.broadcast %cst_514 : f32 to vector<8x16xf32>
    %719 = arith.mulf %718, %654 : vector<8x16xf32>
    %cst_515 = arith.constant 2.500000e-01 : f32
    %720 = vector.broadcast %cst_515 : f32 to vector<8x16xf32>
    %721 = arith.mulf %720, %657 : vector<8x16xf32>
    %722 = arith.addf %719, %721 : vector<8x16xf32>
    %c0_516 = arith.constant 0 : index
    %c16_517 = arith.constant 16 : index
    %c112_518 = arith.constant 112 : index
    %723 = vector.load %arg9[%c0_516, %c16_517, %c112_518] : memref<1x36x256xf32, #tpu.memory_space<vmem>>, vector<1x8x16xf32>
    %724 = vector.shape_cast %723 : vector<1x8x16xf32> to vector<8x16xf32>
    %725 = vector.shape_cast %722 : vector<8x16xf32> to vector<1x8x16xf32>
    tpu.vector_store %arg9[%c0_516, %c16_517, %c112_518], %725 {strides = array<i32>} : memref<1x36x256xf32, #tpu.memory_space<vmem>>, vector<1x8x16xf32>,
    %cst_519 = arith.constant 2.500000e-01 : f32
    %726 = vector.broadcast %cst_519 : f32 to vector<8x16xf32>
    %727 = arith.mulf %726, %654 : vector<8x16xf32>
    %cst_520 = arith.constant 7.500000e-01 : f32
    %728 = vector.broadcast %cst_520 : f32 to vector<8x16xf32>
    %729 = arith.mulf %728, %657 : vector<8x16xf32>
    %730 = arith.addf %727, %729 : vector<8x16xf32>
    %c0_521 = arith.constant 0 : index
    %c16_522 = arith.constant 16 : index
    %c128_523 = arith.constant 128 : index
    %731 = vector.load %arg9[%c0_521, %c16_522, %c128_523] : memref<1x36x256xf32, #tpu.memory_space<vmem>>, vector<1x8x16xf32>
    %732 = vector.shape_cast %731 : vector<1x8x16xf32> to vector<8x16xf32>
    %733 = vector.shape_cast %730 : vector<8x16xf32> to vector<1x8x16xf32>
    tpu.vector_store %arg9[%c0_521, %c16_522, %c128_523], %733 {strides = array<i32>} : memref<1x36x256xf32, #tpu.memory_space<vmem>>, vector<1x8x16xf32>,
    %cst_524 = arith.constant 7.500000e-01 : f32
    %734 = vector.broadcast %cst_524 : f32 to vector<8x16xf32>
    %735 = arith.mulf %734, %657 : vector<8x16xf32>
    %cst_525 = arith.constant 2.500000e-01 : f32
    %736 = vector.broadcast %cst_525 : f32 to vector<8x16xf32>
    %737 = arith.mulf %736, %660 : vector<8x16xf32>
    %738 = arith.addf %735, %737 : vector<8x16xf32>
    %c0_526 = arith.constant 0 : index
    %c16_527 = arith.constant 16 : index
    %c144_528 = arith.constant 144 : index
    %739 = vector.load %arg9[%c0_526, %c16_527, %c144_528] : memref<1x36x256xf32, #tpu.memory_space<vmem>>, vector<1x8x16xf32>
    %740 = vector.shape_cast %739 : vector<1x8x16xf32> to vector<8x16xf32>
    %741 = vector.shape_cast %738 : vector<8x16xf32> to vector<1x8x16xf32>
    tpu.vector_store %arg9[%c0_526, %c16_527, %c144_528], %741 {strides = array<i32>} : memref<1x36x256xf32, #tpu.memory_space<vmem>>, vector<1x8x16xf32>,
    %cst_529 = arith.constant 2.500000e-01 : f32
    %742 = vector.broadcast %cst_529 : f32 to vector<8x16xf32>
    %743 = arith.mulf %742, %657 : vector<8x16xf32>
    %cst_530 = arith.constant 7.500000e-01 : f32
    %744 = vector.broadcast %cst_530 : f32 to vector<8x16xf32>
    %745 = arith.mulf %744, %660 : vector<8x16xf32>
    %746 = arith.addf %743, %745 : vector<8x16xf32>
    %c0_531 = arith.constant 0 : index
    %c16_532 = arith.constant 16 : index
    %c160_533 = arith.constant 160 : index
    %747 = vector.load %arg9[%c0_531, %c16_532, %c160_533] : memref<1x36x256xf32, #tpu.memory_space<vmem>>, vector<1x8x16xf32>
    %748 = vector.shape_cast %747 : vector<1x8x16xf32> to vector<8x16xf32>
    %749 = vector.shape_cast %746 : vector<8x16xf32> to vector<1x8x16xf32>
    tpu.vector_store %arg9[%c0_531, %c16_532, %c160_533], %749 {strides = array<i32>} : memref<1x36x256xf32, #tpu.memory_space<vmem>>, vector<1x8x16xf32>,
    %cst_534 = arith.constant 7.500000e-01 : f32
    %750 = vector.broadcast %cst_534 : f32 to vector<8x16xf32>
    %751 = arith.mulf %750, %660 : vector<8x16xf32>
    %cst_535 = arith.constant 2.500000e-01 : f32
    %752 = vector.broadcast %cst_535 : f32 to vector<8x16xf32>
    %753 = arith.mulf %752, %663 : vector<8x16xf32>
    %754 = arith.addf %751, %753 : vector<8x16xf32>
    %c0_536 = arith.constant 0 : index
    %c16_537 = arith.constant 16 : index
    %c176_538 = arith.constant 176 : index
    %755 = vector.load %arg9[%c0_536, %c16_537, %c176_538] : memref<1x36x256xf32, #tpu.memory_space<vmem>>, vector<1x8x16xf32>
    %756 = vector.shape_cast %755 : vector<1x8x16xf32> to vector<8x16xf32>
    %757 = vector.shape_cast %754 : vector<8x16xf32> to vector<1x8x16xf32>
    tpu.vector_store %arg9[%c0_536, %c16_537, %c176_538], %757 {strides = array<i32>} : memref<1x36x256xf32, #tpu.memory_space<vmem>>, vector<1x8x16xf32>,
    %cst_539 = arith.constant 2.500000e-01 : f32
    %758 = vector.broadcast %cst_539 : f32 to vector<8x16xf32>
    %759 = arith.mulf %758, %660 : vector<8x16xf32>
    %cst_540 = arith.constant 7.500000e-01 : f32
    %760 = vector.broadcast %cst_540 : f32 to vector<8x16xf32>
    %761 = arith.mulf %760, %663 : vector<8x16xf32>
    %762 = arith.addf %759, %761 : vector<8x16xf32>
    %c0_541 = arith.constant 0 : index
    %c16_542 = arith.constant 16 : index
    %c192_543 = arith.constant 192 : index
    %763 = vector.load %arg9[%c0_541, %c16_542, %c192_543] : memref<1x36x256xf32, #tpu.memory_space<vmem>>, vector<1x8x16xf32>
    %764 = vector.shape_cast %763 : vector<1x8x16xf32> to vector<8x16xf32>
    %765 = vector.shape_cast %762 : vector<8x16xf32> to vector<1x8x16xf32>
    tpu.vector_store %arg9[%c0_541, %c16_542, %c192_543], %765 {strides = array<i32>} : memref<1x36x256xf32, #tpu.memory_space<vmem>>, vector<1x8x16xf32>,
    %cst_544 = arith.constant 7.500000e-01 : f32
    %766 = vector.broadcast %cst_544 : f32 to vector<8x16xf32>
    %767 = arith.mulf %766, %663 : vector<8x16xf32>
    %cst_545 = arith.constant 2.500000e-01 : f32
    %768 = vector.broadcast %cst_545 : f32 to vector<8x16xf32>
    %769 = arith.mulf %768, %666 : vector<8x16xf32>
    %770 = arith.addf %767, %769 : vector<8x16xf32>
    %c0_546 = arith.constant 0 : index
    %c16_547 = arith.constant 16 : index
    %c208_548 = arith.constant 208 : index
    %771 = vector.load %arg9[%c0_546, %c16_547, %c208_548] : memref<1x36x256xf32, #tpu.memory_space<vmem>>, vector<1x8x16xf32>
    %772 = vector.shape_cast %771 : vector<1x8x16xf32> to vector<8x16xf32>
    %773 = vector.shape_cast %770 : vector<8x16xf32> to vector<1x8x16xf32>
    tpu.vector_store %arg9[%c0_546, %c16_547, %c208_548], %773 {strides = array<i32>} : memref<1x36x256xf32, #tpu.memory_space<vmem>>, vector<1x8x16xf32>,
    %cst_549 = arith.constant 2.500000e-01 : f32
    %774 = vector.broadcast %cst_549 : f32 to vector<8x16xf32>
    %775 = arith.mulf %774, %663 : vector<8x16xf32>
    %cst_550 = arith.constant 7.500000e-01 : f32
    %776 = vector.broadcast %cst_550 : f32 to vector<8x16xf32>
    %777 = arith.mulf %776, %666 : vector<8x16xf32>
    %778 = arith.addf %775, %777 : vector<8x16xf32>
    %c0_551 = arith.constant 0 : index
    %c16_552 = arith.constant 16 : index
    %c224_553 = arith.constant 224 : index
    %779 = vector.load %arg9[%c0_551, %c16_552, %c224_553] : memref<1x36x256xf32, #tpu.memory_space<vmem>>, vector<1x8x16xf32>
    %780 = vector.shape_cast %779 : vector<1x8x16xf32> to vector<8x16xf32>
    %781 = vector.shape_cast %778 : vector<8x16xf32> to vector<1x8x16xf32>
    tpu.vector_store %arg9[%c0_551, %c16_552, %c224_553], %781 {strides = array<i32>} : memref<1x36x256xf32, #tpu.memory_space<vmem>>, vector<1x8x16xf32>,
    %c0_554 = arith.constant 0 : index
    %c16_555 = arith.constant 16 : index
    %c240_556 = arith.constant 240 : index
    %782 = vector.load %arg9[%c0_554, %c16_555, %c240_556] : memref<1x36x256xf32, #tpu.memory_space<vmem>>, vector<1x8x16xf32>
    %783 = vector.shape_cast %782 : vector<1x8x16xf32> to vector<8x16xf32>
    %784 = vector.shape_cast %666 : vector<8x16xf32> to vector<1x8x16xf32>
    tpu.vector_store %arg9[%c0_554, %c16_555, %c240_556], %784 {strides = array<i32>} : memref<1x36x256xf32, #tpu.memory_space<vmem>>, vector<1x8x16xf32>,
    %785 = tpu.iota {dimensions = array<i32: 1>} : vector<1x64xi32>
    %c8_i32_557 = arith.constant 8 : i32
    %c0_i32_558 = arith.constant 0 : i32
    %786 = arith.cmpi eq, %c8_i32_557, %c0_i32_558 : i32
    %c1_i32_559 = arith.constant 1 : i32
    %787 = arith.select %786, %c1_i32_559, %c8_i32_557 : i32
    %788 = vector.broadcast %787 : i32 to vector<1x64xi32>
    %789 = arith.remsi %785, %788 : vector<1x64xi32>
    %c0_i32_560 = arith.constant 0 : i32
    %790 = vector.broadcast %c0_i32_560 : i32 to vector<1x64xi32>
    %791 = arith.cmpi ne, %789, %790 : vector<1x64xi32>
    %c0_i32_561 = arith.constant 0 : i32
    %792 = vector.broadcast %c0_i32_561 : i32 to vector<1x64xi32>
    %793 = arith.cmpi slt, %789, %792 : vector<1x64xi32>
    %c0_i32_562 = arith.constant 0 : i32
    %794 = arith.cmpi slt, %787, %c0_i32_562 : i32
    %795 = vector.broadcast %794 : i1 to vector<1x64xi1>
    %796 = vector.broadcast %795 : vector<1x64xi1> to vector<1x64xi1>
    %797 = arith.xori %793, %796 : vector<1x64xi1>
    %798 = arith.andi %797, %791 : vector<1x64xi1>
    %799 = vector.broadcast %787 : i32 to vector<1x64xi32>
    %800 = arith.addi %789, %799 : vector<1x64xi32>
    %801 = arith.select %798, %800, %789 : vector<1x64xi1>, vector<1x64xi32>
    %c0_i32_563 = arith.constant 0 : i32
    %802 = vector.broadcast %c0_i32_563 : i32 to vector<1x64xi32>
    %803 = arith.cmpi ne, %801, %802 : vector<1x64xi32>
    %c7_i32_564 = arith.constant 7 : i32
    %804 = vector.broadcast %c7_i32_564 : i32 to vector<1x64xi32>
    %805 = arith.cmpi ne, %801, %804 : vector<1x64xi32>
    %cst_565 = arith.constant 0.000000e+00 : bf16
    %806 = vector.broadcast %cst_565 : bf16 to vector<8x9xbf16>
    %c0_566 = arith.constant 0 : index
    %c0_567 = arith.constant 0 : index
    %807 = vector.load %arg10[%c0_566, %c0_567] : memref<16x82xbf16, #tpu.memory_space<vmem>>, vector<8x9xbf16>
    tpu.vector_store %arg10[%c0_566, %c0_567], %806 {strides = array<i32>} : memref<16x82xbf16, #tpu.memory_space<vmem>>, vector<8x9xbf16>,
    %cst_568 = arith.constant 0.000000e+00 : bf16
    %808 = vector.broadcast %cst_568 : bf16 to vector<8x9xbf16>
    %c0_569 = arith.constant 0 : index
    %c73_570 = arith.constant 73 : index
    %809 = vector.load %arg10[%c0_569, %c73_570] : memref<16x82xbf16, #tpu.memory_space<vmem>>, vector<8x9xbf16>
    tpu.vector_store %arg10[%c0_569, %c73_570], %808 {strides = array<i32>} : memref<16x82xbf16, #tpu.memory_space<vmem>>, vector<8x9xbf16>,
    %c0_571 = arith.constant 0 : index
    %c0_572 = arith.constant 0 : index
    %c0_573 = arith.constant 0 : index
    %810 = vector.load %arg4[%c0_571, %c0_572, %c0_573] : memref<1x8x64xbf16, #tpu.memory_space<vmem>>, vector<1x8x64xbf16>
    %811 = vector.shape_cast %810 : vector<1x8x64xbf16> to vector<8x64xbf16>
    %c0_574 = arith.constant 0 : index
    %c9_575 = arith.constant 9 : index
    %812 = vector.load %arg10[%c0_574, %c9_575] : memref<16x82xbf16, #tpu.memory_space<vmem>>, vector<8x64xbf16>
    tpu.vector_store %arg10[%c0_574, %c9_575], %811 {strides = array<i32>} : memref<16x82xbf16, #tpu.memory_space<vmem>>, vector<8x64xbf16>,
    %c0_576 = arith.constant 0 : index
    %c0_577 = arith.constant 0 : index
    %813 = vector.load %arg10[%c0_576, %c0_577] : memref<16x82xbf16, #tpu.memory_space<vmem>>, vector<8x64xbf16>
    %c0_i32_578 = arith.constant 0 : i32
    %814 = arith.sitofp %c0_i32_578 : i32 to bf16
    %815 = vector.shape_cast %803 : vector<1x64xi1> to vector<1x64xi1>
    %816 = vector.broadcast %815 : vector<1x64xi1> to vector<8x64xi1>
    %817 = vector.broadcast %814 : bf16 to vector<8x64xbf16>
    %818 = arith.select %816, %813, %817 : vector<8x64xi1>, vector<8x64xbf16>
    %c0_579 = arith.constant 0 : index
    %c0_580 = arith.constant 0 : index
    %819 = vector.load %arg12[%c0_579, %c0_580] : memref<144x64xbf16, #tpu.memory_space<vmem>>, vector<8x64xbf16>
    tpu.vector_store %arg12[%c0_579, %c0_580], %818 {strides = array<i32>} : memref<144x64xbf16, #tpu.memory_space<vmem>>, vector<8x64xbf16>,
    %c0_581 = arith.constant 0 : index
    %c1_582 = arith.constant 1 : index
    %820 = vector.load %arg10[%c0_581, %c1_582] : memref<16x82xbf16, #tpu.memory_space<vmem>>, vector<8x64xbf16>
    %c8_583 = arith.constant 8 : index
    %c0_584 = arith.constant 0 : index
    %821 = vector.load %arg12[%c8_583, %c0_584] : memref<144x64xbf16, #tpu.memory_space<vmem>>, vector<8x64xbf16>
    tpu.vector_store %arg12[%c8_583, %c0_584], %820 {strides = array<i32>} : memref<144x64xbf16, #tpu.memory_space<vmem>>, vector<8x64xbf16>,
    %c0_585 = arith.constant 0 : index
    %c2_586 = arith.constant 2 : index
    %822 = vector.load %arg10[%c0_585, %c2_586] : memref<16x82xbf16, #tpu.memory_space<vmem>>, vector<8x64xbf16>
    %c0_i32_587 = arith.constant 0 : i32
    %823 = arith.sitofp %c0_i32_587 : i32 to bf16
    %824 = vector.shape_cast %805 : vector<1x64xi1> to vector<1x64xi1>
    %825 = vector.broadcast %824 : vector<1x64xi1> to vector<8x64xi1>
    %826 = vector.broadcast %823 : bf16 to vector<8x64xbf16>
    %827 = arith.select %825, %822, %826 : vector<8x64xi1>, vector<8x64xbf16>
    %c16_588 = arith.constant 16 : index
    %c0_589 = arith.constant 0 : index
    %828 = vector.load %arg12[%c16_588, %c0_589] : memref<144x64xbf16, #tpu.memory_space<vmem>>, vector<8x64xbf16>
    tpu.vector_store %arg12[%c16_588, %c0_589], %827 {strides = array<i32>} : memref<144x64xbf16, #tpu.memory_space<vmem>>, vector<8x64xbf16>,
    %c0_590 = arith.constant 0 : index
    %c8_591 = arith.constant 8 : index
    %829 = vector.load %arg10[%c0_590, %c8_591] : memref<16x82xbf16, #tpu.memory_space<vmem>>, vector<8x64xbf16>
    %c0_i32_592 = arith.constant 0 : i32
    %830 = arith.sitofp %c0_i32_592 : i32 to bf16
    %831 = vector.shape_cast %803 : vector<1x64xi1> to vector<1x64xi1>
    %832 = vector.broadcast %831 : vector<1x64xi1> to vector<8x64xi1>
    %833 = vector.broadcast %830 : bf16 to vector<8x64xbf16>
    %834 = arith.select %832, %829, %833 : vector<8x64xi1>, vector<8x64xbf16>
    %c24_593 = arith.constant 24 : index
    %c0_594 = arith.constant 0 : index
    %835 = vector.load %arg12[%c24_593, %c0_594] : memref<144x64xbf16, #tpu.memory_space<vmem>>, vector<8x64xbf16>
    tpu.vector_store %arg12[%c24_593, %c0_594], %834 {strides = array<i32>} : memref<144x64xbf16, #tpu.memory_space<vmem>>, vector<8x64xbf16>,
    %c0_595 = arith.constant 0 : index
    %c9_596 = arith.constant 9 : index
    %836 = vector.load %arg10[%c0_595, %c9_596] : memref<16x82xbf16, #tpu.memory_space<vmem>>, vector<8x64xbf16>
    %c32_597 = arith.constant 32 : index
    %c0_598 = arith.constant 0 : index
    %837 = vector.load %arg12[%c32_597, %c0_598] : memref<144x64xbf16, #tpu.memory_space<vmem>>, vector<8x64xbf16>
    tpu.vector_store %arg12[%c32_597, %c0_598], %836 {strides = array<i32>} : memref<144x64xbf16, #tpu.memory_space<vmem>>, vector<8x64xbf16>,
    %c0_599 = arith.constant 0 : index
    %c10_600 = arith.constant 10 : index
    %838 = vector.load %arg10[%c0_599, %c10_600] : memref<16x82xbf16, #tpu.memory_space<vmem>>, vector<8x64xbf16>
    %c0_i32_601 = arith.constant 0 : i32
    %839 = arith.sitofp %c0_i32_601 : i32 to bf16
    %840 = vector.shape_cast %805 : vector<1x64xi1> to vector<1x64xi1>
    %841 = vector.broadcast %840 : vector<1x64xi1> to vector<8x64xi1>
    %842 = vector.broadcast %839 : bf16 to vector<8x64xbf16>
    %843 = arith.select %841, %838, %842 : vector<8x64xi1>, vector<8x64xbf16>
    %c40_602 = arith.constant 40 : index
    %c0_603 = arith.constant 0 : index
    %844 = vector.load %arg12[%c40_602, %c0_603] : memref<144x64xbf16, #tpu.memory_space<vmem>>, vector<8x64xbf16>
    tpu.vector_store %arg12[%c40_602, %c0_603], %843 {strides = array<i32>} : memref<144x64xbf16, #tpu.memory_space<vmem>>, vector<8x64xbf16>,
    %c0_604 = arith.constant 0 : index
    %c16_605 = arith.constant 16 : index
    %845 = vector.load %arg10[%c0_604, %c16_605] : memref<16x82xbf16, #tpu.memory_space<vmem>>, vector<8x64xbf16>
    %c0_i32_606 = arith.constant 0 : i32
    %846 = arith.sitofp %c0_i32_606 : i32 to bf16
    %847 = vector.shape_cast %803 : vector<1x64xi1> to vector<1x64xi1>
    %848 = vector.broadcast %847 : vector<1x64xi1> to vector<8x64xi1>
    %849 = vector.broadcast %846 : bf16 to vector<8x64xbf16>
    %850 = arith.select %848, %845, %849 : vector<8x64xi1>, vector<8x64xbf16>
    %c48_607 = arith.constant 48 : index
    %c0_608 = arith.constant 0 : index
    %851 = vector.load %arg12[%c48_607, %c0_608] : memref<144x64xbf16, #tpu.memory_space<vmem>>, vector<8x64xbf16>
    tpu.vector_store %arg12[%c48_607, %c0_608], %850 {strides = array<i32>} : memref<144x64xbf16, #tpu.memory_space<vmem>>, vector<8x64xbf16>,
    %c0_609 = arith.constant 0 : index
    %c17_610 = arith.constant 17 : index
    %852 = vector.load %arg10[%c0_609, %c17_610] : memref<16x82xbf16, #tpu.memory_space<vmem>>, vector<8x64xbf16>
    %c56_611 = arith.constant 56 : index
    %c0_612 = arith.constant 0 : index
    %853 = vector.load %arg12[%c56_611, %c0_612] : memref<144x64xbf16, #tpu.memory_space<vmem>>, vector<8x64xbf16>
    tpu.vector_store %arg12[%c56_611, %c0_612], %852 {strides = array<i32>} : memref<144x64xbf16, #tpu.memory_space<vmem>>, vector<8x64xbf16>,
    %c0_613 = arith.constant 0 : index
    %c18_614 = arith.constant 18 : index
    %854 = vector.load %arg10[%c0_613, %c18_614] : memref<16x82xbf16, #tpu.memory_space<vmem>>, vector<8x64xbf16>
    %c0_i32_615 = arith.constant 0 : i32
    %855 = arith.sitofp %c0_i32_615 : i32 to bf16
    %856 = vector.shape_cast %805 : vector<1x64xi1> to vector<1x64xi1>
    %857 = vector.broadcast %856 : vector<1x64xi1> to vector<8x64xi1>
    %858 = vector.broadcast %855 : bf16 to vector<8x64xbf16>
    %859 = arith.select %857, %854, %858 : vector<8x64xi1>, vector<8x64xbf16>
    %c64_616 = arith.constant 64 : index
    %c0_617 = arith.constant 0 : index
    %860 = vector.load %arg12[%c64_616, %c0_617] : memref<144x64xbf16, #tpu.memory_space<vmem>>, vector<8x64xbf16>
    tpu.vector_store %arg12[%c64_616, %c0_617], %859 {strides = array<i32>} : memref<144x64xbf16, #tpu.memory_space<vmem>>, vector<8x64xbf16>,
    %c0_618 = arith.constant 0 : index
    %c540 = arith.constant 540 : index
    %861 = vector.load %arg6[%c0_618, %c540] : memref<8x684xbf16, #tpu.memory_space<vmem>>, vector<8x72xbf16>
    %c0_619 = arith.constant 0 : index
    %c0_620 = arith.constant 0 : index
    %862 = vector.load %arg12[%c0_619, %c0_620] : memref<144x64xbf16, #tpu.memory_space<vmem>>, vector<72x64xbf16>
    %cst_621 = arith.constant dense<0.000000e+00> : vector<8x64xf32>
    %863 = tpu.matmul %861, %862, %cst_621 {dimension_numbers = #tpu.dot_dimension_numbers<[1], [0], [0], [1], [0, 0, 1, 1], [], []>} : vector<8x72xbf16>, vector<72x64xbf16>, vector<8x64xf32> -> vector<8x64xf32>
    %c0_622 = arith.constant 0 : index
    %c6_623 = arith.constant 6 : index
    %864 = vector.load %arg7[%c0_622, %c6_623] : memref<8x8xf32, #tpu.memory_space<vmem>>, vector<8x1xf32>
    %865 = vector.broadcast %864 : vector<8x1xf32> to vector<8x64xf32>
    %866 = arith.addf %863, %865 : vector<8x64xf32>
    %cst_624 = arith.constant 0.000000e+00 : bf16
    %867 = vector.broadcast %cst_624 : bf16 to vector<8x9xbf16>
    %c0_625 = arith.constant 0 : index
    %c0_626 = arith.constant 0 : index
    %868 = vector.load %arg11[%c0_625, %c0_626] : memref<8x82xbf16, #tpu.memory_space<vmem>>, vector<8x9xbf16>
    tpu.vector_store %arg11[%c0_625, %c0_626], %867 {strides = array<i32>} : memref<8x82xbf16, #tpu.memory_space<vmem>>, vector<8x9xbf16>,
    %cst_627 = arith.constant 0.000000e+00 : bf16
    %869 = vector.broadcast %cst_627 : bf16 to vector<8x9xbf16>
    %c0_628 = arith.constant 0 : index
    %c73_629 = arith.constant 73 : index
    %870 = vector.load %arg11[%c0_628, %c73_629] : memref<8x82xbf16, #tpu.memory_space<vmem>>, vector<8x9xbf16>
    tpu.vector_store %arg11[%c0_628, %c73_629], %869 {strides = array<i32>} : memref<8x82xbf16, #tpu.memory_space<vmem>>, vector<8x9xbf16>,
    %871 = arith.truncf %866 : vector<8x64xf32> to vector<8x64xbf16>
    %c0_630 = arith.constant 0 : index
    %c9_631 = arith.constant 9 : index
    %872 = vector.load %arg11[%c0_630, %c9_631] : memref<8x82xbf16, #tpu.memory_space<vmem>>, vector<8x64xbf16>
    tpu.vector_store %arg11[%c0_630, %c9_631], %871 {strides = array<i32>} : memref<8x82xbf16, #tpu.memory_space<vmem>>, vector<8x64xbf16>,
    %c0_632 = arith.constant 0 : index
    %c0_633 = arith.constant 0 : index
    %873 = vector.load %arg11[%c0_632, %c0_633] : memref<8x82xbf16, #tpu.memory_space<vmem>>, vector<8x64xbf16>
    %c0_i32_634 = arith.constant 0 : i32
    %874 = arith.sitofp %c0_i32_634 : i32 to bf16
    %875 = vector.shape_cast %803 : vector<1x64xi1> to vector<1x64xi1>
    %876 = vector.broadcast %875 : vector<1x64xi1> to vector<8x64xi1>
    %877 = vector.broadcast %874 : bf16 to vector<8x64xbf16>
    %878 = arith.select %876, %873, %877 : vector<8x64xi1>, vector<8x64xbf16>
    %c0_635 = arith.constant 0 : index
    %c0_636 = arith.constant 0 : index
    %879 = vector.load %arg12[%c0_635, %c0_636] : memref<144x64xbf16, #tpu.memory_space<vmem>>, vector<8x64xbf16>
    tpu.vector_store %arg12[%c0_635, %c0_636], %878 {strides = array<i32>} : memref<144x64xbf16, #tpu.memory_space<vmem>>, vector<8x64xbf16>,
    %c0_637 = arith.constant 0 : index
    %c1_638 = arith.constant 1 : index
    %880 = vector.load %arg11[%c0_637, %c1_638] : memref<8x82xbf16, #tpu.memory_space<vmem>>, vector<8x64xbf16>
    %c8_639 = arith.constant 8 : index
    %c0_640 = arith.constant 0 : index
    %881 = vector.load %arg12[%c8_639, %c0_640] : memref<144x64xbf16, #tpu.memory_space<vmem>>, vector<8x64xbf16>
    tpu.vector_store %arg12[%c8_639, %c0_640], %880 {strides = array<i32>} : memref<144x64xbf16, #tpu.memory_space<vmem>>, vector<8x64xbf16>,
    %c0_641 = arith.constant 0 : index
    %c2_642 = arith.constant 2 : index
    %882 = vector.load %arg11[%c0_641, %c2_642] : memref<8x82xbf16, #tpu.memory_space<vmem>>, vector<8x64xbf16>
    %c0_i32_643 = arith.constant 0 : i32
    %883 = arith.sitofp %c0_i32_643 : i32 to bf16
    %884 = vector.shape_cast %805 : vector<1x64xi1> to vector<1x64xi1>
    %885 = vector.broadcast %884 : vector<1x64xi1> to vector<8x64xi1>
    %886 = vector.broadcast %883 : bf16 to vector<8x64xbf16>
    %887 = arith.select %885, %882, %886 : vector<8x64xi1>, vector<8x64xbf16>
    %c16_644 = arith.constant 16 : index
    %c0_645 = arith.constant 0 : index
    %888 = vector.load %arg12[%c16_644, %c0_645] : memref<144x64xbf16, #tpu.memory_space<vmem>>, vector<8x64xbf16>
    tpu.vector_store %arg12[%c16_644, %c0_645], %887 {strides = array<i32>} : memref<144x64xbf16, #tpu.memory_space<vmem>>, vector<8x64xbf16>,
    %c0_646 = arith.constant 0 : index
    %c8_647 = arith.constant 8 : index
    %889 = vector.load %arg11[%c0_646, %c8_647] : memref<8x82xbf16, #tpu.memory_space<vmem>>, vector<8x64xbf16>
    %c0_i32_648 = arith.constant 0 : i32
    %890 = arith.sitofp %c0_i32_648 : i32 to bf16
    %891 = vector.shape_cast %803 : vector<1x64xi1> to vector<1x64xi1>
    %892 = vector.broadcast %891 : vector<1x64xi1> to vector<8x64xi1>
    %893 = vector.broadcast %890 : bf16 to vector<8x64xbf16>
    %894 = arith.select %892, %889, %893 : vector<8x64xi1>, vector<8x64xbf16>
    %c24_649 = arith.constant 24 : index
    %c0_650 = arith.constant 0 : index
    %895 = vector.load %arg12[%c24_649, %c0_650] : memref<144x64xbf16, #tpu.memory_space<vmem>>, vector<8x64xbf16>
    tpu.vector_store %arg12[%c24_649, %c0_650], %894 {strides = array<i32>} : memref<144x64xbf16, #tpu.memory_space<vmem>>, vector<8x64xbf16>,
    %c0_651 = arith.constant 0 : index
    %c9_652 = arith.constant 9 : index
    %896 = vector.load %arg11[%c0_651, %c9_652] : memref<8x82xbf16, #tpu.memory_space<vmem>>, vector<8x64xbf16>
    %c32_653 = arith.constant 32 : index
    %c0_654 = arith.constant 0 : index
    %897 = vector.load %arg12[%c32_653, %c0_654] : memref<144x64xbf16, #tpu.memory_space<vmem>>, vector<8x64xbf16>
    tpu.vector_store %arg12[%c32_653, %c0_654], %896 {strides = array<i32>} : memref<144x64xbf16, #tpu.memory_space<vmem>>, vector<8x64xbf16>,
    %c0_655 = arith.constant 0 : index
    %c10_656 = arith.constant 10 : index
    %898 = vector.load %arg11[%c0_655, %c10_656] : memref<8x82xbf16, #tpu.memory_space<vmem>>, vector<8x64xbf16>
    %c0_i32_657 = arith.constant 0 : i32
    %899 = arith.sitofp %c0_i32_657 : i32 to bf16
    %900 = vector.shape_cast %805 : vector<1x64xi1> to vector<1x64xi1>
    %901 = vector.broadcast %900 : vector<1x64xi1> to vector<8x64xi1>
    %902 = vector.broadcast %899 : bf16 to vector<8x64xbf16>
    %903 = arith.select %901, %898, %902 : vector<8x64xi1>, vector<8x64xbf16>
    %c40_658 = arith.constant 40 : index
    %c0_659 = arith.constant 0 : index
    %904 = vector.load %arg12[%c40_658, %c0_659] : memref<144x64xbf16, #tpu.memory_space<vmem>>, vector<8x64xbf16>
    tpu.vector_store %arg12[%c40_658, %c0_659], %903 {strides = array<i32>} : memref<144x64xbf16, #tpu.memory_space<vmem>>, vector<8x64xbf16>,
    %c0_660 = arith.constant 0 : index
    %c16_661 = arith.constant 16 : index
    %905 = vector.load %arg11[%c0_660, %c16_661] : memref<8x82xbf16, #tpu.memory_space<vmem>>, vector<8x64xbf16>
    %c0_i32_662 = arith.constant 0 : i32
    %906 = arith.sitofp %c0_i32_662 : i32 to bf16
    %907 = vector.shape_cast %803 : vector<1x64xi1> to vector<1x64xi1>
    %908 = vector.broadcast %907 : vector<1x64xi1> to vector<8x64xi1>
    %909 = vector.broadcast %906 : bf16 to vector<8x64xbf16>
    %910 = arith.select %908, %905, %909 : vector<8x64xi1>, vector<8x64xbf16>
    %c48_663 = arith.constant 48 : index
    %c0_664 = arith.constant 0 : index
    %911 = vector.load %arg12[%c48_663, %c0_664] : memref<144x64xbf16, #tpu.memory_space<vmem>>, vector<8x64xbf16>
    tpu.vector_store %arg12[%c48_663, %c0_664], %910 {strides = array<i32>} : memref<144x64xbf16, #tpu.memory_space<vmem>>, vector<8x64xbf16>,
    %c0_665 = arith.constant 0 : index
    %c17_666 = arith.constant 17 : index
    %912 = vector.load %arg11[%c0_665, %c17_666] : memref<8x82xbf16, #tpu.memory_space<vmem>>, vector<8x64xbf16>
    %c56_667 = arith.constant 56 : index
    %c0_668 = arith.constant 0 : index
    %913 = vector.load %arg12[%c56_667, %c0_668] : memref<144x64xbf16, #tpu.memory_space<vmem>>, vector<8x64xbf16>
    tpu.vector_store %arg12[%c56_667, %c0_668], %912 {strides = array<i32>} : memref<144x64xbf16, #tpu.memory_space<vmem>>, vector<8x64xbf16>,
    %c0_669 = arith.constant 0 : index
    %c18_670 = arith.constant 18 : index
    %914 = vector.load %arg11[%c0_669, %c18_670] : memref<8x82xbf16, #tpu.memory_space<vmem>>, vector<8x64xbf16>
    %c0_i32_671 = arith.constant 0 : i32
    %915 = arith.sitofp %c0_i32_671 : i32 to bf16
    %916 = vector.shape_cast %805 : vector<1x64xi1> to vector<1x64xi1>
    %917 = vector.broadcast %916 : vector<1x64xi1> to vector<8x64xi1>
    %918 = vector.broadcast %915 : bf16 to vector<8x64xbf16>
    %919 = arith.select %917, %914, %918 : vector<8x64xi1>, vector<8x64xbf16>
    %c64_672 = arith.constant 64 : index
    %c0_673 = arith.constant 0 : index
    %920 = vector.load %arg12[%c64_672, %c0_673] : memref<144x64xbf16, #tpu.memory_space<vmem>>, vector<8x64xbf16>
    tpu.vector_store %arg12[%c64_672, %c0_673], %919 {strides = array<i32>} : memref<144x64xbf16, #tpu.memory_space<vmem>>, vector<8x64xbf16>,
    %c0_674 = arith.constant 0 : index
    %c612 = arith.constant 612 : index
    %921 = vector.load %arg6[%c0_674, %c612] : memref<8x684xbf16, #tpu.memory_space<vmem>>, vector<8x72xbf16>
    %c0_675 = arith.constant 0 : index
    %c0_676 = arith.constant 0 : index
    %922 = vector.load %arg12[%c0_675, %c0_676] : memref<144x64xbf16, #tpu.memory_space<vmem>>, vector<72x64xbf16>
    %cst_677 = arith.constant dense<0.000000e+00> : vector<8x64xf32>
    %923 = tpu.matmul %921, %922, %cst_677 {dimension_numbers = #tpu.dot_dimension_numbers<[1], [0], [0], [1], [0, 0, 1, 1], [], []>} : vector<8x72xbf16>, vector<72x64xbf16>, vector<8x64xf32> -> vector<8x64xf32>
    %c0_678 = arith.constant 0 : index
    %c7_679 = arith.constant 7 : index
    %924 = vector.load %arg7[%c0_678, %c7_679] : memref<8x8xf32, #tpu.memory_space<vmem>>, vector<8x1xf32>
    %925 = vector.broadcast %924 : vector<8x1xf32> to vector<8x64xf32>
    %926 = arith.addf %923, %925 : vector<8x64xf32>
    %c0_680 = arith.constant 0 : index
    %c48_681 = arith.constant 48 : index
    %927 = vector.load %arg8[%c0_680, %c48_681] : memref<8x64xbf16, #tpu.memory_space<vmem>>, vector<8x16xbf16>
    %928 = vector.extract_strided_slice %926 {offsets = [0, 0], sizes = [8, 8], strides = [1, 1]} : vector<8x64xf32> to vector<8x8xf32>
    %929 = arith.truncf %928 : vector<8x8xf32> to vector<8x8xbf16>
    %cst_682 = arith.constant dense<0.000000e+00> : vector<8x16xf32>
    %930 = tpu.matmul %929, %927, %cst_682 {dimension_numbers = #tpu.dot_dimension_numbers<[1], [0], [0], [1], [0, 0, 1, 1], [], []>} : vector<8x8xbf16>, vector<8x16xbf16>, vector<8x16xf32> -> vector<8x16xf32>
    %931 = vector.extract_strided_slice %926 {offsets = [0, 8], sizes = [8, 8], strides = [1, 1]} : vector<8x64xf32> to vector<8x8xf32>
    %932 = arith.truncf %931 : vector<8x8xf32> to vector<8x8xbf16>
    %cst_683 = arith.constant dense<0.000000e+00> : vector<8x16xf32>
    %933 = tpu.matmul %932, %927, %cst_683 {dimension_numbers = #tpu.dot_dimension_numbers<[1], [0], [0], [1], [0, 0, 1, 1], [], []>} : vector<8x8xbf16>, vector<8x16xbf16>, vector<8x16xf32> -> vector<8x16xf32>
    %934 = vector.extract_strided_slice %926 {offsets = [0, 16], sizes = [8, 8], strides = [1, 1]} : vector<8x64xf32> to vector<8x8xf32>
    %935 = arith.truncf %934 : vector<8x8xf32> to vector<8x8xbf16>
    %cst_684 = arith.constant dense<0.000000e+00> : vector<8x16xf32>
    %936 = tpu.matmul %935, %927, %cst_684 {dimension_numbers = #tpu.dot_dimension_numbers<[1], [0], [0], [1], [0, 0, 1, 1], [], []>} : vector<8x8xbf16>, vector<8x16xbf16>, vector<8x16xf32> -> vector<8x16xf32>
    %937 = vector.extract_strided_slice %926 {offsets = [0, 24], sizes = [8, 8], strides = [1, 1]} : vector<8x64xf32> to vector<8x8xf32>
    %938 = arith.truncf %937 : vector<8x8xf32> to vector<8x8xbf16>
    %cst_685 = arith.constant dense<0.000000e+00> : vector<8x16xf32>
    %939 = tpu.matmul %938, %927, %cst_685 {dimension_numbers = #tpu.dot_dimension_numbers<[1], [0], [0], [1], [0, 0, 1, 1], [], []>} : vector<8x8xbf16>, vector<8x16xbf16>, vector<8x16xf32> -> vector<8x16xf32>
    %940 = vector.extract_strided_slice %926 {offsets = [0, 32], sizes = [8, 8], strides = [1, 1]} : vector<8x64xf32> to vector<8x8xf32>
    %941 = arith.truncf %940 : vector<8x8xf32> to vector<8x8xbf16>
    %cst_686 = arith.constant dense<0.000000e+00> : vector<8x16xf32>
    %942 = tpu.matmul %941, %927, %cst_686 {dimension_numbers = #tpu.dot_dimension_numbers<[1], [0], [0], [1], [0, 0, 1, 1], [], []>} : vector<8x8xbf16>, vector<8x16xbf16>, vector<8x16xf32> -> vector<8x16xf32>
    %943 = vector.extract_strided_slice %926 {offsets = [0, 40], sizes = [8, 8], strides = [1, 1]} : vector<8x64xf32> to vector<8x8xf32>
    %944 = arith.truncf %943 : vector<8x8xf32> to vector<8x8xbf16>
    %cst_687 = arith.constant dense<0.000000e+00> : vector<8x16xf32>
    %945 = tpu.matmul %944, %927, %cst_687 {dimension_numbers = #tpu.dot_dimension_numbers<[1], [0], [0], [1], [0, 0, 1, 1], [], []>} : vector<8x8xbf16>, vector<8x16xbf16>, vector<8x16xf32> -> vector<8x16xf32>
    %946 = vector.extract_strided_slice %926 {offsets = [0, 48], sizes = [8, 8], strides = [1, 1]} : vector<8x64xf32> to vector<8x8xf32>
    %947 = arith.truncf %946 : vector<8x8xf32> to vector<8x8xbf16>
    %cst_688 = arith.constant dense<0.000000e+00> : vector<8x16xf32>
    %948 = tpu.matmul %947, %927, %cst_688 {dimension_numbers = #tpu.dot_dimension_numbers<[1], [0], [0], [1], [0, 0, 1, 1], [], []>} : vector<8x8xbf16>, vector<8x16xbf16>, vector<8x16xf32> -> vector<8x16xf32>
    %949 = vector.extract_strided_slice %926 {offsets = [0, 56], sizes = [8, 8], strides = [1, 1]} : vector<8x64xf32> to vector<8x8xf32>
    %950 = arith.truncf %949 : vector<8x8xf32> to vector<8x8xbf16>
    %cst_689 = arith.constant dense<0.000000e+00> : vector<8x16xf32>
    %951 = tpu.matmul %950, %927, %cst_689 {dimension_numbers = #tpu.dot_dimension_numbers<[1], [0], [0], [1], [0, 0, 1, 1], [], []>} : vector<8x8xbf16>, vector<8x16xbf16>, vector<8x16xf32> -> vector<8x16xf32>
    %c0_690 = arith.constant 0 : index
    %c24_691 = arith.constant 24 : index
    %c0_692 = arith.constant 0 : index
    %952 = vector.load %arg9[%c0_690, %c24_691, %c0_692] : memref<1x36x256xf32, #tpu.memory_space<vmem>>, vector<1x8x16xf32>
    %953 = vector.shape_cast %952 : vector<1x8x16xf32> to vector<8x16xf32>
    %954 = vector.shape_cast %930 : vector<8x16xf32> to vector<1x8x16xf32>
    tpu.vector_store %arg9[%c0_690, %c24_691, %c0_692], %954 {strides = array<i32>} : memref<1x36x256xf32, #tpu.memory_space<vmem>>, vector<1x8x16xf32>,
    %cst_693 = arith.constant 7.500000e-01 : f32
    %955 = vector.broadcast %cst_693 : f32 to vector<8x16xf32>
    %956 = arith.mulf %955, %930 : vector<8x16xf32>
    %cst_694 = arith.constant 2.500000e-01 : f32
    %957 = vector.broadcast %cst_694 : f32 to vector<8x16xf32>
    %958 = arith.mulf %957, %933 : vector<8x16xf32>
    %959 = arith.addf %956, %958 : vector<8x16xf32>
    %c0_695 = arith.constant 0 : index
    %c24_696 = arith.constant 24 : index
    %c16_697 = arith.constant 16 : index
    %960 = vector.load %arg9[%c0_695, %c24_696, %c16_697] : memref<1x36x256xf32, #tpu.memory_space<vmem>>, vector<1x8x16xf32>
    %961 = vector.shape_cast %960 : vector<1x8x16xf32> to vector<8x16xf32>
    %962 = vector.shape_cast %959 : vector<8x16xf32> to vector<1x8x16xf32>
    tpu.vector_store %arg9[%c0_695, %c24_696, %c16_697], %962 {strides = array<i32>} : memref<1x36x256xf32, #tpu.memory_space<vmem>>, vector<1x8x16xf32>,
    %cst_698 = arith.constant 2.500000e-01 : f32
    %963 = vector.broadcast %cst_698 : f32 to vector<8x16xf32>
    %964 = arith.mulf %963, %930 : vector<8x16xf32>
    %cst_699 = arith.constant 7.500000e-01 : f32
    %965 = vector.broadcast %cst_699 : f32 to vector<8x16xf32>
    %966 = arith.mulf %965, %933 : vector<8x16xf32>
    %967 = arith.addf %964, %966 : vector<8x16xf32>
    %c0_700 = arith.constant 0 : index
    %c24_701 = arith.constant 24 : index
    %c32_702 = arith.constant 32 : index
    %968 = vector.load %arg9[%c0_700, %c24_701, %c32_702] : memref<1x36x256xf32, #tpu.memory_space<vmem>>, vector<1x8x16xf32>
    %969 = vector.shape_cast %968 : vector<1x8x16xf32> to vector<8x16xf32>
    %970 = vector.shape_cast %967 : vector<8x16xf32> to vector<1x8x16xf32>
    tpu.vector_store %arg9[%c0_700, %c24_701, %c32_702], %970 {strides = array<i32>} : memref<1x36x256xf32, #tpu.memory_space<vmem>>, vector<1x8x16xf32>,
    %cst_703 = arith.constant 7.500000e-01 : f32
    %971 = vector.broadcast %cst_703 : f32 to vector<8x16xf32>
    %972 = arith.mulf %971, %933 : vector<8x16xf32>
    %cst_704 = arith.constant 2.500000e-01 : f32
    %973 = vector.broadcast %cst_704 : f32 to vector<8x16xf32>
    %974 = arith.mulf %973, %936 : vector<8x16xf32>
    %975 = arith.addf %972, %974 : vector<8x16xf32>
    %c0_705 = arith.constant 0 : index
    %c24_706 = arith.constant 24 : index
    %c48_707 = arith.constant 48 : index
    %976 = vector.load %arg9[%c0_705, %c24_706, %c48_707] : memref<1x36x256xf32, #tpu.memory_space<vmem>>, vector<1x8x16xf32>
    %977 = vector.shape_cast %976 : vector<1x8x16xf32> to vector<8x16xf32>
    %978 = vector.shape_cast %975 : vector<8x16xf32> to vector<1x8x16xf32>
    tpu.vector_store %arg9[%c0_705, %c24_706, %c48_707], %978 {strides = array<i32>} : memref<1x36x256xf32, #tpu.memory_space<vmem>>, vector<1x8x16xf32>,
    %cst_708 = arith.constant 2.500000e-01 : f32
    %979 = vector.broadcast %cst_708 : f32 to vector<8x16xf32>
    %980 = arith.mulf %979, %933 : vector<8x16xf32>
    %cst_709 = arith.constant 7.500000e-01 : f32
    %981 = vector.broadcast %cst_709 : f32 to vector<8x16xf32>
    %982 = arith.mulf %981, %936 : vector<8x16xf32>
    %983 = arith.addf %980, %982 : vector<8x16xf32>
    %c0_710 = arith.constant 0 : index
    %c24_711 = arith.constant 24 : index
    %c64_712 = arith.constant 64 : index
    %984 = vector.load %arg9[%c0_710, %c24_711, %c64_712] : memref<1x36x256xf32, #tpu.memory_space<vmem>>, vector<1x8x16xf32>
    %985 = vector.shape_cast %984 : vector<1x8x16xf32> to vector<8x16xf32>
    %986 = vector.shape_cast %983 : vector<8x16xf32> to vector<1x8x16xf32>
    tpu.vector_store %arg9[%c0_710, %c24_711, %c64_712], %986 {strides = array<i32>} : memref<1x36x256xf32, #tpu.memory_space<vmem>>, vector<1x8x16xf32>,
    %cst_713 = arith.constant 7.500000e-01 : f32
    %987 = vector.broadcast %cst_713 : f32 to vector<8x16xf32>
    %988 = arith.mulf %987, %936 : vector<8x16xf32>
    %cst_714 = arith.constant 2.500000e-01 : f32
    %989 = vector.broadcast %cst_714 : f32 to vector<8x16xf32>
    %990 = arith.mulf %989, %939 : vector<8x16xf32>
    %991 = arith.addf %988, %990 : vector<8x16xf32>
    %c0_715 = arith.constant 0 : index
    %c24_716 = arith.constant 24 : index
    %c80_717 = arith.constant 80 : index
    %992 = vector.load %arg9[%c0_715, %c24_716, %c80_717] : memref<1x36x256xf32, #tpu.memory_space<vmem>>, vector<1x8x16xf32>
    %993 = vector.shape_cast %992 : vector<1x8x16xf32> to vector<8x16xf32>
    %994 = vector.shape_cast %991 : vector<8x16xf32> to vector<1x8x16xf32>
    tpu.vector_store %arg9[%c0_715, %c24_716, %c80_717], %994 {strides = array<i32>} : memref<1x36x256xf32, #tpu.memory_space<vmem>>, vector<1x8x16xf32>,
    %cst_718 = arith.constant 2.500000e-01 : f32
    %995 = vector.broadcast %cst_718 : f32 to vector<8x16xf32>
    %996 = arith.mulf %995, %936 : vector<8x16xf32>
    %cst_719 = arith.constant 7.500000e-01 : f32
    %997 = vector.broadcast %cst_719 : f32 to vector<8x16xf32>
    %998 = arith.mulf %997, %939 : vector<8x16xf32>
    %999 = arith.addf %996, %998 : vector<8x16xf32>
    %c0_720 = arith.constant 0 : index
    %c24_721 = arith.constant 24 : index
    %c96_722 = arith.constant 96 : index
    %1000 = vector.load %arg9[%c0_720, %c24_721, %c96_722] : memref<1x36x256xf32, #tpu.memory_space<vmem>>, vector<1x8x16xf32>
    %1001 = vector.shape_cast %1000 : vector<1x8x16xf32> to vector<8x16xf32>
    %1002 = vector.shape_cast %999 : vector<8x16xf32> to vector<1x8x16xf32>
    tpu.vector_store %arg9[%c0_720, %c24_721, %c96_722], %1002 {strides = array<i32>} : memref<1x36x256xf32, #tpu.memory_space<vmem>>, vector<1x8x16xf32>,
    %cst_723 = arith.constant 7.500000e-01 : f32
    %1003 = vector.broadcast %cst_723 : f32 to vector<8x16xf32>
    %1004 = arith.mulf %1003, %939 : vector<8x16xf32>
    %cst_724 = arith.constant 2.500000e-01 : f32
    %1005 = vector.broadcast %cst_724 : f32 to vector<8x16xf32>
    %1006 = arith.mulf %1005, %942 : vector<8x16xf32>
    %1007 = arith.addf %1004, %1006 : vector<8x16xf32>
    %c0_725 = arith.constant 0 : index
    %c24_726 = arith.constant 24 : index
    %c112_727 = arith.constant 112 : index
    %1008 = vector.load %arg9[%c0_725, %c24_726, %c112_727] : memref<1x36x256xf32, #tpu.memory_space<vmem>>, vector<1x8x16xf32>
    %1009 = vector.shape_cast %1008 : vector<1x8x16xf32> to vector<8x16xf32>
    %1010 = vector.shape_cast %1007 : vector<8x16xf32> to vector<1x8x16xf32>
    tpu.vector_store %arg9[%c0_725, %c24_726, %c112_727], %1010 {strides = array<i32>} : memref<1x36x256xf32, #tpu.memory_space<vmem>>, vector<1x8x16xf32>,
    %cst_728 = arith.constant 2.500000e-01 : f32
    %1011 = vector.broadcast %cst_728 : f32 to vector<8x16xf32>
    %1012 = arith.mulf %1011, %939 : vector<8x16xf32>
    %cst_729 = arith.constant 7.500000e-01 : f32
    %1013 = vector.broadcast %cst_729 : f32 to vector<8x16xf32>
    %1014 = arith.mulf %1013, %942 : vector<8x16xf32>
    %1015 = arith.addf %1012, %1014 : vector<8x16xf32>
    %c0_730 = arith.constant 0 : index
    %c24_731 = arith.constant 24 : index
    %c128_732 = arith.constant 128 : index
    %1016 = vector.load %arg9[%c0_730, %c24_731, %c128_732] : memref<1x36x256xf32, #tpu.memory_space<vmem>>, vector<1x8x16xf32>
    %1017 = vector.shape_cast %1016 : vector<1x8x16xf32> to vector<8x16xf32>
    %1018 = vector.shape_cast %1015 : vector<8x16xf32> to vector<1x8x16xf32>
    tpu.vector_store %arg9[%c0_730, %c24_731, %c128_732], %1018 {strides = array<i32>} : memref<1x36x256xf32, #tpu.memory_space<vmem>>, vector<1x8x16xf32>,
    %cst_733 = arith.constant 7.500000e-01 : f32
    %1019 = vector.broadcast %cst_733 : f32 to vector<8x16xf32>
    %1020 = arith.mulf %1019, %942 : vector<8x16xf32>
    %cst_734 = arith.constant 2.500000e-01 : f32
    %1021 = vector.broadcast %cst_734 : f32 to vector<8x16xf32>
    %1022 = arith.mulf %1021, %945 : vector<8x16xf32>
    %1023 = arith.addf %1020, %1022 : vector<8x16xf32>
    %c0_735 = arith.constant 0 : index
    %c24_736 = arith.constant 24 : index
    %c144_737 = arith.constant 144 : index
    %1024 = vector.load %arg9[%c0_735, %c24_736, %c144_737] : memref<1x36x256xf32, #tpu.memory_space<vmem>>, vector<1x8x16xf32>
    %1025 = vector.shape_cast %1024 : vector<1x8x16xf32> to vector<8x16xf32>
    %1026 = vector.shape_cast %1023 : vector<8x16xf32> to vector<1x8x16xf32>
    tpu.vector_store %arg9[%c0_735, %c24_736, %c144_737], %1026 {strides = array<i32>} : memref<1x36x256xf32, #tpu.memory_space<vmem>>, vector<1x8x16xf32>,
    %cst_738 = arith.constant 2.500000e-01 : f32
    %1027 = vector.broadcast %cst_738 : f32 to vector<8x16xf32>
    %1028 = arith.mulf %1027, %942 : vector<8x16xf32>
    %cst_739 = arith.constant 7.500000e-01 : f32
    %1029 = vector.broadcast %cst_739 : f32 to vector<8x16xf32>
    %1030 = arith.mulf %1029, %945 : vector<8x16xf32>
    %1031 = arith.addf %1028, %1030 : vector<8x16xf32>
    %c0_740 = arith.constant 0 : index
    %c24_741 = arith.constant 24 : index
    %c160_742 = arith.constant 160 : index
    %1032 = vector.load %arg9[%c0_740, %c24_741, %c160_742] : memref<1x36x256xf32, #tpu.memory_space<vmem>>, vector<1x8x16xf32>
    %1033 = vector.shape_cast %1032 : vector<1x8x16xf32> to vector<8x16xf32>
    %1034 = vector.shape_cast %1031 : vector<8x16xf32> to vector<1x8x16xf32>
    tpu.vector_store %arg9[%c0_740, %c24_741, %c160_742], %1034 {strides = array<i32>} : memref<1x36x256xf32, #tpu.memory_space<vmem>>, vector<1x8x16xf32>,
    %cst_743 = arith.constant 7.500000e-01 : f32
    %1035 = vector.broadcast %cst_743 : f32 to vector<8x16xf32>
    %1036 = arith.mulf %1035, %945 : vector<8x16xf32>
    %cst_744 = arith.constant 2.500000e-01 : f32
    %1037 = vector.broadcast %cst_744 : f32 to vector<8x16xf32>
    %1038 = arith.mulf %1037, %948 : vector<8x16xf32>
    %1039 = arith.addf %1036, %1038 : vector<8x16xf32>
    %c0_745 = arith.constant 0 : index
    %c24_746 = arith.constant 24 : index
    %c176_747 = arith.constant 176 : index
    %1040 = vector.load %arg9[%c0_745, %c24_746, %c176_747] : memref<1x36x256xf32, #tpu.memory_space<vmem>>, vector<1x8x16xf32>
    %1041 = vector.shape_cast %1040 : vector<1x8x16xf32> to vector<8x16xf32>
    %1042 = vector.shape_cast %1039 : vector<8x16xf32> to vector<1x8x16xf32>
    tpu.vector_store %arg9[%c0_745, %c24_746, %c176_747], %1042 {strides = array<i32>} : memref<1x36x256xf32, #tpu.memory_space<vmem>>, vector<1x8x16xf32>,
    %cst_748 = arith.constant 2.500000e-01 : f32
    %1043 = vector.broadcast %cst_748 : f32 to vector<8x16xf32>
    %1044 = arith.mulf %1043, %945 : vector<8x16xf32>
    %cst_749 = arith.constant 7.500000e-01 : f32
    %1045 = vector.broadcast %cst_749 : f32 to vector<8x16xf32>
    %1046 = arith.mulf %1045, %948 : vector<8x16xf32>
    %1047 = arith.addf %1044, %1046 : vector<8x16xf32>
    %c0_750 = arith.constant 0 : index
    %c24_751 = arith.constant 24 : index
    %c192_752 = arith.constant 192 : index
    %1048 = vector.load %arg9[%c0_750, %c24_751, %c192_752] : memref<1x36x256xf32, #tpu.memory_space<vmem>>, vector<1x8x16xf32>
    %1049 = vector.shape_cast %1048 : vector<1x8x16xf32> to vector<8x16xf32>
    %1050 = vector.shape_cast %1047 : vector<8x16xf32> to vector<1x8x16xf32>
    tpu.vector_store %arg9[%c0_750, %c24_751, %c192_752], %1050 {strides = array<i32>} : memref<1x36x256xf32, #tpu.memory_space<vmem>>, vector<1x8x16xf32>,
    %cst_753 = arith.constant 7.500000e-01 : f32
    %1051 = vector.broadcast %cst_753 : f32 to vector<8x16xf32>
    %1052 = arith.mulf %1051, %948 : vector<8x16xf32>
    %cst_754 = arith.constant 2.500000e-01 : f32
    %1053 = vector.broadcast %cst_754 : f32 to vector<8x16xf32>
    %1054 = arith.mulf %1053, %951 : vector<8x16xf32>
    %1055 = arith.addf %1052, %1054 : vector<8x16xf32>
    %c0_755 = arith.constant 0 : index
    %c24_756 = arith.constant 24 : index
    %c208_757 = arith.constant 208 : index
    %1056 = vector.load %arg9[%c0_755, %c24_756, %c208_757] : memref<1x36x256xf32, #tpu.memory_space<vmem>>, vector<1x8x16xf32>
    %1057 = vector.shape_cast %1056 : vector<1x8x16xf32> to vector<8x16xf32>
    %1058 = vector.shape_cast %1055 : vector<8x16xf32> to vector<1x8x16xf32>
    tpu.vector_store %arg9[%c0_755, %c24_756, %c208_757], %1058 {strides = array<i32>} : memref<1x36x256xf32, #tpu.memory_space<vmem>>, vector<1x8x16xf32>,
    %cst_758 = arith.constant 2.500000e-01 : f32
    %1059 = vector.broadcast %cst_758 : f32 to vector<8x16xf32>
    %1060 = arith.mulf %1059, %948 : vector<8x16xf32>
    %cst_759 = arith.constant 7.500000e-01 : f32
    %1061 = vector.broadcast %cst_759 : f32 to vector<8x16xf32>
    %1062 = arith.mulf %1061, %951 : vector<8x16xf32>
    %1063 = arith.addf %1060, %1062 : vector<8x16xf32>
    %c0_760 = arith.constant 0 : index
    %c24_761 = arith.constant 24 : index
    %c224_762 = arith.constant 224 : index
    %1064 = vector.load %arg9[%c0_760, %c24_761, %c224_762] : memref<1x36x256xf32, #tpu.memory_space<vmem>>, vector<1x8x16xf32>
    %1065 = vector.shape_cast %1064 : vector<1x8x16xf32> to vector<8x16xf32>
    %1066 = vector.shape_cast %1063 : vector<8x16xf32> to vector<1x8x16xf32>
    tpu.vector_store %arg9[%c0_760, %c24_761, %c224_762], %1066 {strides = array<i32>} : memref<1x36x256xf32, #tpu.memory_space<vmem>>, vector<1x8x16xf32>,
    %c0_763 = arith.constant 0 : index
    %c24_764 = arith.constant 24 : index
    %c240_765 = arith.constant 240 : index
    %1067 = vector.load %arg9[%c0_763, %c24_764, %c240_765] : memref<1x36x256xf32, #tpu.memory_space<vmem>>, vector<1x8x16xf32>
    %1068 = vector.shape_cast %1067 : vector<1x8x16xf32> to vector<8x16xf32>
    %1069 = vector.shape_cast %951 : vector<8x16xf32> to vector<1x8x16xf32>
    tpu.vector_store %arg9[%c0_763, %c24_764, %c240_765], %1069 {strides = array<i32>} : memref<1x36x256xf32, #tpu.memory_space<vmem>>, vector<1x8x16xf32>,
    %c0_766 = arith.constant 0 : index
    %c0_767 = arith.constant 0 : index
    %c0_768 = arith.constant 0 : index
    %1070 = vector.load %arg5[%c0_766, %c0_767, %c0_768] : memref<1x4x256xf32, #tpu.memory_space<vmem>>, vector<1x4x256xf32>
    %1071 = vector.shape_cast %1070 : vector<1x4x256xf32> to vector<4x256xf32>
    %c0_769 = arith.constant 0 : index
    %c32_770 = arith.constant 32 : index
    %c0_771 = arith.constant 0 : index
    %1072 = vector.load %arg9[%c0_769, %c32_770, %c0_771] : memref<1x36x256xf32, #tpu.memory_space<vmem>>, vector<1x4x256xf32>
    %1073 = vector.shape_cast %1072 : vector<1x4x256xf32> to vector<4x256xf32>
    %1074 = vector.shape_cast %1071 : vector<4x256xf32> to vector<1x4x256xf32>
    tpu.vector_store %arg9[%c0_769, %c32_770, %c0_771], %1074 {strides = array<i32>} : memref<1x36x256xf32, #tpu.memory_space<vmem>>, vector<1x4x256xf32>,
    return
  }
  func.func @transform_0(%arg0: i32) -> (i32, i32, i32) {
    %c0_i32 = arith.constant 0 : i32
    %c0_i32_0 = arith.constant 0 : i32
    %c0_i32_1 = arith.constant 0 : i32
    return %arg0, %c0_i32, %c0_i32_0 : i32, i32, i32
  }
  func.func @transform_1(%arg0: i32) -> (i32, i32, i32) {
    %c0_i32 = arith.constant 0 : i32
    %c0_i32_0 = arith.constant 0 : i32
    %c0_i32_1 = arith.constant 0 : i32
    return %arg0, %c0_i32, %c0_i32_0 : i32, i32, i32
  }
  func.func @transform_2(%arg0: i32) -> (i32, i32, i32) {
    %c0_i32 = arith.constant 0 : i32
    %c0_i32_0 = arith.constant 0 : i32
    %c0_i32_1 = arith.constant 0 : i32
    return %arg0, %c0_i32, %c0_i32_0 : i32, i32, i32
  }
  func.func @transform_3(%arg0: i32) -> (i32, i32, i32) {
    %c0_i32 = arith.constant 0 : i32
    %c0_i32_0 = arith.constant 0 : i32
    %c0_i32_1 = arith.constant 0 : i32
    return %arg0, %c0_i32, %c0_i32_0 : i32, i32, i32
  }
  func.func @transform_4(%arg0: i32) -> (i32, i32, i32) {
    %c0_i32 = arith.constant 0 : i32
    %c0_i32_0 = arith.constant 0 : i32
    %c0_i32_1 = arith.constant 0 : i32
    return %arg0, %c0_i32, %c0_i32_0 : i32, i32, i32
  }
  func.func @transform_5(%arg0: i32) -> (i32, i32) {
    %c0_i32 = arith.constant 0 : i32
    %c0_i32_0 = arith.constant 0 : i32
    %c0_i32_1 = arith.constant 0 : i32
    return %c0_i32, %c0_i32_0 : i32, i32
  }
  func.func @transform_6(%arg0: i32) -> (i32, i32) {
    %c0_i32 = arith.constant 0 : i32
    %c0_i32_0 = arith.constant 0 : i32
    %c0_i32_1 = arith.constant 0 : i32
    return %c0_i32, %c0_i32_0 : i32, i32
  }
  func.func @transform_7(%arg0: i32) -> (i32, i32) {
    %c0_i32 = arith.constant 0 : i32
    %c0_i32_0 = arith.constant 0 : i32
    %c0_i32_1 = arith.constant 0 : i32
    return %c0_i32, %c0_i32_0 : i32, i32
  }
  func.func @transform_8(%arg0: i32) -> (i32, i32, i32) {
    %c0_i32 = arith.constant 0 : i32
    %c0_i32_0 = arith.constant 0 : i32
    %c0_i32_1 = arith.constant 0 : i32
    return %arg0, %c0_i32, %c0_i32_0 : i32, i32, i32
  }
}

</mosaic_0001>

<bundles_post_ra>
// kernel: hcolumns_forward.1
= control target key start
LH: loop header
LB: loop body
LE: loop exit
PB: predicated region body
PF: predicated region fallthrough
CT: control target
= control target key end

     0   :  { %s3908_s27 = smov 0   ;;  %s4949_s0 = inlined_call_operand.vmem [shape: bf16[2,16,4], index: 0, kind: input, shape index: {}]   ;;  %s4950_s1 = inlined_call_operand.vmem [shape: bf16[2,12,16], index: 1, kind: input, shape index: {}]   ;;  %s4951_s2 = inlined_call_operand.vmem [shape: bf16[2,8,64], index: 2, kind: input, shape index: {}]   ;;  %s4952_s3 = inlined_call_operand.vmem [shape: bf16[2,8,64], index: 3, kind: input, shape index: {}]   ;;  %s4953_s4 = inlined_call_operand.vmem [shape: f32[2,4,256], index: 4, kind: input, shape index: {}]   ;;  %s4954_s5 = inlined_call_operand.vmem [shape: bf16[8,684], index: 5, kind: input, shape index: {}]   ;;  %s4955_s6 = inlined_call_operand.vmem [shape: f32[8,8], index: 6, kind: input, shape index: {}]   ;;  %s4956_s7 = inlined_call_operand.vmem [shape: bf16[8,64], index: 7, kind: input, shape index: {}]   ;;  %s4957_s8 = inlined_call_operand.vmem [shape: f32[2,36,256], index: 8, kind: output, shape index: {}]  }
   0x1 LB: > { %s3281_s28 = sadd.s32 4294967295, %s3815_s27   ;;  %p3285_p0 = scmp.ge.s32.totalorder %s3815_s27, 1  ;;  %s3815_s27 = sphi %s3908_s27, %s18_s27  }
   0x2   : > { %p300_p1 = scmp.lt.s32.totalorder %s3815_s27, 3 }
   0x4   : > { %p301_p2 = pnand %p3285_p0, %p300_p1 }
   0x5   : > { %p352_p3 = scmp.lt.s32.totalorder (!%p301_p2), %s3281_s28, 1  ;;  %v383_v0 = vlaneseq (!%p301_p2)  ;;  %vm399_vm0 = vcmask (!%p301_p2), 23552   ;;  %vm401_vm1 = vcmask (!%p301_p2), 80952   ;;  %v3817_v1 = vmov (!%p301_p2), 0   ;;  %s3818_s18 = smov (!%p301_p2), 3   ;;  %v504_v28 = vld [vmem:[%s4954_s5] sm:$0xff] (!%p301_p2) }
   0x6   : > { %304 = sbr.rel (%p301_p2) target bundleno = 3669 (0xe55), region = 52  ;;  %400 = vst.msk [vmem:[#allocation2] sm:$0xff] (!%p301_p2), %vm399_vm0, %v3817_v1  ;;  %530 = vmatprep.subr.bf16.mxu0 (!%p301_p2), %v3817_v1  ;;  %3767 = vset.pattern.permute.xlu0 (!%p301_p2), %v3817_v1  ;;  %s3819_s19 = smov (!%p301_p2), 2   ;;  %vm413_vm6 = vcmask (!%p301_p2), 56344   ;;  %vm945_vm9 = vcmask (!%p301_p2), 37888   ;;  %vm426_vm10 = vcmask (!%p301_p2), 31744   ;;  %v3297_v29 = vcombine.high (!%p301_p2), %v504_v28, %v504_v28 }
   0x7   : > { %v3921_v2 = vand.u32 (!%p301_p2), 127, %v383_v0  ;;  %v421_v3 = vshrl.u32 (!%p301_p2), %v383_v0, 7  ;;  %402 = vst.msk [vmem:[#allocation2] sm:$0xff] (!%p301_p2), %vm401_vm1, %v3817_v1  ;;  %s3820_s20 = smov (!%p301_p2), 4   ;;  %s3821_s21 = smov (!%p301_p2), 6   ;;  %vm947_vm11 = vcmask (!%p301_p2), 210088   ;;  %v3296_v47 = vcombine.low (!%p301_p2), %v504_v28, %v504_v28 }
   0x8   : > { %s3822_s22 = smov (!%p301_p2), 127   ;;  %s3823_s23 = smov (!%p301_p2), 126   ;;  %vm4960_vm0 = vcmask (!%p301_p2), 130048   ;;  %v3993_v30 = vld [vmem:[%s4955_s6] sm:$0xff] (!%p301_p2) }
   0x9   : > { %v389_v4 = vand.u32 (!%p301_p2), 1, %v3921_v2  ;;  %v3937_v5 = vsub.s32 (!%p301_p2), 0, %v421_v3  ;;  %s3824_s24 = smov (!%p301_p2), 125   ;;  %s3825_s25 = smov (!%p301_p2), 124   ;;  %3298 = vmatprep.mubr.msk.bf16.mxu0 (!%p301_p2), %vm4960_vm0, %v3297_v29  ;;  %v935_v48 = vand.u32 (!%p301_p2), 3, %v3921_v2 }
   0xa   : > { %s3826_s26 = smov (!%p301_p2), 123   ;;  %s3829_s16 = smov (!%p301_p2), 5  }
   0xb   : > { %vm3939_vm2 = vcmp.ne.s32.totalorder (!%p301_p2), %v389_v4, 0  ;;  %vm398_vm4 = vcmp.ne.s32.totalorder (!%p301_p2), %v389_v4, 1  ;;  %vm944_vm1 = vcmp.ne.s32.totalorder (!%p301_p2), %v935_v48, 3  ;;  %s3830_s9 = smov (!%p301_p2), 10   ;;  %s3834_s12 = smov (!%p301_p2), 119  }
   0xc   : > { %vm418_vm3 = vmpackc.low (!%p301_p2), %vm3939_vm2, %vm3939_vm2  ;;  %vm1140_vm2 = vcmask (!%p301_p2), 208040   ;;  %s3835_s13 = smov (!%p301_p2), 40   ;;  %s3846_s10 = smov (!%p301_p2), 110  }
   0xd   : > { %s4977_s28 = smov (!%p352_p3, %s3281_s28), 1  ;;  %v3959_v10 = vsel %vm418_vm3, 65537, %v3817_v1  ;;  %vm437_vm5 = vmpackc.low %vm398_vm4, %vm398_vm4 }
   0xe   : > { %s3925_s29 = sshll.u32 %s4977_s28, 3  ;;  %s3712_s30 = smul.u32 80, %s4977_s28  ;;  %v423_v11 = vrot.slane %v3959_v10, %v3937_v5  ;;  %v3964_v12 = vsel %vm437_vm5, 65537, %v3817_v1  ;;  %vm987_vm4 = vmpackc.low %vm944_vm1, %vm944_vm1  ;;  %vm4025_vm5 = vcmp.ne.s32.totalorder %v935_v48, 0 }
   0xf   : > { %s356_s11 = scalar_lea.vmem %s4949_s0, %s3925_s29  ;;  %s374_s14 = scalar_lea.vmem %s4953_s4, %s3925_s29  ;;  %v442_v13 = vrot.slane %v3964_v12, %v3937_v5  ;;  %v4021_v49 = vsel %vm987_vm4, 65537, %v3817_v1  ;;  %vm1138_vm4 = vcmask 35840  }
  0x10   : > { %v3776_v6 = vld [vmem:[%s356_s11] sm:$0xff]   ;;  %s3946_s17 = scalar_lea.vmem %s4957_s8, %s3712_s30  ;;  %453 = vrot.lane.b32.xlu1 %v423_v11, %s3819_s19  ;;  %vm424_vm7 = vcmp.ne.s16.totalorder %v423_v11, 0  ;;  %s3827_s30 = smov 122   ;;  %v992_v50 = vrot.slane %v4021_v49, %v3937_v5 }
  0x11   : > { %v3172_v8 = vld [vmem:[%s374_s14] sm:$0xff]  ;;  %410 = vrot.lane.b32.xlu0 %v3776_v6, %s3818_s18  ;;  %s361_s15 = scalar_lea.vmem %s4950_s1, %s3925_s29  ;;  %s3828_s29 = smov 8  }
  0x12   : > { %v3174_v9 = vcombine.high %v3172_v8, %v3172_v8  ;;  %3176 = vst [vmem:[%s3946_s17 + $0x40] sm:$0xf] %v3172_v8  ;;  %v3780_v61 = vld [vmem:[%s361_s15] sm:$0x3f]   ;;  %v3831_v8 = vmov 0.0   ;;  %s3833_s11 = smov 118  }
  0x13   : > { %3478 = vmatprep.subr.bf16.mxu1 %v3831_v8  ;;  %s3857_s14 = smov 72  }
  0x14   : > { %3177 = vst [vmem:[%s3946_s17 + $0x48] sm:$0xf] %v3174_v9  ;;  %469 = vrot.lane.b32.xlu1 %v442_v13, %s3820_s20 }
  0x15   : > { %443 = vrot.lane.b32.xlu0 %v442_v13, %s3819_s19 }
  0x18   : > { %495 = vrot.lane.b32.xlu1 %v442_v13, %s3821_s21 }
  0x19   : > { %479 = vrot.lane.b32.xlu0 %v423_v11, %s3820_s20 }
  0x82   : > { %v454_v15 = vpop.permute.xlu1 %453 }
  0x83   : > { %v411_v14 = vpop.permute.xlu0 %410  ;;  %vm455_vm12 = vcmp.ne.s16.totalorder %v454_v15, 0 }
  0x84   : > { %414 = vst.msk [vmem:[#allocation2] sm:$0xff] %vm413_vm6, %v411_v14  ;;  %vm964_vm6 = vmpackc.low %vm4025_vm5, %vm4025_vm5 }
  0x85   : > { %v4039_v52 = vsel %vm964_vm6, 65537, %v3817_v1 }
  0x86   : > { %v470_v19 = vpop.permute.xlu1 %469  ;;  %v4043_v53 = vrot.slane %v4039_v52, %v3937_v5 }
  0x87   : > { %v444_v16 = vpop.permute.xlu0 %443  ;;  %vm471_vm13 = vcmp.ne.s16.totalorder %v470_v19, 0 }
  0x88   : > { %vm445_vm8 = vcmp.ne.s16.totalorder %v444_v16, 0 }
  0x8a   : > { %v496_v23 = vpop.permute.xlu1 %495 }
  0x8b   : > { %v415_v17 = vld [vmem:[#allocation2] sm:$0xff]  ;;  %v480_v21 = vpop.permute.xlu0 %479  ;;  %vm497_vm15 = vcmp.ne.s16.totalorder %v496_v23, 0 }
  0x8c   : > { %v425_v18 = vsel %vm424_vm7, %v415_v17, 0  ;;  %430 = vrot.lane.b32.xlu0 %v415_v17, %s3822_s22  ;;  %v446_v20 = vsel %vm445_vm8, %v415_v17, 0  ;;  %946 = vst.msk [vmem:[#allocation2] sm:$0x3f] %vm945_vm9, %v3817_v1  ;;  %v456_v22 = vsel %vm455_vm12, %v415_v17, 0  ;;  %vm481_vm14 = vcmp.ne.s16.totalorder %v480_v21, 0 }
  0x8d   : > { %427 = vst.msk [vmem:[#allocation4] sm:$0xff] %vm426_vm10, %v425_v18  ;;  %448 = vrot.lane.b32.xlu1 %v446_v20, %s3823_s23  ;;  %v472_v24 = vsel %vm471_vm13, %v415_v17, 0  ;;  %v482_v26 = vsel %vm481_vm14, %v415_v17, 0  ;;  %v498_v27 = vsel %vm497_vm15, %v415_v17, 0  ;;  %vm570_vm7 = vcmask 19456  }
  0x8e   : > { %948 = vst.msk [vmem:[#allocation2] sm:$0x3f] %vm947_vm11, %v3817_v1  ;;  %vm572_vm8 = vcmask 76856   ;;  %vm581_vm9 = vcmask 52248   ;;  %vm959_vm11 = vcmask 169000   ;;  %vm585_vm12 = vcmask 27648  }
  0x8f   : > { %571 = vst.msk [vmem:[#allocation3] sm:$0xf] %vm570_vm7, %v3817_v1  ;;  %vm1612_vm7 = vcmask 667208  }
  0x90   : > { %458 = vrot.lane.b32.xlu0 %v456_v22, %s3823_s23  ;;  %573 = vst.msk [vmem:[#allocation3] sm:$0xf] %vm572_vm8, %v3817_v1 }
  0x91   : > { %464 = vrot.lane.b32.xlu1 %v415_v17, %s3824_s24 }
  0x94   : > { %474 = vrot.lane.b32.xlu0 %v472_v24, %s3825_s25  ;;  %v505_v25 = vld [vmem:[#allocation4] sm:$0xff] }
  0x95   : > { %531 = vmatpush1.bf16.msra.mxu0 %v505_v25  ;;  %484 = vrot.lane.b32.xlu1 %v482_v26, %s3825_s25 }
  0x96   : > { %532 = vmatprep.subr.bf16.mxu0 %v3817_v1 }
  0x98   : > { %490 = vrot.lane.b32.xlu0 %v415_v17, %s3826_s26 }
  0x99   : > { %500 = vrot.lane.b32.xlu1 %v498_v27, %s3827_s30 }
  0x9c   : > { %517 = vperm.xlu0 %3767, %v3993_v30  }
  0xa0   : > { %597 = vrot.lane.b32.xlu0 %v3964_v12, %s3819_s19 }
  0xa4   : > { %629 = vrot.lane.b32.xlu0 %v3964_v12, %s3820_s20 }
  0xa8   : > { %993 = vrot.lane.b32.xlu0 %v992_v50, %s3819_s19 }
  0xac   : > { %1007 = vrot.lane.b32.xlu0 %v4043_v53, %s3820_s20 }
  0xb0   : > { %1037 = vrot.lane.b32.xlu0 %v4043_v53, %s3828_s29 }
  0xfe   : > { %v431_v31 = vpop.permute.xlu0 %430 }
  0xff   : > { %433 = vst.msk [vmem:[#allocation4 + $0x8] sm:$0xff] %vm426_vm10, %v431_v31  ;;  %v449_v32 = vpop.permute.xlu1 %448 }
 0x100   : > { %451 = vst.msk [vmem:[#allocation4 + $0x10] sm:$0xff] %vm426_vm10, %v449_v32 }
 0x102   : > { %v459_v33 = vpop.permute.xlu0 %458 }
 0x103   : > { %461 = vst.msk [vmem:[#allocation4 + $0x18] sm:$0xff] %vm426_vm10, %v459_v33  ;;  %v465_v34 = vpop.permute.xlu1 %464 }
 0x104   : > { %467 = vst.msk [vmem:[#allocation4 + $0x20] sm:$0xff] %vm426_vm10, %v465_v34 }
 0x106   : > { %v506_v35 = vld [vmem:[#allocation4 + $0x8] sm:$0xff]  ;;  %v475_v36 = vpop.permute.xlu0 %474 }
 0x107   : > { %477 = vst.msk [vmem:[#allocation4 + $0x28] sm:$0xff] %vm426_vm10, %v475_v36  ;;  %v485_v37 = vpop.permute.xlu1 %484  ;;  %533 = vmatpush1.bf16.msra.mxu0 %v506_v35  ;;  %v507_v38 = vld [vmem:[#allocation4 + $0x10] sm:$0xff] }
 0x108   : > { %487 = vst.msk [vmem:[#allocation4 + $0x30] sm:$0xff] %vm426_vm10, %v485_v37  ;;  %534 = vmatprep.subr.bf16.mxu0 %v3817_v1 }
 0x10a   : > { %v491_v39 = vpop.permute.xlu0 %490  ;;  %v508_v41 = vld [vmem:[#allocation4 + $0x18] sm:$0xff] }
 0x10b   : > { %493 = vst.msk [vmem:[#allocation4 + $0x38] sm:$0xff] %vm426_vm10, %v491_v39  ;;  %v501_v40 = vpop.permute.xlu1 %500  ;;  %535 = vmatpush1.bf16.msra.mxu0 %v507_v38  ;;  %v509_v42 = vld [vmem:[#allocation4 + $0x20] sm:$0xff] }
 0x10c   : > { %503 = vst.msk [vmem:[#allocation4 + $0x40] sm:$0xff] %vm426_vm10, %v501_v40  ;;  %536 = vmatprep.subr.bf16.mxu0 %v3817_v1 }
 0x10e   : > { %v510_v43 = vld [vmem:[#allocation4 + $0x28] sm:$0xff] }
 0x10f   : > { %537 = vmatpush1.bf16.msra.mxu0 %v508_v41  ;;  %v511_v44 = vld [vmem:[#allocation4 + $0x30] sm:$0xff] }
 0x110   : > { %538 = vmatprep.subr.bf16.mxu0 %v3817_v1 }
 0x112   : > { %v512_v45 = vld [vmem:[#allocation4 + $0x38] sm:$0xff] }
 0x113   : > { %539 = vmatpush1.bf16.msra.mxu0 %v509_v42  ;;  %v513_v46 = vld [vmem:[#allocation4 + $0x40] sm:$0xff] }
 0x114   : > { %540 = vmatprep.subr.bf16.mxu0 %v3817_v1 }
 0x117   : > { %541 = vmatpush1.bf16.msra.mxu0 %v510_v43 }
 0x118   : > { %542 = vmatprep.subr.bf16.mxu0 %v3817_v1 }
 0x11b   : > { %543 = vmatpush1.bf16.msra.mxu0 %v511_v44  ;;  %v518_v54 = vpop.permute.xlu0 %517 }
 0x11c   : > { %544 = vmatprep.subr.bf16.mxu0 %v3817_v1 }
 0x11f   : > { %545 = vmatpush1.bf16.msra.mxu0 %v512_v45  ;;  %v598_v62 = vpop.permute.xlu0 %597 }
 0x120   : > { %546 = vmatprep.subr.bf16.mxu0 %v3817_v1  ;;  %vm599_vm13 = vcmp.ne.s16.totalorder %v598_v62, 0  ;;  %v3786_v62 = vld [vmem:[%s4954_s5 + $0x4] ss:$0 sps:$4 sm:$0xff]  }
 0x123   : > { %547 = vmatpush1.bf16.msra.mxu0 %v513_v46  ;;  %v630_v0 = vpop.permute.xlu0 %629 }
 0x124   : > { %3504 = vmatprep.subr.bf16.mxu0 %v3831_v8  ;;  %vm631_vm1 = vcmp.ne.s16.totalorder %v630_v0, 0  ;;  %v3839_v0 = vmov 1  }
 0x126   : > { %563 = vmatmul.mubr.bf16.vlgmr.msra.gmra.mrb[0].mxu0 %v3296_v47 }
 0x127   : > { %v994_v11 = vpop.permute.xlu0 %993 }
 0x128   : > { %vm995_vm14 = vcmp.ne.s16.totalorder %v994_v11, 0 }
 0x12b   : > { %v1008_v36 = vpop.permute.xlu0 %1007 }
 0x12f   : > { %v1038_v41 = vpop.permute.xlu0 %1037 }
 0x1f9   : > { %v564_v55 = vpop.f32.mrb[0].mxu0 }
 0x1fa   : > { %v565_v56 = vadd.f32 %v564_v55, %v518_v54  ;;  %v566_v57 = vpop.f32.mrb[1].mxu0 }
 0x1fb   : > { %v567_v58 = vpop.f32.mrb[2].mxu0  ;;  %v1065_v57 = vld [vmem:[%s4954_s5 + $0x4] sm:$0xff] }
 0x1fc   : > { %v3386_v59 = vpack.c.bf16 %v565_v56, %v565_v56  ;;  %v568_v60 = vpop.f32.mrb[3].mxu0 }
 0x1fd   : > { %v3314_v60 = vcombine.high %v1065_v57, %v1065_v57 }
 0x1fe   : > { %578 = vrot.lane.b32.xlu1 %v3386_v59, %s3818_s18  ;;  %s3832_s18 = smov 120  }
 0x202   : > { %956 = vrot.lane.b32.xlu1 %v3780_v61, %s3829_s16  ;;  %v3313_v61 = vcombine.low %v1065_v57, %v1065_v57 }
 0x206   : > { %609 = vrot.lane.b32.xlu1 %v3959_v10, %s3819_s19 }
 0x20a   : > { %641 = vrot.lane.b32.xlu1 %v3959_v10, %s3820_s20 }
 0x20e   : > { %661 = vrot.lane.b32.xlu1 %v3964_v12, %s3821_s21 }
 0x212   : > { %1025 = vrot.lane.b32.xlu1 %v992_v50, %s3821_s21 }
 0x216   : > { %1056 = vrot.lane.b32.xlu1 %v992_v50, %s3830_s9 }
 0x270   : > { %v579_v63 = vpop.permute.xlu1 %578 }
 0x271   : > { %582 = vst.msk [vmem:[#allocation3] sm:$0xf] %vm581_vm9, %v579_v63  ;;  %v3837_v63 = vmov 2  }
 0x272   : > { %3768 = vset.pattern.permute.xlu1 %v3837_v63 }
 0x274   : > { %v957_v3 = vpop.permute.xlu1 %956 }
 0x275   : > { %960 = vst.msk [vmem:[#allocation2] sm:$0x3f] %vm959_vm11, %v957_v3  ;;  %vm1009_vm11 = vcmp.ne.s16.totalorder %v1008_v36, 0 }
 0x278   : > { %v583_v4 = vld [vmem:[#allocation3] sm:$0xf]  ;;  %v610_v6 = vpop.permute.xlu1 %609 }
 0x279   : > { %v3781_v9 = vld [vmem:[#allocation3] ss:$0 sps:$4 sm:$0xff]   ;;  %v584_v10 = vsel %vm418_vm3, %v583_v4, 0  ;;  %vm611_vm15 = vcmp.ne.s16.totalorder %v610_v6, 0  ;;  %vm1610_vm3 = vcmask 68608  }
 0x27a   : > { %v608_v12 = vld [vmem:[#allocation3] sm:$0xf]  ;;  %586 = vst.msk [vmem:[#allocation4] sm:$0xf] %vm585_vm12, %v584_v10  ;;  %624 = vrot.lane.b32.xlu1 %v3781_v9, %s3824_s24  ;;  %s4958_s24 = smov 112  }
 0x27b   : > { %v3782_v13 = vld [vmem:[#allocation3] ss:$0 sps:$4 sm:$0xff]   ;;  %v612_v18 = vsel %vm611_vm15, %v608_v12, 0 }
 0x27c   : > { %v596_v14 = vld [vmem:[#allocation3] sm:$0xf]  ;;  %591 = vrot.lane.b32.xlu0 %v3782_v13, %s3822_s22  ;;  %v642_v15 = vpop.permute.xlu1 %641  ;;  %v984_v17 = vld [vmem:[#allocation2] sm:$0x3f]  ;;  %v3302_v37 = vcombine.low %v612_v18, %v612_v18 }
 0x27d   : > { %v600_v16 = vsel %vm599_vm13, %v596_v14, 0  ;;  %v640_v19 = vld [vmem:[#allocation3] sm:$0xf]  ;;  %v996_v21 = vsel %vm995_vm14, %v984_v17, 0  ;;  %v974_v22 = vld [vmem:[#allocation2] sm:$0x3f] }
 0x27e   : > { %v3301_v7 = vcombine.low %v600_v16, %v600_v16  ;;  %v660_v20 = vld [vmem:[#allocation3] sm:$0xf]  ;;  %v1006_v23 = vld [vmem:[#allocation2] sm:$0x3f]  ;;  %v998_v25 = vrot.slane %v996_v21, 4  ;;  %v976_v26 = vrot.slane %v974_v22, 2 }
 0x27f   : > { %v1036_v24 = vld [vmem:[#allocation2] sm:$0x3f]  ;;  %v3783_v29 = vld [vmem:[#allocation3] ss:$0 sps:$4 sm:$0xff]   ;;  %vm643_vm9 = vcmp.ne.s16.totalorder %v642_v15, 0  ;;  %vm1039_vm13 = vcmp.ne.s16.totalorder %v1038_v41, 0 }
 0x280   : > { %604 = vrot.lane.b32.xlu1 %v3301_v7, %s3823_s23  ;;  %v1024_v27 = vld [vmem:[#allocation2] sm:$0x3f]  ;;  %v662_v28 = vpop.permute.xlu1 %661  ;;  %v628_v31 = vld [vmem:[#allocation3] sm:$0xf]  ;;  %999 = vrot.lane.b32.xlu0 %v998_v25, %s3823_s23  ;;  %v644_v42 = vsel %vm643_vm9, %v640_v19, 0  ;;  %v1010_v46 = vsel %vm1009_vm11, %v1006_v23, 0 }
 0x281   : > { %v1018_v32 = vld [vmem:[#allocation2] sm:$0x3f]  ;;  %1139 = vst.msk [vmem:[#allocation3] sm:$0xf] %vm1138_vm4, %v3817_v1  ;;  %vm663_vm8 = vcmp.ne.s16.totalorder %v662_v28, 0  ;;  %v632_v38 = vsel %vm631_vm1, %v628_v31, 0  ;;  %v3305_v45 = vcombine.low %v644_v42, %v644_v42 }
 0x282   : > { %v1055_v33 = vld [vmem:[#allocation2] sm:$0x3f]  ;;  %1141 = vst.msk [vmem:[#allocation3] sm:$0xf] %vm1140_vm2, %v3817_v1  ;;  %v664_v39 = vsel %vm663_vm8, %v660_v20, 0  ;;  %v3304_v40 = vcombine.low %v632_v38, %v632_v38  ;;  %v1040_v47 = vsel %vm1039_vm13, %v1036_v24, 0 }
 0x283   : > { %v1048_v34 = vld [vmem:[#allocation2] sm:$0x3f]  ;;  %v3307_v43 = vcombine.low %v664_v39, %v664_v39  ;;  %v1012_v48 = vrot.slane %v1010_v46, 6  ;;  %v1042_v55 = vrot.slane %v1040_v47, 4  ;;  %vm3836_vm1 = vmmov 0  }
 0x284   : > { %v4076_v35 = vld [vmem:[#allocation2] sm:$0x3f]  ;;  %977 = vrot.lane.b32.xlu1 %v976_v26, %s3822_s22  ;;  %616 = vrot.lane.b32.xlu0 %v3302_v37, %s3823_s23  ;;  %v1026_v44 = vpop.permute.xlu1 %1025  ;;  %v1050_v59 = vrot.slane %v1048_v34, 6  ;;  %vm594_vm4 = vcmask 31748   ;;  %vm970_vm2 = vcmp.ne.s16.totalorder %v4043_v53, 0  ;;  %vm972_vm8 = vcmask 128000  }
 0x285   : > { %1611 = vst.msk [vmem:[#allocation2] sm:$0xf] %vm1610_vm3, %v3817_v1  ;;  %vm1027_vm14 = vcmp.ne.s16.totalorder %v1026_v44, 0  ;;  %3518 = vmatprep.mubr.msk.bf16.mxu0 %vm3836_vm1, %v3831_v8  ;;  %3488 = vmatprep.mubr.msk.bf16.mxu1 %vm3836_vm1, %v3831_v8  ;;  %vm980_vm9 = vcmask 130054   ;;  %v971_v11 = vsel %vm970_vm2, %v4076_v35, 0  ;;  %vm1002_vm11 = vcmask 130052  }
 0x286   : > { %1613 = vst.msk [vmem:[#allocation2] sm:$0xf] %vm1612_vm7, %v3817_v1  ;;  %v1028_v50 = vsel %vm1027_vm14, %v1024_v27, 0  ;;  %vm982_vm13 = vcmask 125952   ;;  %vm1004_vm14 = vcmask 123904   ;;  %vm1094_vm2 = vcmask 1045504  }
 0x287   : > { %v1030_v56 = vrot.slane %v1028_v50, 2  ;;  %v737_v47 = vld [vmem:[%s4956_s7] sm:$0x1] }
 0x288   : > { %656 = vrot.lane.b32.xlu1 %v3783_v29, %s3826_s26  ;;  %636 = vrot.lane.b32.xlu0 %v3304_v40, %s3825_s25  ;;  %v1057_v54 = vpop.permute.xlu1 %1056 }
 0x289   : > { %vm1058_vm15 = vcmp.ne.s16.totalorder %v1057_v54, 0 }
 0x28a   : > { %v1059_v58 = vsel %vm1058_vm15, %v1055_v33, 0  ;;  %vm1016_vm15 = vcmask 130050  }
 0x28c   : > { %668 = vrot.lane.b32.xlu1 %v3307_v43, %s3827_s30  ;;  %648 = vrot.lane.b32.xlu0 %v3305_v45, %s3825_s25 }
 0x290   : > { %1020 = vrot.lane.b32.xlu1 %v1018_v32, %s3826_s26  ;;  %1013 = vrot.lane.b32.xlu0 %v1012_v48, %s3825_s25 }
 0x294   : > { %1043 = vrot.lane.b32.xlu1 %v1042_v55, %s3832_s18  ;;  %1031 = vrot.lane.b32.xlu0 %v1030_v56, %s3827_s30 }
 0x298   : > { %1061 = vrot.lane.b32.xlu1 %v1059_v58, %s3833_s11  ;;  %1051 = vrot.lane.b32.xlu0 %v1050_v59, %s3834_s12 }
 0x29c   : > { %1086 = vrot.lane.b32.xlu1 %v3314_v60, %s3835_s13  ;;  %1084 = vrot.lane.b32.xlu0 %v3313_v61, %s3835_s13  ;;  %s3844_s13 = smov 16  }
 0x2a0   : > { %687 = vrot.lane.b32.xlu0 %v3786_v62, %s4958_s24  ;;  %1076 = vperm.xlu1 %3768, %v3993_v30  }
 0x2a4   : > { %3769 = vset.pattern.permute.xlu1 %v3839_v0 }
 0x2a5   : > { %681 = vperm.xlu1 %3769, %v3993_v30  }
 0x2a9   : > { %1175 = vrot.lane.b32.xlu1 %v4039_v52, %s3820_s20  ;;  %s4969_s20 = smov 112  }
 0x2ad   : > { %1207 = vrot.lane.b32.xlu1 %v4039_v52, %s3828_s29 }
 0x2ec   : > { %v625_v3 = vpop.permute.xlu1 %624 }
 0x2ed   : > { %627 = vst.msk [vmem:[#allocation4 + $0x10] sm:$0xf] %vm585_vm12, %v625_v3 }
 0x2ee   : > { %v592_v4 = vpop.permute.xlu0 %591 }
 0x2ef   : > { %595 = vst.msk [vmem:[#allocation4] sm:$0xf0] %vm594_vm4, %v592_v4 }
 0x2f2   : > { %v605_v6 = vpop.permute.xlu1 %604  ;;  %v1000_v9 = vpop.permute.xlu0 %999 }
 0x2f3   : > { %607 = vst.msk [vmem:[#allocation4 + $0x8] sm:$0xf] %vm585_vm12, %v605_v6 }
 0x2f6   : > { %v978_v10 = vpop.permute.xlu1 %977  ;;  %v673_v12 = vld [vmem:[#allocation4] sm:$0xff]  ;;  %v617_v52 = vpop.permute.xlu0 %616 }
 0x2f7   : > { %973 = vst.msk [vmem:[#allocation4] sm:$0x3f] %vm972_vm8, %v971_v11  ;;  %3479 = vmatpush3.bf16.msra.mxu1 %v673_v12 }
 0x2f8   : > { %981 = vst.msk [vmem:[#allocation4] sm:$0xc0] %vm980_vm9, %v978_v10  ;;  %3480 = vmatprep.subr.bf16.mxu1 %v3831_v8 }
 0x2f9   : > { %619 = vst.msk [vmem:[#allocation4 + $0x8] sm:$0xf0] %vm594_vm4, %v617_v52 }
 0x2fa   : > { %v657_v13 = vpop.permute.xlu1 %656  ;;  %v637_v53 = vpop.permute.xlu0 %636 }
 0x2fb   : > { %659 = vst.msk [vmem:[#allocation4 + $0x18] sm:$0xf0] %vm594_vm4, %v657_v13  ;;  %639 = vst.msk [vmem:[#allocation4 + $0x10] sm:$0xf0] %vm594_vm4, %v637_v53  ;;  %vm689_vm4 = vcmask 588800  }
 0x2fe   : > { %v669_v14 = vpop.permute.xlu1 %668  ;;  %v649_v7 = vpop.permute.xlu0 %648 }
 0x2ff   : > { %671 = vst.msk [vmem:[#allocation4 + $0x20] sm:$0xf] %vm585_vm12, %v669_v14  ;;  %v1066_v15 = vld [vmem:[#allocation4] sm:$0xff]  ;;  %651 = vst.msk [vmem:[#allocation4 + $0x18] sm:$0xf] %vm585_vm12, %v649_v7  ;;  %vm693_vm12 = vcmask 1043456  }
 0x300   : > { %v674_v16 = vld [vmem:[#allocation4 + $0x8] sm:$0xff]  ;;  %3505 = vmatpush3.bf16.msra.mxu0 %v1066_v15 }
 0x301   : > { %1003 = vst.msk [vmem:[#allocation4 + $0x8] sm:$0xf0] %vm1002_vm11, %v1000_v9  ;;  %3481 = vmatpush3.bf16.msra.mxu1 %v674_v16  ;;  %3506 = vmatprep.subr.bf16.mxu0 %v3831_v8 }
 0x302   : > { %983 = vst.msk [vmem:[#allocation4 + $0x8] sm:$0xf] %vm982_vm13, %v978_v10  ;;  %v1021_v17 = vpop.permute.xlu1 %1020  ;;  %3482 = vmatprep.subr.bf16.mxu1 %v3831_v8  ;;  %v675_v18 = vld [vmem:[#allocation4 + $0x10] sm:$0xff]  ;;  %v1014_v19 = vpop.permute.xlu0 %1013 }
 0x303   : > { %1005 = vst.msk [vmem:[#allocation4 + $0x10] sm:$0x3] %vm1004_vm14, %v1000_v9 }
 0x304   : > { %1017 = vst.msk [vmem:[#allocation4 + $0x10] sm:$0xfc] %vm1016_vm15, %v1014_v19 }
 0x305   : > { %3483 = vmatpush3.bf16.msra.mxu1 %v675_v18  ;;  %v1238_v18 = vld [vmem:[%s4954_s5 + $0x8] sm:$0xff] }
 0x306   : > { %v1044_v20 = vpop.permute.xlu1 %1043  ;;  %3484 = vmatprep.subr.bf16.mxu1 %v3831_v8  ;;  %v676_v21 = vld [vmem:[#allocation4 + $0x18] sm:$0xff]  ;;  %v677_v22 = vld [vmem:[#allocation4 + $0x20] sm:$0xf]  ;;  %v1032_v23 = vpop.permute.xlu0 %1031 }
 0x307   : > { %1046 = vst.msk [vmem:[#allocation4 + $0x20] sm:$0xf0] %vm1002_vm11, %v1044_v20  ;;  %v695_v27 = vsel %vm693_vm12, %v677_v22, 0 }
 0x308   : > { %1047 = vst.msk [vmem:[#allocation4 + $0x28] sm:$0x3] %vm1004_vm14, %v1044_v20  ;;  %vm743_vm14 = vcmask 1040384   ;;  %v3325_v20 = vcombine.low %v1238_v18, %v1238_v18 }
 0x309   : > { %v1067_v24 = vld [vmem:[#allocation4 + $0x8] sm:$0xff]  ;;  %1023 = vst.msk [vmem:[#allocation4 + $0x18] sm:$0x3f] %vm972_vm8, %v1021_v17  ;;  %3485 = vmatpush3.bf16.msra.mxu1 %v676_v21  ;;  %v745_v54 = vsel %vm743_vm14, %v737_v47, 0 }
 0x30a   : > { %1034 = vst.msk [vmem:[#allocation4 + $0x18] sm:$0xc0] %vm980_vm9, %v1032_v23  ;;  %3507 = vmatpush3.bf16.msra.mxu0 %v1067_v24  ;;  %v1062_v25 = vpop.permute.xlu1 %1061  ;;  %3486 = vmatprep.subr.bf16.mxu1 %v3831_v8  ;;  %v1052_v26 = vpop.permute.xlu0 %1051  ;;  %vm1090_vm9 = vcmask 883712  }
 0x30b   : > { %1035 = vst.msk [vmem:[#allocation4 + $0x20] sm:$0xf] %vm982_vm13, %v1032_v23  ;;  %3508 = vmatprep.subr.bf16.mxu0 %v3831_v8  ;;  %v1068_v28 = vld [vmem:[#allocation4 + $0x10] sm:$0xff] }
 0x30c   : > { %1064 = vst.msk [vmem:[#allocation4 + $0x30] sm:$0x3f] %vm972_vm8, %v1062_v25  ;;  %vm1088_vm8 = vcmask 326656   ;;  %v1600_v25 = vand.u32 7, %v3921_v2 }
 0x30d   : > { %1054 = vst.msk [vmem:[#allocation4 + $0x28] sm:$0xfc] %vm1016_vm15, %v1052_v26  ;;  %3487 = vmatpush3.bf16.msra.mxu1 %v695_v27  ;;  %vm739_vm15 = vcmask 15360   ;;  %v3326_v26 = vcombine.high %v1238_v18, %v1238_v18  ;;  %v3842_v27 = vmov 3  }
 0x30e   : > { %3509 = vmatpush3.bf16.msra.mxu0 %v1068_v28  ;;  %3492 = vmatprep.subr.bf16.mxu1 %v3831_v8  ;;  %v1085_v31 = vpop.permute.xlu0 %1084  ;;  %v1087_v36 = vpop.permute.xlu1 %1086 }
 0x30f   : > { %3510 = vmatprep.subr.bf16.mxu0 %v3831_v8  ;;  %v1089_v38 = vsel %vm1088_vm8, %v1085_v31, %v1087_v36  ;;  %3770 = vset.pattern.permute.xlu1 %v3842_v27 }
 0x311   : > { %v1069_v29 = vld [vmem:[#allocation4 + $0x18] sm:$0xff] }
 0x312   : > { %3511 = vmatpush3.bf16.msra.mxu0 %v1069_v29  ;;  %v1070_v32 = vld [vmem:[#allocation4 + $0x20] sm:$0xff]  ;;  %v688_v33 = vpop.permute.xlu0 %687 }
 0x313   : > { %3512 = vmatprep.subr.bf16.mxu0 %v3831_v8  ;;  %3489 = vmatmul.mubr.msk.bf16.vlgmr.msra.gmra.mrb[0].mxu1 %vm689_vm4, %v688_v33  ;;  %v1072_v35 = vld [vmem:[#allocation4 + $0x30] sm:$0x3f] }
 0x314   : > { %3494 = vmatprep.mubr.msk.bf16.mxu1 %vm3836_vm1, %v3831_v8  ;;  %v1071_v34 = vld [vmem:[#allocation4 + $0x28] sm:$0xff]  ;;  %v1096_v37 = vsel %vm1094_vm2, %v1072_v35, 0  ;;  %3493 = vmatpush3.bf16.msra.mxu1 %v745_v54  ;;  %vm1149_vm2 = vcmask 166952  }
 0x315   : > { %3498 = vmatprep.subr.bf16.mxu1 %v3831_v8 }
 0x316   : > { %3513 = vmatpush3.bf16.msra.mxu0 %v1070_v32 }
 0x317   : > { %3514 = vmatprep.subr.bf16.mxu0 %v3831_v8 }
 0x31a   : > { %3515 = vmatpush3.bf16.msra.mxu0 %v1071_v34 }
 0x31b   : > { %3516 = vmatprep.subr.bf16.mxu0 %v3831_v8 }
 0x31e   : > { %3517 = vmatpush3.bf16.msra.mxu0 %v1096_v37  ;;  %v3845_v37 = vmov 4  }
 0x31f   : > { %3542 = vmatprep.subr.bf16.mxu0 %v3831_v8  ;;  %v1077_v42 = vpop.permute.xlu1 %1076  ;;  %3771 = vset.pattern.permute.xlu0 %v3845_v37 }
 0x321   : > { %3519 = vmatmul.mubr.msk.bf16.vlgmr.msra.gmra.mrb[4].mxu0 %vm1090_vm9, %v1089_v38 }
 0x322   : > { %3544 = vmatprep.mubr.msk.bf16.mxu0 %vm3836_vm1, %v3831_v8 }
 0x324   : > { %v682_v44 = vpop.permute.xlu1 %681 }
 0x328   : > { %v1176_v61 = vpop.permute.xlu1 %1175 }
 0x329   : > { %vm1177_vm9 = vcmp.ne.s16.totalorder %v1176_v61, 0 }
 0x32c   : > { %v1208_v16 = vpop.permute.xlu1 %1207 }
 0x32d   : > { %vm1209_vm5 = vcmp.ne.s16.totalorder %v1208_v16, 0 }
 0x3e6   : > { %v731_v39 = vpop.f32.mrb[0].mxu1 }
 0x3e7   : > { %v3490_v40 = vpop.f32.mrb[1].mxu1  ;;  %v732_v45 = vadd.f32 %v731_v39, %v682_v44 }
 0x3e8   : > { %v734_v41 = vpop.f32.mrb[2].mxu1 }
 0x3e9   : > { %v3491_v43 = vpop.f32.mrb[3].mxu1  ;;  %v738_v58 = vpack.c.bf16 %v732_v45, %v732_v45 }
 0x3eb   : > { %3495 = vmatmul.mubr.msk.bf16.vlgmr.msra.gmra.mrb[4].mxu1 %vm739_vm15, %v738_v58 }
 0x3ec   : > { %3499 = vmatpush3.bf16.msra.mxu1 %v745_v54  ;;  %3500 = vmatprep.mubr.msk.bf16.mxu1 %vm3836_vm1, %v3831_v8 }
 0x3ed   : > { %3522 = vmatprep.subr.bf16.mxu1 %v3831_v8 }
 0x3f4   : > { %v1132_v46 = vpop.f32.mrb[4].mxu0 }
 0x3f5   : > { %v1133_v48 = vadd.f32 %v1132_v46, %v1077_v42  ;;  %v3520_v50 = vpop.f32.mrb[5].mxu0 }
 0x3f6   : > { %v1135_v55 = vpop.f32.mrb[6].mxu0 }
 0x3f7   : > { %v3387_v56 = vpack.c.bf16 %v1133_v48, %v1133_v48  ;;  %v3521_v57 = vpop.f32.mrb[7].mxu0 }
 0x3f9   : > { %1146 = vrot.lane.b32.xlu0 %v3387_v56, %s3829_s16  ;;  %s3290_s16 = sshll.u32 %s4977_s28, 2 }
 0x3fa   : > { %s4173_s15 = scalar_lea.vmem %s4951_s2, %s3290_s16  ;;  %s4178_s24 = scalar_lea.vmem %s4952_s3, %s3290_s16 }
 0x3fb   : > { %v3792_v23 = vld [vmem:[%s4173_s15] ss:$0 sps:$4 sm:$0xff]   ;;  %s3841_s16 = smov 9  }
 0x3fd   : > { %1163 = vrot.lane.b32.xlu0 %v4021_v49, %s3819_s19 }
 0x401   : > { %1195 = vrot.lane.b32.xlu0 %v4021_v49, %s3821_s21  ;;  %s3851_s21 = smov 96  }
 0x405   : > { %1227 = vrot.lane.b32.xlu0 %v4021_v49, %s3830_s9 }
 0x409   : > { %788 = vrot.lane.b32.xlu0 %v738_v58, %s3823_s23 }
 0x46b   : > { %v1147_v59 = vpop.permute.xlu0 %1146 }
 0x46c   : > { %1150 = vst.msk [vmem:[#allocation3] sm:$0xf] %vm1149_vm2, %v1147_v59  ;;  %vm1609_vm2 = vcmp.ne.s32.totalorder %v1600_v25, 7 }
 0x46f   : > { %v1164_v60 = vpop.permute.xlu0 %1163 }
 0x470   : > { %vm1165_vm8 = vcmp.ne.s16.totalorder %v1164_v60, 0 }
 0x473   : > { %v1151_v49 = vld [vmem:[#allocation3] sm:$0xf]  ;;  %v1196_v0 = vpop.permute.xlu0 %1195 }
 0x474   : > { %v1174_v62 = vld [vmem:[#allocation3] sm:$0xf]  ;;  %vm1197_vm14 = vcmp.ne.s16.totalorder %v1196_v0, 0  ;;  %v1152_v13 = vsel %vm964_vm6, %v1151_v49, 0 }
 0x475   : > { %v1162_v63 = vld [vmem:[#allocation3] sm:$0xf]  ;;  %v1178_v6 = vsel %vm1177_vm9, %v1174_v62, 0  ;;  %1153 = vst.msk [vmem:[#allocation4] sm:$0xf] %vm982_vm13, %v1152_v13  ;;  %vm1641_vm9 = vmpackc.low %vm1609_vm2, %vm1609_vm2 }
 0x476   : > { %v1166_v3 = vsel %vm1165_vm8, %v1162_v63, 0  ;;  %v1194_v4 = vld [vmem:[#allocation3] sm:$0xf]  ;;  %v3319_v7 = vcombine.low %v1178_v6, %v1178_v6  ;;  %v4219_v31 = vsel %vm1641_vm9, 65537, %v3817_v1  ;;  %vm1317_vm9 = vcmask 1041408  }
 0x477   : > { %v3318_v9 = vcombine.low %v1166_v3, %v1166_v3  ;;  %v1206_v10 = vld [vmem:[#allocation3] sm:$0xf]  ;;  %v1198_v12 = vsel %vm1197_vm14, %v1194_v4, 0  ;;  %v1228_v53 = vpop.permute.xlu0 %1227  ;;  %v1646_v32 = vrot.slane %v4219_v31, %v3937_v5  ;;  %vm1621_vm14 = vcmask 592968  }
 0x478   : > { %v3787_v11 = vld [vmem:[#allocation3] ss:$0 sps:$4 sm:$0xff]   ;;  %v3321_v17 = vcombine.low %v1198_v12, %v1198_v12  ;;  %v1210_v19 = vsel %vm1209_vm5, %v1206_v10, 0  ;;  %vm1229_vm6 = vcmp.ne.s16.totalorder %v1228_v53, 0 }
 0x479   : > { %v1226_v52 = vld [vmem:[#allocation3] sm:$0xf]  ;;  %1158 = vrot.lane.b32.xlu1 %v3787_v11, %s3822_s22  ;;  %1170 = vrot.lane.b32.xlu0 %v3318_v9, %s3823_s23  ;;  %v3322_v21 = vcombine.low %v1210_v19, %v1210_v19 }
 0x47a   : > { %v3788_v14 = vld [vmem:[#allocation3] ss:$0 sps:$4 sm:$0xff]   ;;  %v1230_v22 = vsel %vm1229_vm6, %v1226_v52, 0 }
 0x47b   : > { %v3789_v15 = vld [vmem:[#allocation3] ss:$0 sps:$4 sm:$0xff]   ;;  %v789_v51 = vpop.permute.xlu0 %788  ;;  %v3324_v24 = vcombine.low %v1230_v22, %v1230_v22 }
 0x47c   : > { %1779 = vst.msk [vmem:[#allocation3] sm:$0xf] %vm1610_vm3, %v3817_v1  ;;  %3501 = vmatmul.mubr.msk.bf16.vlgmr.msra.gmra.mrb[8].mxu1 %vm739_vm15, %v789_v51  ;;  %vm1608_vm15 = vcmp.ne.s32.totalorder %v1600_v25, 0 }
 0x47d   : > { %1780 = vst.msk [vmem:[#allocation3] sm:$0xf] %vm1612_vm7, %v3817_v1  ;;  %1182 = vrot.lane.b32.xlu1 %v3319_v7, %s3825_s25  ;;  %1202 = vrot.lane.b32.xlu0 %v3321_v17, %s3827_s30  ;;  %s3840_s30 = smov 60   ;;  %vm4207_vm8 = vmpackc.low %vm1608_vm15, %vm1608_vm15 }
 0x47e   : > { %3532 = vmatprep.mubr.msk.bf16.mxu1 %vm3836_vm1, %v3831_v8  ;;  %v4214_v29 = vsel %vm4207_vm8, 65537, %v3817_v1 }
 0x47f   : > { %v1661_v2 = vrot.slane %v4214_v29, %v3937_v5  ;;  %v3794_v5 = vld [vmem:[%s4956_s7] ss:$0 sps:$4 sm:$0x33]  }
 0x481   : > { %1190 = vrot.lane.b32.xlu1 %v3788_v14, %s3826_s26  ;;  %1222 = vrot.lane.b32.xlu0 %v3789_v15, %s3834_s12  ;;  %s3843_s26 = smov 18  }
 0x485   : > { %1214 = vrot.lane.b32.xlu1 %v3322_v21, %s3832_s18  ;;  %1255 = vrot.lane.b32.xlu0 %v3325_v20, %s3840_s30 }
 0x489   : > { %1234 = vrot.lane.b32.xlu1 %v3324_v24, %s3833_s11  ;;  %1618 = vrot.lane.b32.xlu0 %v3792_v23, %s3841_s16 }
 0x48d   : > { %1257 = vrot.lane.b32.xlu1 %v3326_v26, %s3840_s30  ;;  %1662 = vrot.lane.b32.xlu0 %v1661_v2, %s3828_s29  ;;  %s3848_s30 = smov 116  }
 0x491   : > { %1247 = vperm.xlu1 %3770, %v3993_v30   ;;  %1679 = vrot.lane.b32.xlu0 %v1646_v32, %s3830_s9 }
 0x495   : > { %1647 = vrot.lane.b32.xlu1 %v1646_v32, %s3819_s19  ;;  %1707 = vrot.lane.b32.xlu0 %v1646_v32, %s3843_s26 }
 0x499   : > { %1690 = vrot.lane.b32.xlu1 %v1661_v2, %s3844_s13 }
 0x49d   : > { %1312 = vrot.lane.b32.xlu1 %v3794_v5, %s4969_s20 }
 0x4be   : > { %v4229_v33 = vpop.f32.mrb[4].mxu1 }
 0x4bf   : > { %833 = vst.msk [vmem:[%s3946_s17] sm:$0xff] %vm4960_vm0, %v4229_v33  ;;  %v3496_v34 = vpop.f32.mrb[5].mxu1  ;;  %v850_v19 = vmul.f32 0.9375, %v4229_v33  ;;  %v877_v20 = vmul.f32 0.5625, %v4229_v33  ;;  %v868_v21 = vmul.f32 0.6875, %v4229_v33  ;;  %v898_v23 = vmul.f32 0.1875, %v4229_v33 }
 0x4c0   : > { %v784_v35 = vpop.f32.mrb[6].mxu1  ;;  %v890_v24 = vmul.f32 0.3125, %v4229_v33  ;;  %v906_v25 = vmul.f32 0.0625, %v4229_v33  ;;  %v886_v26 = vmul.f32 0.4375, %v4229_v33 }
 0x4c1   : > { %v3497_v36 = vpop.f32.mrb[7].mxu1 }
 0x4eb   : > { %v1159_v38 = vpop.permute.xlu1 %1158  ;;  %v1171_v39 = vpop.permute.xlu0 %1170 }
 0x4ec   : > { %1161 = vst.msk [vmem:[#allocation4] sm:$0xf0] %vm1002_vm11, %v1159_v38 }
 0x4ed   : > { %1173 = vst.msk [vmem:[#allocation4 + $0x8] sm:$0xf] %vm982_vm13, %v1171_v39 }
 0x4ef   : > { %v1183_v40 = vpop.permute.xlu1 %1182  ;;  %v1203_v41 = vpop.permute.xlu0 %1202 }
 0x4f0   : > { %1185 = vst.msk [vmem:[#allocation4 + $0x8] sm:$0xf0] %vm1002_vm11, %v1183_v40  ;;  %1205 = vst.msk [vmem:[#allocation4 + $0x10] sm:$0xf0] %vm1002_vm11, %v1203_v41 }
 0x4f3   : > { %v1191_v42 = vpop.permute.xlu1 %1190  ;;  %v1239_v43 = vld [vmem:[#allocation4] sm:$0xff]  ;;  %v1223_v44 = vpop.permute.xlu0 %1222 }
 0x4f4   : > { %1193 = vst.msk [vmem:[#allocation4 + $0x10] sm:$0xf] %vm982_vm13, %v1191_v42  ;;  %3523 = vmatpush3.bf16.msra.mxu1 %v1239_v43 }
 0x4f5   : > { %1225 = vst.msk [vmem:[#allocation4 + $0x18] sm:$0xf0] %vm1002_vm11, %v1223_v44  ;;  %3524 = vmatprep.subr.bf16.mxu1 %v3831_v8  ;;  %vm1259_vm11 = vcmask 490496  }
 0x4f7   : > { %v1215_v45 = vpop.permute.xlu1 %1214  ;;  %v1240_v46 = vld [vmem:[#allocation4 + $0x8] sm:$0xff]  ;;  %v1256_v47 = vpop.permute.xlu0 %1255 }
 0x4f8   : > { %1217 = vst.msk [vmem:[#allocation4 + $0x18] sm:$0xf] %vm982_vm13, %v1215_v45  ;;  %3525 = vmatpush3.bf16.msra.mxu1 %v1240_v46 }
 0x4f9   : > { %3526 = vmatprep.subr.bf16.mxu1 %v3831_v8 }
 0x4fb   : > { %v1235_v48 = vpop.permute.xlu1 %1234  ;;  %v1241_v50 = vld [vmem:[#allocation4 + $0x10] sm:$0xff]  ;;  %v1619_v54 = vpop.permute.xlu0 %1618 }
 0x4fc   : > { %1237 = vst.msk [vmem:[#allocation4 + $0x20] sm:$0xf] %vm982_vm13, %v1235_v48  ;;  %3527 = vmatpush3.bf16.msra.mxu1 %v1241_v50 }
 0x4fd   : > { %1622 = vst.msk [vmem:[#allocation2] sm:$0xf] %vm1621_vm14, %v1619_v54  ;;  %3528 = vmatprep.subr.bf16.mxu1 %v3831_v8 }
 0x4ff   : > { %v1242_v55 = vld [vmem:[#allocation4 + $0x18] sm:$0xff]  ;;  %v4251_v56 = vpop.permute.xlu0 %1662  ;;  %v1258_v57 = vpop.permute.xlu1 %1257 }
 0x500   : > { %3529 = vmatpush3.bf16.msra.mxu1 %v1242_v55  ;;  %vm1664_vm5 = vcmp.ne.s16.totalorder %v4251_v56, 0  ;;  %v1260_v63 = vsel %vm1259_vm11, %v1256_v47, %v1258_v57  ;;  %vm1628_vm11 = vcmask 519168  }
 0x501   : > { %3530 = vmatprep.subr.bf16.mxu1 %v3831_v8 }
 0x503   : > { %v1243_v58 = vld [vmem:[#allocation4 + $0x20] sm:$0xf]  ;;  %v4266_v6 = vpop.permute.xlu0 %1679 }
 0x504   : > { %v1630_v59 = vld [vmem:[#allocation2] sm:$0xf]  ;;  %v1265_v61 = vsel %vm693_vm12, %v1243_v58, 0  ;;  %vm1681_vm13 = vcmp.ne.s16.totalorder %v4266_v6, 0 }
 0x505   : > { %v1656_v60 = vld [vmem:[#allocation2] sm:$0xf]  ;;  %v1632_v49 = vrot.slane %v1630_v59, 4  ;;  %3531 = vmatpush3.bf16.msra.mxu1 %v1265_v61 }
 0x506   : > { %v1665_v62 = vsel %vm1664_vm5, %v1656_v60, 0  ;;  %3536 = vmatprep.subr.bf16.mxu1 %v3831_v8  ;;  %v1672_v3 = vld [vmem:[#allocation2] sm:$0xf] }
 0x507   : > { %1633 = vrot.lane.b32.xlu0 %v1632_v49, %s3822_s22  ;;  %v1667_v0 = vrot.slane %v1665_v62, 4  ;;  %v1678_v9 = vld [vmem:[#allocation2] sm:$0xf]  ;;  %v4274_v52 = vpop.permute.xlu0 %1707 }
 0x508   : > { %3533 = vmatmul.mubr.msk.bf16.vlgmr.msra.gmra.mrb[12].mxu1 %vm689_vm4, %v1260_v63  ;;  %v1638_v10 = vld [vmem:[#allocation2] sm:$0xf]  ;;  %v1682_v12 = vsel %vm1681_vm13, %v1678_v9, 0  ;;  %vm4961_vm2 = vcmp.ne.s16.totalorder %v4274_v52, 0 }
 0x509   : > { %3538 = vmatprep.mubr.msk.bf16.mxu1 %vm3836_vm1, %v3831_v8  ;;  %v1684_v53 = vrot.slane %v1682_v12, 4  ;;  %v1689_v14 = vld [vmem:[#allocation2] sm:$0xf] }
 0x50a   : > { %v1706_v16 = vld [vmem:[#allocation2] sm:$0xf] }
 0x50b   : > { %1668 = vrot.lane.b32.xlu0 %v1667_v0, %s3832_s18  ;;  %v1710_v17 = vsel %vm4961_vm2, %v1706_v16, 0  ;;  %v1699_v48 = vld [vmem:[#allocation2] sm:$0xf] }
 0x50c   : > { %v1623_v50 = vld [vmem:[#allocation2] sm:$0xf]  ;;  %v1701_v12 = vrot.slane %v1699_v48, 4 }
 0x50d   : > { %v1627_v54 = vsel %vm4207_vm8, %v1623_v50, 0  ;;  %2417 = vst.msk [vmem:[#allocation2] sm:$0xf] %vm1610_vm3, %v3817_v1 }
 0x50e   : > { %1629 = vst.msk [vmem:[#allocation4] sm:$0xf] %vm1628_vm11, %v1627_v54 }
 0x50f   : > { %1674 = vrot.lane.b32.xlu0 %v1672_v3, %s3834_s12  ;;  %2418 = vst.msk [vmem:[#allocation2] sm:$0xf] %vm1612_vm7, %v3817_v1 }
 0x510   : > { %v4264_v4 = vpop.permute.xlu1 %1247 }
 0x514   : > { %v4269_v11 = vpop.permute.xlu1 %1647 }
 0x515   : > { %vm1649_vm6 = vcmp.ne.s16.totalorder %v4269_v11, 0 }
 0x516   : > { %v1650_v13 = vsel %vm1649_vm6, %v1638_v10, 0 }
 0x517   : > { %1652 = vrot.lane.b32.xlu1 %v1650_v13, %s3823_s23 }
 0x518   : > { %v4279_v15 = vpop.permute.xlu1 %1690 }
 0x519   : > { %vm1692_vm15 = vcmp.ne.s16.totalorder %v4279_v15, 0 }
 0x51a   : > { %v1693_v7 = vsel %vm1692_vm15, %v1689_v14, 0 }
 0x51b   : > { %1695 = vrot.lane.b32.xlu0 %v1693_v7, %s4969_s20  ;;  %1685 = vrot.lane.b32.xlu1 %v1684_v53, %s3833_s11 }
 0x51c   : > { %v1313_v51 = vpop.permute.xlu1 %1312 }
 0x51d   : > { %v4295_v18 = vsel %vm1317_vm9, %v1313_v51, 0  ;;  %vm1636_vm9 = vcmask 523268  }
 0x51e   : > { %3537 = vmatpush3.bf16.msra.mxu1 %v4295_v18  ;;  %3543 = vmatpush3.bf16.msra.mxu0 %v4295_v18 }
 0x51f   : > { %1712 = vrot.lane.b32.xlu0 %v1710_v17, %s3846_s10  ;;  %3548 = vmatprep.subr.bf16.mxu1 %v3831_v8 }
 0x520   : > { %3554 = vmatprep.subr.bf16.mxu0 %v3831_v8 }
 0x523   : > { %1725 = vperm.xlu0 %3771, %v3993_v30   ;;  %v859_v30 = vmul.f32 0.8125, %v4229_v33 }
 0x527   : > { %1813 = vrot.lane.b32.xlu0 %v4214_v29, %s3828_s29  ;;  %s3847_s29 = smov 111  }
 0x52b   : > { %1845 = vrot.lane.b32.xlu0 %v4214_v29, %s3844_s13 }
 0x54f   : > { %v4305_v22 = vpop.f32.mrb[8].mxu1 }
 0x550   : > { %v3502_v27 = vpop.f32.mrb[9].mxu1  ;;  %v860_v29 = vmul.f32 0.1875, %v4305_v22  ;;  %v851_v2 = vmul.f32 0.0625, %v4305_v22  ;;  %v878_v32 = vmul.f32 0.4375, %v4305_v22  ;;  %v869_v34 = vmul.f32 0.3125, %v4305_v22 }
 0x551   : > { %v830_v35 = vpop.f32.mrb[10].mxu1  ;;  %v899_v36 = vmul.f32 0.8125, %v4305_v22  ;;  %v891_v5 = vmul.f32 0.6875, %v4305_v22  ;;  %v907_v37 = vmul.f32 0.9375, %v4305_v22  ;;  %v887_v38 = vmul.f32 0.5625, %v4305_v22 }
 0x552   : > { %v3503_v39 = vpop.f32.mrb[11].mxu1  ;;  %v4319_v40 = vadd.f32 %v860_v29, %v859_v30  ;;  %v4321_v41 = vadd.f32 %v851_v2, %v850_v19  ;;  %v4323_v42 = vadd.f32 %v878_v32, %v877_v20  ;;  %v4325_v43 = vadd.f32 %v869_v34, %v868_v21 }
 0x553   : > { %v4327_v44 = vadd.f32 %v899_v36, %v898_v23  ;;  %v4329_v45 = vadd.f32 %v891_v5, %v890_v24  ;;  %v4331_v46 = vadd.f32 %v907_v37, %v906_v25  ;;  %v888_v47 = vadd.f32 %v887_v38, %v886_v26 }
 0x555   : > { %889 = vst.msk [vmem:[%s3946_s17 + $0x8] sm:$0xff] %vm4960_vm0, %v888_v47 }
 0x579   : > { %v1634_v55 = vpop.permute.xlu0 %1633 }
 0x57a   : > { %1637 = vst.msk [vmem:[#allocation4] sm:$0xf0] %vm1636_vm9, %v1634_v55 }
 0x57d   : > { %v1669_v57 = vpop.permute.xlu0 %1668 }
 0x57e   : > { %1671 = vst.msk [vmem:[#allocation4 + $0x8] sm:$0xf0] %vm1636_vm9, %v1669_v57 }
 0x581   : > { %v1675_v58 = vpop.permute.xlu0 %1674  ;;  %v1717_v17 = vld [vmem:[#allocation4] sm:$0xff] }
 0x582   : > { %1677 = vst.msk [vmem:[#allocation4 + $0x10] sm:$0xf] %vm1628_vm11, %v1675_v58 }
 0x589   : > { %v1653_v59 = vpop.permute.xlu1 %1652 }
 0x58a   : > { %1655 = vst.msk [vmem:[#allocation4 + $0x8] sm:$0xf] %vm1628_vm11, %v1653_v59 }
 0x58d   : > { %v1696_v60 = vpop.permute.xlu0 %1695  ;;  %v1686_v61 = vpop.permute.xlu1 %1685 }
 0x58e   : > { %1698 = vst.msk [vmem:[#allocation4 + $0x18] sm:$0xf] %vm1628_vm11, %v1696_v60 }
 0x58f   : > { %1688 = vst.msk [vmem:[#allocation4 + $0x10] sm:$0xf0] %vm1636_vm9, %v1686_v61 }
 0x591   : > { %v1713_v49 = vpop.permute.xlu0 %1712  ;;  %v1718_v30 = vld [vmem:[#allocation4 + $0x8] sm:$0xff] }
 0x592   : > { %1715 = vst.msk [vmem:[#allocation4 + $0x20] sm:$0xf] %vm1628_vm11, %v1713_v49 }
 0x596   : > { %v1719_v20 = vld [vmem:[#allocation4 + $0x10] sm:$0xff] }
 0x599   : > { %v1721_v21 = vld [vmem:[#allocation4 + $0x20] sm:$0xf] }
 0x59a   : > { %v1737_v23 = vsel %vm693_vm12, %v1721_v21, 0 }
 0x5a2   : > { %v4361_v13 = vpop.permute.xlu0 %1725 }
 0x5a6   : > { %v4363_v53 = vpop.permute.xlu0 %1813 }
 0x5aa   : > { %v4365_v14 = vpop.permute.xlu0 %1845 }
 0x5db   : > { %v1301_v62 = vpop.f32.mrb[12].mxu1 }
 0x5dc   : > { %v1302_v63 = vadd.f32 %v1301_v62, %v4264_v4  ;;  %v3534_v0 = vpop.f32.mrb[13].mxu1  ;;  %v3795_v4 = vld [vmem:[%s4954_s5 + $0xc] ss:$0 sps:$4 sm:$0xff]  }
 0x5dd   : > { %v1304_v3 = vpop.f32.mrb[14].mxu1 }
 0x5de   : > { %v1308_v9 = vpack.c.bf16 %v1302_v63, %v1302_v63  ;;  %v3535_v10 = vpop.f32.mrb[15].mxu1 }
 0x5e0   : > { %3539 = vmatmul.mubr.msk.bf16.vlgmr.msra.gmra.mrb[16].mxu1 %vm426_vm10, %v1308_v9  ;;  %1407 = vrot.lane.b32.xlu1 %v1308_v9, %s3832_s18 }
 0x5e1   : > { %1362 = vrot.lane.b32.xlu0 %v1308_v9, %s3825_s25  ;;  %3549 = vmatpush3.bf16.msra.mxu1 %v4295_v18  ;;  %s3854_s25 = smov 100  }
 0x5e2   : > { %3550 = vmatprep.mubr.msk.bf16.mxu1 %vm3836_vm1, %v3831_v8  ;;  %3560 = vmatprep.subr.bf16.mxu1 %v3831_v8 }
 0x5e4   : > { %1702 = vrot.lane.b32.xlu1 %v1701_v12, %s3847_s29 }
 0x5e5   : > { %1452 = vrot.lane.b32.xlu0 %v1308_v9, %s3848_s30 }
 0x5e8   : > { %1731 = vrot.lane.b32.xlu1 %v3795_v4, %s3848_s30 }
 0x652   : > { %v1408_v16 = vpop.permute.xlu1 %1407 }
 0x653   : > { %v1363_v7 = vpop.permute.xlu0 %1362  ;;  %3551 = vmatmul.mubr.msk.bf16.vlgmr.msra.gmra.mrb[20].mxu1 %vm426_vm10, %v1408_v16 }
 0x654   : > { %3545 = vmatmul.mubr.msk.bf16.vlgmr.msra.gmra.mrb[8].mxu0 %vm426_vm10, %v1363_v7  ;;  %3561 = vmatpush3.bf16.msra.mxu1 %v1717_v17 }
 0x655   : > { %3555 = vmatpush3.bf16.msra.mxu0 %v4295_v18  ;;  %3562 = vmatprep.subr.bf16.mxu1 %v3831_v8 }
 0x656   : > { %v1703_v51 = vpop.permute.xlu1 %1702  ;;  %3556 = vmatprep.mubr.msk.bf16.mxu0 %vm3836_vm1, %v3831_v8  ;;  %3570 = vmatprep.mubr.msk.bf16.mxu1 %vm3836_vm1, %v3831_v8 }
 0x657   : > { %1705 = vst.msk [vmem:[#allocation4 + $0x18] sm:$0xf0] %vm1636_vm9, %v1703_v51  ;;  %3574 = vmatprep.subr.bf16.mxu0 %v3831_v8  ;;  %v1453_v19 = vpop.permute.xlu0 %1452 }
 0x658   : > { %3563 = vmatpush3.bf16.msra.mxu1 %v1718_v30 }
 0x659   : > { %3564 = vmatprep.subr.bf16.mxu1 %v3831_v8 }
 0x65a   : > { %v1732_v24 = vpop.permute.xlu1 %1731 }
 0x65c   : > { %3557 = vmatmul.mubr.msk.bf16.vlgmr.msra.gmra.mrb[12].mxu0 %vm426_vm10, %v1453_v19  ;;  %3565 = vmatpush3.bf16.msra.mxu1 %v1719_v20 }
 0x65d   : > { %3566 = vmatprep.subr.bf16.mxu1 %v3831_v8  ;;  %3584 = vmatprep.mubr.msk.bf16.mxu0 %vm3836_vm1, %v3831_v8 }
 0x65e   : > { %v1720_v18 = vld [vmem:[#allocation4 + $0x18] sm:$0xff] }
 0x660   : > { %3567 = vmatpush3.bf16.msra.mxu1 %v1720_v18 }
 0x661   : > { %3568 = vmatprep.subr.bf16.mxu1 %v3831_v8 }
 0x664   : > { %3569 = vmatpush3.bf16.msra.mxu1 %v1737_v23 }
 0x665   : > { %3588 = vmatprep.subr.bf16.mxu1 %v3831_v8 }
 0x667   : > { %3571 = vmatmul.mubr.msk.bf16.vlgmr.msra.gmra.mrb[24].mxu1 %vm689_vm4, %v1732_v24 }
 0x668   : > { %3590 = vmatprep.mubr.msk.bf16.mxu1 %vm3836_vm1, %v3831_v8 }
 0x6b3   : > { %v4388_v25 = vpop.f32.mrb[16].mxu1 }
 0x6b4   : > { %1497 = vst.msk [vmem:[%s3946_s17 + $0x10] sm:$0xff] %vm4960_vm0, %v4388_v25  ;;  %v3540_v26 = vpop.f32.mrb[17].mxu1  ;;  %v1511_v32 = vmul.f32 0.625, %v4388_v25  ;;  %v1503_v34 = vmul.f32 0.875, %v4388_v25  ;;  %v1527_v35 = vmul.f32 0.125, %v4388_v25  ;;  %v1519_v61 = vmul.f32 0.375, %v4388_v25 }
 0x6b5   : > { %v1358_v27 = vpop.f32.mrb[18].mxu1 }
 0x6b6   : > { %v3541_v29 = vpop.f32.mrb[19].mxu1 }
 0x726   : > { %v1446_v2 = vpop.f32.mrb[20].mxu1 }
 0x727   : > { %v1401_v36 = vpop.f32.mrb[8].mxu0  ;;  %v1535_v5 = vmul.f32 0.125, %v1446_v2  ;;  %v1542_v37 = vmul.f32 0.375, %v1446_v2  ;;  %v1549_v38 = vmul.f32 0.625, %v1446_v2  ;;  %v1552_v39 = vmul.f32 0.875, %v1446_v2  ;;  %v3552_v47 = vpop.f32.mrb[21].mxu1 }
 0x728   : > { %v1504_v48 = vmul.f32 0.125, %v1401_v36  ;;  %v1512_v50 = vmul.f32 0.375, %v1401_v36  ;;  %v1520_v54 = vmul.f32 0.625, %v1401_v36  ;;  %v1528_v55 = vmul.f32 0.875, %v1401_v36  ;;  %v3546_v57 = vpop.f32.mrb[9].mxu0  ;;  %v1449_v58 = vpop.f32.mrb[22].mxu1 }
 0x729   : > { %v1404_v59 = vpop.f32.mrb[10].mxu0  ;;  %v3553_v60 = vpop.f32.mrb[23].mxu1 }
 0x72a   : > { %v1550_v49 = vadd.f32 %v1549_v38, %v1512_v50  ;;  %v3547_v62 = vpop.f32.mrb[11].mxu0  ;;  %v4397_v63 = vadd.f32 %v1512_v50, %v1511_v32  ;;  %v4399_v0 = vadd.f32 %v1504_v48, %v1503_v34  ;;  %v4401_v3 = vadd.f32 %v1528_v55, %v1527_v35 }
 0x72b   : > { %v4403_v9 = vadd.f32 %v1520_v54, %v1519_v61  ;;  %v4405_v10 = vadd.f32 %v1542_v37, %v1520_v54  ;;  %v4407_v12 = vadd.f32 %v1535_v5, %v1528_v55  ;;  %v4409_v4 = vadd.f32 %v1552_v39, %v1504_v48 }
 0x72c   : > { %1551 = vst.msk [vmem:[%s3946_s17 + $0x18] sm:$0xff] %vm4960_vm0, %v1550_v49  ;;  %vm1815_vm0 = vcmp.ne.s16.totalorder %v4363_v53, 0 }
 0x72f   : > { %v4413_v16 = vpop.f32.mrb[12].mxu0 }
 0x730   : > { %v3558_v7 = vpop.f32.mrb[13].mxu0  ;;  %v1559_v17 = vmul.f32 0.125, %v4413_v16  ;;  %v1566_v51 = vmul.f32 0.375, %v4413_v16  ;;  %v1573_v30 = vmul.f32 0.625, %v4413_v16  ;;  %v1580_v19 = vmul.f32 0.875, %v4413_v16 }
 0x731   : > { %v1494_v20 = vpop.f32.mrb[14].mxu0 }
 0x732   : > { %v3559_v18 = vpop.f32.mrb[15].mxu0  ;;  %v4419_v21 = vadd.f32 %v1559_v17, %v1552_v39  ;;  %v4421_v23 = vadd.f32 %v1566_v51, %v1549_v38  ;;  %v4423_v24 = vadd.f32 %v1573_v30, %v1542_v37  ;;  %v4425_v26 = vadd.f32 %v1580_v19, %v1535_v5 }
 0x73a   : > { %v1773_v27 = vpop.f32.mrb[24].mxu1 }
 0x73b   : > { %v1774_v29 = vadd.f32 %v1773_v27, %v4361_v13  ;;  %v3572_v2 = vpop.f32.mrb[25].mxu1  ;;  %v3793_v27 = vld [vmem:[%s4178_s24] ss:$0 sps:$4 sm:$0xff]   ;;  %s3853_s24 = smov 80  }
 0x73c   : > { %v1776_v32 = vpop.f32.mrb[26].mxu1  ;;  %v3850_v2 = vmov 5  }
 0x73d   : > { %v3388_v34 = vpack.c.bf16 %v1774_v29, %v1774_v29  ;;  %v3573_v35 = vpop.f32.mrb[27].mxu1  ;;  %v4479_v29 = vld [vmem:[%s4955_s6] sm:$0xff]  ;;  %3772 = vset.pattern.permute.xlu0 %v3850_v2 }
 0x73e   : > { %v3801_v32 = vld [vmem:[%s4956_s7] ss:$0 sps:$4 sm:$0xff]  }
 0x73f   : > { %1785 = vrot.lane.b32.xlu1 %v3388_v34, %s3841_s16 }
 0x743   : > { %1801 = vrot.lane.b32.xlu1 %v4219_v31, %s3819_s19 }
 0x747   : > { %1833 = vrot.lane.b32.xlu1 %v4219_v31, %s3830_s9  ;;  %s3849_s9 = smov 44  }
 0x74b   : > { %1865 = vrot.lane.b32.xlu1 %v4219_v31, %s3843_s26  ;;  %s3856_s26 = smov 88  }
 0x7b1   : > { %v1786_v36 = vpop.permute.xlu1 %1785 }
 0x7b2   : > { %1788 = vst.msk [vmem:[#allocation3] sm:$0xf] %vm1621_vm14, %v1786_v36 }
 0x7b5   : > { %v4436_v5 = vpop.permute.xlu1 %1801 }
 0x7b6   : > { %vm1803_vm10 = vcmp.ne.s16.totalorder %v4436_v5, 0 }
 0x7b9   : > { %v1800_v13 = vld [vmem:[#allocation3] sm:$0xf]  ;;  %v4440_v38 = vpop.permute.xlu1 %1833 }
 0x7ba   : > { %v1832_v37 = vld [vmem:[#allocation3] sm:$0xf]  ;;  %v1804_v39 = vsel %vm1803_vm10, %v1800_v13, 0  ;;  %vm4962_vm2 = vcmp.ne.s16.totalorder %v4440_v38, 0 }
 0x7bb   : > { %v3796_v47 = vld [vmem:[#allocation3] ss:$0 sps:$4 sm:$0xff]   ;;  %v3338_v31 = vcombine.low %v1804_v39, %v1804_v39  ;;  %v1836_v54 = vsel %vm4962_vm2, %v1832_v37, 0  ;;  %vm1847_vm2 = vcmp.ne.s16.totalorder %v4365_v14, 0 }
 0x7bc   : > { %v1864_v48 = vld [vmem:[#allocation3] sm:$0xf]  ;;  %1796 = vrot.lane.b32.xlu1 %v3796_v47, %s3822_s22  ;;  %v3341_v62 = vcombine.low %v1836_v54, %v1836_v54 }
 0x7bd   : > { %v1812_v50 = vld [vmem:[#allocation3] sm:$0xf]  ;;  %1808 = vrot.lane.b32.xlu0 %v3338_v31, %s3823_s23  ;;  %v4460_v7 = vpop.permute.xlu1 %1865 }
 0x7be   : > { %v1816_v55 = vsel %vm1815_vm0, %v1812_v50, 0  ;;  %v3797_v57 = vld [vmem:[#allocation3] ss:$0 sps:$4 sm:$0xff]  }
 0x7bf   : > { %v3798_v58 = vld [vmem:[#allocation3] ss:$0 sps:$4 sm:$0xff]   ;;  %v3339_v61 = vcombine.low %v1816_v55, %v1816_v55 }
 0x7c0   : > { %v1844_v59 = vld [vmem:[#allocation3] sm:$0xf] }
 0x7c1   : > { %v1789_v60 = vld [vmem:[#allocation3] sm:$0xf]  ;;  %1820 = vrot.lane.b32.xlu1 %v3339_v61, %s3832_s18  ;;  %1840 = vrot.lane.b32.xlu0 %v3341_v62, %s3833_s11  ;;  %v1848_v17 = vsel %vm1847_vm2, %v1844_v59, 0 }
 0x7c2   : > { %v1790_v49 = vsel %vm4207_vm8, %v1789_v60, 0  ;;  %2550 = vst.msk [vmem:[#allocation3] sm:$0xf] %vm1610_vm3, %v3817_v1  ;;  %vm1867_vm3 = vcmp.ne.s16.totalorder %v4460_v7, 0  ;;  %v3342_v30 = vcombine.low %v1848_v17, %v1848_v17  ;;  %v3859_v7 = vmov 7  }
 0x7c3   : > { %1791 = vst.msk [vmem:[#allocation4] sm:$0xf] %vm1628_vm11, %v1790_v49  ;;  %v1868_v19 = vsel %vm1867_vm3, %v1864_v48, 0  ;;  %3774 = vset.pattern.permute.xlu1 %v3859_v7 }
 0x7c4   : > { %2551 = vst.msk [vmem:[#allocation3] sm:$0xf] %vm1612_vm7, %v3817_v1  ;;  %v1876_v1 = vld [vmem:[%s4954_s5 + $0xc] sm:$0xff]  ;;  %v3344_v20 = vcombine.low %v1868_v19, %v1868_v19  ;;  %vm1897_vm7 = vcmask 359424  }
 0x7c5   : > { %1828 = vrot.lane.b32.xlu1 %v3797_v57, %s3834_s12  ;;  %1860 = vrot.lane.b32.xlu0 %v3798_v58, %s3847_s29  ;;  %v3345_v51 = vcombine.low %v1876_v1, %v1876_v1  ;;  %v3346_v18 = vcombine.high %v1876_v1, %v1876_v1 }
 0x7c9   : > { %1852 = vrot.lane.b32.xlu1 %v3342_v30, %s4969_s20  ;;  %1893 = vrot.lane.b32.xlu0 %v3345_v51, %s3849_s9 }
 0x7cd   : > { %1872 = vrot.lane.b32.xlu1 %v3344_v20, %s3846_s10  ;;  %1885 = vperm.xlu0 %3772, %v4479_v29   ;;  %v3852_v20 = vmov 6  }
 0x7d1   : > { %1895 = vrot.lane.b32.xlu1 %v3346_v18, %s3849_s9  ;;  %3773 = vset.pattern.permute.xlu0 %v3852_v20  ;;  %s3855_s9 = smov 104  }
 0x7d5   : > { %2423 = vrot.lane.b32.xlu1 %v3793_v27, %s3841_s16 }
 0x7d9   : > { %1950 = vrot.lane.b32.xlu1 %v3801_v32, %s3851_s21 }
 0x82e   : > { %v1797_v34 = vpop.permute.xlu1 %1796 }
 0x82f   : > { %1799 = vst.msk [vmem:[#allocation4] sm:$0xf0] %vm1636_vm9, %v1797_v34  ;;  %v1809_v35 = vpop.permute.xlu0 %1808 }
 0x830   : > { %1811 = vst.msk [vmem:[#allocation4 + $0x8] sm:$0xf] %vm1628_vm11, %v1809_v35 }
 0x833   : > { %v1821_v36 = vpop.permute.xlu1 %1820  ;;  %v1841_v13 = vpop.permute.xlu0 %1840 }
 0x834   : > { %1823 = vst.msk [vmem:[#allocation4 + $0x8] sm:$0xf0] %vm1636_vm9, %v1821_v36  ;;  %1843 = vst.msk [vmem:[#allocation4 + $0x10] sm:$0xf0] %vm1636_vm9, %v1841_v13 }
 0x836   : > { %v1877_v39 = vld [vmem:[#allocation4] sm:$0xff] }
 0x837   : > { %v1829_v37 = vpop.permute.xlu1 %1828  ;;  %3575 = vmatpush3.bf16.msra.mxu0 %v1877_v39  ;;  %v1861_v47 = vpop.permute.xlu0 %1860 }
 0x838   : > { %1831 = vst.msk [vmem:[#allocation4 + $0x10] sm:$0xf] %vm1628_vm11, %v1829_v37  ;;  %3576 = vmatprep.subr.bf16.mxu0 %v3831_v8 }
 0x839   : > { %1863 = vst.msk [vmem:[#allocation4 + $0x18] sm:$0xf0] %vm1636_vm9, %v1861_v47 }
 0x83b   : > { %v1853_v31 = vpop.permute.xlu1 %1852  ;;  %v1878_v48 = vld [vmem:[#allocation4 + $0x8] sm:$0xff]  ;;  %v1894_v58 = vpop.permute.xlu0 %1893 }
 0x83c   : > { %1855 = vst.msk [vmem:[#allocation4 + $0x18] sm:$0xf] %vm1628_vm11, %v1853_v31  ;;  %3577 = vmatpush3.bf16.msra.mxu0 %v1878_v48 }
 0x83d   : > { %3578 = vmatprep.subr.bf16.mxu0 %v3831_v8 }
 0x83f   : > { %v1873_v50 = vpop.permute.xlu1 %1872  ;;  %v1879_v54 = vld [vmem:[#allocation4 + $0x10] sm:$0xff] }
 0x840   : > { %1875 = vst.msk [vmem:[#allocation4 + $0x20] sm:$0xf] %vm1628_vm11, %v1873_v50  ;;  %3579 = vmatpush3.bf16.msra.mxu0 %v1879_v54 }
 0x841   : > { %3580 = vmatprep.subr.bf16.mxu0 %v3831_v8 }
 0x843   : > { %v1896_v55 = vpop.permute.xlu1 %1895  ;;  %v1880_v57 = vld [vmem:[#allocation4 + $0x18] sm:$0xff] }
 0x844   : > { %3581 = vmatpush3.bf16.msra.mxu0 %v1880_v57  ;;  %v1898_v49 = vsel %vm1897_vm7, %v1894_v58, %v1896_v55  ;;  %v3802_v58 = vld [vmem:[%s4954_s5 + $0x10] ss:$0 sps:$4 sm:$0xff]  }
 0x845   : > { %3582 = vmatprep.subr.bf16.mxu0 %v3831_v8 }
 0x847   : > { %v2424_v59 = vpop.permute.xlu1 %2423  ;;  %v1881_v60 = vld [vmem:[#allocation4 + $0x20] sm:$0xf] }
 0x848   : > { %2426 = vst.msk [vmem:[#allocation2] sm:$0xf] %vm1621_vm14, %v2424_v59  ;;  %v1903_v61 = vsel %vm693_vm12, %v1881_v60, 0 }
 0x849   : > { %3583 = vmatpush3.bf16.msra.mxu0 %v1903_v61 }
 0x84a   : > { %3594 = vmatprep.subr.bf16.mxu0 %v3831_v8 }
 0x84b   : > { %v1951_v62 = vpop.permute.xlu1 %1950 }
 0x84c   : > { %3585 = vmatmul.mubr.msk.bf16.vlgmr.msra.gmra.mrb[16].mxu0 %vm689_vm4, %v1898_v49  ;;  %v4504_v17 = vsel %vm693_vm12, %v1951_v62, 0  ;;  %v1886_v27 = vpop.permute.xlu0 %1885 }
 0x84d   : > { %3589 = vmatpush3.bf16.msra.mxu1 %v4504_v17  ;;  %3595 = vmatpush3.bf16.msra.mxu0 %v4504_v17 }
 0x84e   : > { %3600 = vmatprep.subr.bf16.mxu1 %v3831_v8  ;;  %3596 = vmatprep.mubr.msk.bf16.mxu0 %vm3836_vm1, %v3831_v8 }
 0x84f   : > { %v2437_v1 = vld [vmem:[#allocation2] sm:$0xf]  ;;  %3606 = vmatprep.subr.bf16.mxu0 %v3831_v8 }
 0x850   : > { %v2438_v51 = vsel %vm1649_vm6, %v2437_v1, 0  ;;  %v2427_v30 = vld [vmem:[#allocation2] sm:$0xf]  ;;  %vm1952_vm6 = vcmask 64512  }
 0x851   : > { %2440 = vrot.lane.b32.xlu1 %v2438_v51, %s3823_s23  ;;  %v2428_v19 = vsel %vm4207_vm8, %v2427_v30, 0  ;;  %v2458_v35 = vld [vmem:[#allocation2] sm:$0xf] }
 0x852   : > { %2429 = vst.msk [vmem:[#allocation4] sm:$0xf] %vm1628_vm11, %v2428_v19  ;;  %v2430_v36 = vld [vmem:[#allocation2] sm:$0xf]  ;;  %v2459_v39 = vsel %vm1681_vm13, %v2458_v35, 0  ;;  %vm4971_vm13 = vcmask 130048  }
 0x853   : > { %v2432_v47 = vrot.slane %v2430_v36, 4  ;;  %v2444_v31 = vld [vmem:[#allocation2] sm:$0xf]  ;;  %v2461_v48 = vrot.slane %v2459_v39, 4 }
 0x854   : > { %v2445_v6 = vsel %vm1664_vm5, %v2444_v31, 0  ;;  %v2473_v54 = vld [vmem:[#allocation2] sm:$0xf]  ;;  %vm4970_vm5 = vcmp.ne.s16.totalorder %v4274_v52, 0 }
 0x855   : > { %v2447_v50 = vrot.slane %v2445_v6, 4  ;;  %v2475_v55 = vrot.slane %v2473_v54, 4  ;;  %v2452_v57 = vld [vmem:[#allocation2] sm:$0xf] }
 0x856   : > { %v2466_v56 = vld [vmem:[#allocation2] sm:$0xf] }
 0x857   : > { %v2467_v59 = vsel %vm1692_vm15, %v2466_v56, 0  ;;  %v2480_v60 = vld [vmem:[#allocation2] sm:$0xf]  ;;  %vm848_vm15 = vcmask 523648  }
 0x858   : > { %v2481_v61 = vsel %vm4970_vm5, %v2480_v60, 0 }
 0x8c3   : > { %v2441_v18 = vpop.permute.xlu1 %2440 }
 0x8c4   : > { %2443 = vst.msk [vmem:[#allocation4 + $0x8] sm:$0xf] %vm1628_vm11, %v2441_v18 }
 0x91f   : > { %v1939_v2 = vpop.f32.mrb[16].mxu0 }
 0x920   : > { %v1940_v32 = vadd.f32 %v1939_v2, %v1886_v27  ;;  %v3586_v34 = vpop.f32.mrb[17].mxu0 }
 0x921   : > { %v1942_v11 = vpop.f32.mrb[18].mxu0 }
 0x922   : > { %v4519_v13 = vpack.c.bf16 %v1940_v32, %v1940_v32  ;;  %v3587_v37 = vpop.f32.mrb[19].mxu0 }
 0x924   : > { %2135 = vrot.lane.b32.xlu1 %v4519_v13, %s3851_s21  ;;  %2045 = vrot.lane.b32.xlu0 %v4519_v13, %s4969_s20 }
 0x925   : > { %3591 = vmatmul.mubr.msk.bf16.vlgmr.msra.gmra.mrb[28].mxu1 %vm1952_vm6, %v4519_v13 }
 0x926   : > { %3601 = vmatpush3.bf16.msra.mxu1 %v4504_v17  ;;  %3602 = vmatprep.mubr.msk.bf16.mxu1 %vm3836_vm1, %v3831_v8 }
 0x927   : > { %3612 = vmatprep.subr.bf16.mxu1 %v3831_v8 }
 0x928   : > { %2462 = vrot.lane.b32.xlu1 %v2461_v48, %s3833_s11  ;;  %2433 = vrot.lane.b32.xlu0 %v2432_v47, %s3822_s22 }
 0x92c   : > { %2225 = vrot.lane.b32.xlu1 %v4519_v13, %s3853_s24  ;;  %2448 = vrot.lane.b32.xlu0 %v2447_v50, %s3832_s18 }
 0x930   : > { %2476 = vrot.lane.b32.xlu1 %v2475_v55, %s3847_s29  ;;  %2454 = vrot.lane.b32.xlu0 %v2452_v57, %s3834_s12 }
 0x934   : > { %2469 = vrot.lane.b32.xlu0 %v2467_v59, %s4969_s20  ;;  %2502 = vrot.lane.b32.xlu1 %v3802_v58, %s3854_s25 }
 0x938   : > { %2483 = vrot.lane.b32.xlu0 %v2481_v61, %s3846_s10 }
 0x93c   : > { %2496 = vperm.xlu0 %3773, %v4479_v29  }
 0x940   : > { %2090 = vrot.lane.b32.xlu0 %v4519_v13, %s3855_s9 }
 0x941   : > { %3775 = vset.pattern.permute.xlu0 %v3859_v7 }
 0x996   : > { %v2136_v49 = vpop.permute.xlu1 %2135  ;;  %v2046_v62 = vpop.permute.xlu0 %2045 }
 0x997   : > { %3603 = vmatmul.mubr.msk.bf16.vlgmr.msra.gmra.mrb[32].mxu1 %vm1952_vm6, %v2046_v62 }
 0x998   : > { %3613 = vmatpush3.bf16.msra.mxu1 %v4504_v17  ;;  %3614 = vmatprep.mubr.msk.bf16.mxu1 %vm3836_vm1, %v3831_v8 }
 0x999   : > { %3624 = vmatprep.subr.bf16.mxu1 %v3831_v8 }
 0x99a   : > { %v2463_v52 = vpop.permute.xlu1 %2462  ;;  %v2434_v15 = vpop.permute.xlu0 %2433 }
 0x99b   : > { %2465 = vst.msk [vmem:[#allocation4 + $0x10] sm:$0xf0] %vm1636_vm9, %v2463_v52  ;;  %2436 = vst.msk [vmem:[#allocation4] sm:$0xf0] %vm1636_vm9, %v2434_v15 }
 0x99e   : > { %v2226_v1 = vpop.permute.xlu1 %2225  ;;  %v2449_v51 = vpop.permute.xlu0 %2448 }
 0x99f   : > { %2451 = vst.msk [vmem:[#allocation4 + $0x8] sm:$0xf0] %vm1636_vm9, %v2449_v51  ;;  %3615 = vmatmul.mubr.msk.bf16.vlgmr.msra.gmra.mrb[36].mxu1 %vm1952_vm6, %v2136_v49 }
 0x9a0   : > { %3625 = vmatpush3.bf16.msra.mxu1 %v4504_v17  ;;  %3626 = vmatprep.mubr.msk.bf16.mxu1 %vm3836_vm1, %v3831_v8 }
 0x9a1   : > { %3636 = vmatprep.subr.bf16.mxu1 %v3831_v8 }
 0x9a2   : > { %v2477_v30 = vpop.permute.xlu1 %2476  ;;  %v2455_v19 = vpop.permute.xlu0 %2454  ;;  %v2488_v18 = vld [vmem:[#allocation4] sm:$0xff] }
 0x9a3   : > { %2479 = vst.msk [vmem:[#allocation4 + $0x18] sm:$0xf0] %vm1636_vm9, %v2477_v30 }
 0x9a4   : > { %2457 = vst.msk [vmem:[#allocation4 + $0x10] sm:$0xf] %vm1628_vm11, %v2455_v19 }
 0x9a6   : > { %v2470_v20 = vpop.permute.xlu0 %2469  ;;  %v2489_v2 = vld [vmem:[#allocation4 + $0x8] sm:$0xff]  ;;  %v2503_v36 = vpop.permute.xlu1 %2502 }
 0x9a7   : > { %2472 = vst.msk [vmem:[#allocation4 + $0x18] sm:$0xf] %vm1628_vm11, %v2470_v20  ;;  %3627 = vmatmul.mubr.msk.bf16.vlgmr.msra.gmra.mrb[40].mxu1 %vm1952_vm6, %v2226_v1 }
 0x9a8   : > { %3637 = vmatpush3.bf16.msra.mxu1 %v2488_v18  ;;  %3646 = vmatprep.mubr.msk.bf16.mxu1 %vm3836_vm1, %v3831_v8 }
 0x9a9   : > { %3638 = vmatprep.subr.bf16.mxu1 %v3831_v8 }
 0x9aa   : > { %v2484_v27 = vpop.permute.xlu0 %2483 }
 0x9ab   : > { %2486 = vst.msk [vmem:[#allocation4 + $0x20] sm:$0xf] %vm1628_vm11, %v2484_v27  ;;  %v2490_v32 = vld [vmem:[#allocation4 + $0x10] sm:$0xff] }
 0x9ac   : > { %3639 = vmatpush3.bf16.msra.mxu1 %v2489_v2 }
 0x9ad   : > { %3640 = vmatprep.subr.bf16.mxu1 %v3831_v8 }
 0x9ae   : > { %v2491_v34 = vld [vmem:[#allocation4 + $0x18] sm:$0xff] }
 0x9b0   : > { %3641 = vmatpush3.bf16.msra.mxu1 %v2490_v32 }
 0x9b1   : > { %3642 = vmatprep.subr.bf16.mxu1 %v3831_v8 }
 0x9b2   : > { %v2492_v35 = vld [vmem:[#allocation4 + $0x20] sm:$0xf] }
 0x9b3   : > { %v2508_v11 = vsel %vm693_vm12, %v2492_v35, 0 }
 0x9b4   : > { %3643 = vmatpush3.bf16.msra.mxu1 %v2491_v34 }
 0x9b5   : > { %3644 = vmatprep.subr.bf16.mxu1 %v3831_v8 }
 0x9b8   : > { %3645 = vmatpush3.bf16.msra.mxu1 %v2508_v11 }
 0x9b9   : > { %3664 = vmatprep.subr.bf16.mxu1 %v3831_v8 }
 0x9bb   : > { %3647 = vmatmul.mubr.msk.bf16.vlgmr.msra.gmra.mrb[44].mxu1 %vm689_vm4, %v2503_v36  ;;  %v2497_v62 = vpop.permute.xlu0 %2496 }
 0x9bc   : > { %3666 = vmatprep.mubr.msk.bf16.mxu1 %vm3836_vm1, %v3831_v8 }
 0x9f8   : > { %v4583_v37 = vpop.f32.mrb[28].mxu1 }
 0x9f9   : > { %2315 = vst.msk [vmem:[%s3946_s17 + $0x20] sm:$0xff] %vm4971_vm13, %v4583_v37  ;;  %v3592_v39 = vpop.f32.mrb[29].mxu1 }
 0x9fa   : > { %v1996_v47 = vpop.f32.mrb[30].mxu1  ;;  %v2091_v39 = vpop.permute.xlu0 %2090 }
 0x9fb   : > { %v3593_v31 = vpop.f32.mrb[31].mxu1 }
 0xa6a   : > { %v4588_v48 = vpop.f32.mrb[32].mxu1 }
 0xa6b   : > { %v3604_v6 = vpop.f32.mrb[33].mxu1 }
 0xa6c   : > { %v2087_v50 = vpop.f32.mrb[34].mxu1 }
 0xa6d   : > { %v3605_v54 = vpop.f32.mrb[35].mxu1  ;;  %v2632_v50 = vld [vmem:[%s4954_s5 + $0x10] sm:$0xff] }
 0xa72   : > { %v4590_v55 = vpop.f32.mrb[36].mxu1 }
 0xa73   : > { %v3616_v57 = vpop.f32.mrb[37].mxu1 }
 0xa74   : > { %v2177_v56 = vpop.f32.mrb[38].mxu1 }
 0xa75   : > { %v3617_v58 = vpop.f32.mrb[39].mxu1 }
 0xa7a   : > { %v4592_v59 = vpop.f32.mrb[40].mxu1 }
 0xa7b   : > { %v3628_v60 = vpop.f32.mrb[41].mxu1 }
 0xa7c   : > { %v2267_v61 = vpop.f32.mrb[42].mxu1  ;;  %v3369_v60 = vcombine.low %v2632_v50, %v2632_v50 }
 0xa7d   : > { %v3629_v49 = vpop.f32.mrb[43].mxu1 }
 0xa7e   : > { %v3370_v49 = vcombine.high %v2632_v50, %v2632_v50 }
 0xa8e   : > { %v2544_v52 = vpop.f32.mrb[44].mxu1 }
 0xa8f   : > { %v2545_v15 = vadd.f32 %v2544_v52, %v2497_v62  ;;  %v3648_v1 = vpop.f32.mrb[45].mxu1 }
 0xa90   : > { %v2547_v51 = vpop.f32.mrb[46].mxu1 }
 0xa91   : > { %v3389_v30 = vpack.c.bf16 %v2545_v15, %v2545_v15  ;;  %v3649_v19 = vpop.f32.mrb[47].mxu1 }
 0xa93   : > { %2556 = vrot.lane.b32.xlu1 %v3389_v30, %s3841_s16 }
 0xa97   : > { %2000 = vrot.lane.b32.xlu1 %v4519_v13, %s3832_s18 }
 0xa9b   : > { %2180 = vrot.lane.b32.xlu1 %v4519_v13, %s3856_s26 }
 0xa9f   : > { %2270 = vrot.lane.b32.xlu1 %v4519_v13, %s3857_s14 }
 0xb05   : > { %v2557_v20 = vpop.permute.xlu1 %2556 }
 0xb06   : > { %2559 = vst.msk [vmem:[#allocation3] sm:$0xf] %vm1621_vm14, %v2557_v20  ;;  %vm4972_vm14 = vcmp.ne.s16.totalorder %v4440_v38, 0 }
 0xb09   : > { %v2001_v18 = vpop.permute.xlu1 %2000 }
 0xb0a   : > { %3597 = vmatmul.mubr.msk.bf16.vlgmr.msra.gmra.mrb[20].mxu0 %vm1952_vm6, %v2001_v18 }
 0xb0b   : > { %3607 = vmatpush3.bf16.msra.mxu0 %v4504_v17  ;;  %3608 = vmatprep.mubr.msk.bf16.mxu0 %vm3836_vm1, %v3831_v8 }
 0xb0c   : > { %3618 = vmatprep.subr.bf16.mxu0 %v3831_v8 }
 0xb0d   : > { %v3803_v27 = vld [vmem:[#allocation3] ss:$0 sps:$4 sm:$0xff]   ;;  %v2181_v56 = vpop.permute.xlu1 %2180 }
 0xb0e   : > { %v2571_v2 = vld [vmem:[#allocation3] sm:$0xf]  ;;  %2567 = vrot.lane.b32.xlu0 %v3803_v27, %s3822_s22 }
 0xb0f   : > { %v2572_v32 = vsel %vm1803_vm10, %v2571_v2, 0  ;;  %v2580_v34 = vld [vmem:[#allocation3] sm:$0xf]  ;;  %vm884_vm10 = vcmask 1048448  }
 0xb10   : > { %v2597_v13 = vld [vmem:[#allocation3] sm:$0xf]  ;;  %v3362_v35 = vcombine.low %v2572_v32, %v2572_v32  ;;  %v2581_v11 = vsel %vm1815_vm0, %v2580_v34, 0  ;;  %vm2653_vm0 = vcmask 228352  }
 0xb11   : > { %v2598_v36 = vsel %vm4972_vm14, %v2597_v13, 0  ;;  %v3363_v47 = vcombine.low %v2581_v11, %v2581_v11  ;;  %v2560_v31 = vld [vmem:[#allocation3] sm:$0xf]  ;;  %v2271_v62 = vpop.permute.xlu1 %2270 }
 0xb12   : > { %2576 = vrot.lane.b32.xlu1 %v3362_v35, %s3823_s23  ;;  %3609 = vmatmul.mubr.msk.bf16.vlgmr.msra.gmra.mrb[24].mxu0 %vm1952_vm6, %v2091_v39  ;;  %v2561_v5 = vsel %vm4207_vm8, %v2560_v31, 0  ;;  %v3365_v6 = vcombine.low %v2598_v36, %v2598_v36  ;;  %v2606_v53 = vld [vmem:[#allocation3] sm:$0xf]  ;;  %v2316_v39 = vmul.f32 0.75, %v4583_v37  ;;  %vm843_vm8 = vcmask 392448  }
 0xb13   : > { %3619 = vmatpush3.bf16.msra.mxu0 %v4504_v17  ;;  %2585 = vrot.lane.b32.xlu0 %v3363_v47, %s3832_s18  ;;  %2562 = vst.msk [vmem:[#allocation4] sm:$0xf] %vm1628_vm11, %v2561_v5  ;;  %v3804_v38 = vld [vmem:[#allocation3] ss:$0 sps:$4 sm:$0xff]   ;;  %v2607_v28 = vsel %vm1847_vm2, %v2606_v53, 0  ;;  %v2324_v47 = vmul.f32 0.25, %v4583_v37 }
 0xb14   : > { %3620 = vmatprep.mubr.msk.bf16.mxu0 %vm3836_vm1, %v3831_v8  ;;  %3630 = vmatprep.subr.bf16.mxu0 %v3831_v8  ;;  %v3805_v54 = vld [vmem:[#allocation3] ss:$0 sps:$4 sm:$0xff]   ;;  %v3366_v58 = vcombine.low %v2607_v28, %v2607_v28  ;;  %v2332_v5 = vmul.f32 0.25, %v4588_v48  ;;  %vm857_vm2 = vcmask 654848  }
 0xb15   : > { %v2623_v57 = vld [vmem:[#allocation3] sm:$0xf] }
 0xb16   : > { %2602 = vrot.lane.b32.xlu1 %v3365_v6, %s3833_s11  ;;  %v2624_v61 = vsel %vm1867_vm3, %v2623_v57, 0  ;;  %s3858_s11 = smov 28   ;;  %v2339_v6 = vmul.f32 0.75, %v4588_v48 }
 0xb17   : > { %2593 = vrot.lane.b32.xlu0 %v3804_v38, %s3834_s12  ;;  %v3368_v14 = vcombine.low %v2624_v61, %v2624_v61  ;;  %v2360_v61 = vmul.f32 0.25, %v4590_v55 }
 0xb1a   : > { %2619 = vrot.lane.b32.xlu1 %v3805_v54, %s3847_s29  ;;  %3621 = vmatmul.mubr.msk.bf16.vlgmr.msra.gmra.mrb[28].mxu0 %vm1952_vm6, %v2181_v56  ;;  %s3862_s29 = smov 64  }
 0xb1b   : > { %3631 = vmatpush3.bf16.msra.mxu0 %v4504_v17  ;;  %2611 = vrot.lane.b32.xlu0 %v3366_v58, %s4969_s20  ;;  %v3808_v17 = vld [vmem:[%s4956_s7] ss:$0 sps:$4 sm:$0xff]  }
 0xb1c   : > { %3632 = vmatprep.mubr.msk.bf16.mxu0 %vm3836_vm1, %v3831_v8  ;;  %3650 = vmatprep.subr.bf16.mxu0 %v3831_v8 }
 0xb1e   : > { %2649 = vrot.lane.b32.xlu1 %v3369_v60, %s3858_s11 }
 0xb1f   : > { %2628 = vrot.lane.b32.xlu0 %v3368_v14, %s3846_s10  ;;  %v2367_v14 = vmul.f32 0.75, %v4590_v55  ;;  %v2384_v55 = vmul.f32 0.25, %v4592_v59  ;;  %s3861_s10 = smov 32  }
 0xb22   : > { %3633 = vmatmul.mubr.msk.bf16.vlgmr.msra.gmra.mrb[32].mxu0 %vm1952_vm6, %v2271_v62  ;;  %2641 = vperm.xlu1 %3774, %v4479_v29  }
 0xb23   : > { %2651 = vrot.lane.b32.xlu0 %v3370_v49, %s3858_s11  ;;  %3660 = vmatprep.mubr.msk.bf16.mxu0 %vm3836_vm1, %v3831_v8 }
 0xb27   : > { %2706 = vrot.lane.b32.xlu0 %v3808_v17, %s3853_s24 }
 0xb80   : > { %v2568_v52 = vpop.permute.xlu0 %2567 }
 0xb81   : > { %2570 = vst.msk [vmem:[#allocation4] sm:$0xf0] %vm1636_vm9, %v2568_v52 }
 0xb84   : > { %v2577_v15 = vpop.permute.xlu1 %2576 }
 0xb85   : > { %2579 = vst.msk [vmem:[#allocation4 + $0x8] sm:$0xf] %vm1628_vm11, %v2577_v15  ;;  %v2586_v1 = vpop.permute.xlu0 %2585 }
 0xb86   : > { %2588 = vst.msk [vmem:[#allocation4 + $0x8] sm:$0xf0] %vm1636_vm9, %v2586_v1 }
 0xb88   : > { %v2603_v51 = vpop.permute.xlu1 %2602  ;;  %v2633_v29 = vld [vmem:[#allocation4] sm:$0xff] }
 0xb89   : > { %2605 = vst.msk [vmem:[#allocation4 + $0x10] sm:$0xf0] %vm1636_vm9, %v2603_v51  ;;  %v2594_v30 = vpop.permute.xlu0 %2593  ;;  %3651 = vmatpush3.bf16.msra.mxu0 %v2633_v29 }
 0xb8a   : > { %2596 = vst.msk [vmem:[#allocation4 + $0x10] sm:$0xf] %vm1628_vm11, %v2594_v30  ;;  %3652 = vmatprep.subr.bf16.mxu0 %v3831_v8 }
 0xb8c   : > { %v2620_v19 = vpop.permute.xlu1 %2619 }
 0xb8d   : > { %2622 = vst.msk [vmem:[#allocation4 + $0x18] sm:$0xf0] %vm1636_vm9, %v2620_v19  ;;  %v2612_v20 = vpop.permute.xlu0 %2611  ;;  %v2634_v18 = vld [vmem:[#allocation4 + $0x8] sm:$0xff]  ;;  %vm875_vm9 = vcmask 917248  }
 0xb8e   : > { %2614 = vst.msk [vmem:[#allocation4 + $0x18] sm:$0xf] %vm1628_vm11, %v2612_v20  ;;  %3653 = vmatpush3.bf16.msra.mxu0 %v2634_v18  ;;  %v2391_v20 = vmul.f32 0.75, %v4592_v59 }
 0xb8f   : > { %3654 = vmatprep.subr.bf16.mxu0 %v3831_v8 }
 0xb90   : > { %v2650_v13 = vpop.permute.xlu1 %2649 }
 0xb91   : > { %v2629_v27 = vpop.permute.xlu0 %2628  ;;  %v2635_v2 = vld [vmem:[#allocation4 + $0x10] sm:$0xff] }
 0xb92   : > { %2631 = vst.msk [vmem:[#allocation4 + $0x20] sm:$0xf] %vm1628_vm11, %v2629_v27  ;;  %3655 = vmatpush3.bf16.msra.mxu0 %v2635_v2  ;;  %vm866_vm11 = vcmask 786048  }
 0xb93   : > { %3656 = vmatprep.subr.bf16.mxu0 %v3831_v8 }
 0xb95   : > { %v2636_v32 = vld [vmem:[#allocation4 + $0x18] sm:$0xff]  ;;  %v2652_v34 = vpop.permute.xlu0 %2651 }
 0xb96   : > { %3657 = vmatpush3.bf16.msra.mxu0 %v2636_v32  ;;  %v2654_v36 = vsel %vm2653_vm0, %v2650_v13, %v2652_v34 }
 0xb97   : > { %3658 = vmatprep.subr.bf16.mxu0 %v3831_v8 }
 0xb99   : > { %v2637_v35 = vld [vmem:[#allocation4 + $0x20] sm:$0xf]  ;;  %v2707_v30 = vpop.permute.xlu0 %2706 }
 0xb9a   : > { %v2659_v11 = vsel %vm693_vm12, %v2637_v35, 0  ;;  %v4689_v19 = vsel %vm693_vm12, %v2707_v30, 0  ;;  %vm838_vm12 = vcmask 261248  }
 0xb9b   : > { %3659 = vmatpush3.bf16.msra.mxu0 %v2659_v11  ;;  %3665 = vmatpush3.bf16.msra.mxu1 %v4689_v19 }
 0xb9c   : > { %3670 = vmatprep.subr.bf16.mxu0 %v3831_v8  ;;  %3676 = vmatprep.subr.bf16.mxu1 %v3831_v8 }
 0xb9e   : > { %3661 = vmatmul.mubr.msk.bf16.vlgmr.msra.gmra.mrb[36].mxu0 %vm689_vm4, %v2654_v36  ;;  %vm4973_vm4 = vmmov %vm4971_vm13 }
 0xb9f   : > { %3672 = vmatprep.mubr.msk.bf16.mxu0 %vm3836_vm1, %v3831_v8  ;;  %3671 = vmatpush3.bf16.msra.mxu0 %v4689_v19 }
 0xba0   : > { %3682 = vmatprep.subr.bf16.mxu0 %v3831_v8 }
 0xbdd   : > { %v2039_v31 = vpop.f32.mrb[20].mxu0 }
 0xbde   : > { %v2317_v53 = vmul.f32 0.25, %v2039_v31  ;;  %v2325_v38 = vmul.f32 0.75, %v2039_v31  ;;  %v3598_v28 = vpop.f32.mrb[21].mxu0 }
 0xbdf   : > { %v2042_v50 = vpop.f32.mrb[22].mxu0  ;;  %v2642_v28 = vpop.permute.xlu1 %2641 }
 0xbe0   : > { %v4670_v54 = vadd.f32 %v2317_v53, %v2316_v39  ;;  %v4672_v57 = vadd.f32 %v2325_v38, %v2324_v47  ;;  %v4674_v56 = vadd.f32 %v2332_v5, %v2325_v38  ;;  %v4676_v58 = vadd.f32 %v2339_v6, %v2317_v53  ;;  %v3599_v60 = vpop.f32.mrb[23].mxu0 }
 0xbe5   : > { %v2129_v37 = vpop.f32.mrb[24].mxu0 }
 0xbe6   : > { %v2346_v48 = vmul.f32 0.25, %v2129_v37  ;;  %v2353_v49 = vmul.f32 0.75, %v2129_v37  ;;  %v3610_v62 = vpop.f32.mrb[25].mxu0 }
 0xbe7   : > { %v2132_v7 = vpop.f32.mrb[26].mxu0 }
 0xbe8   : > { %v4680_v17 = vadd.f32 %v2346_v48, %v2339_v6  ;;  %v4682_v52 = vadd.f32 %v2353_v49, %v2332_v5  ;;  %v4684_v15 = vadd.f32 %v2360_v61, %v2353_v49  ;;  %v2368_v1 = vadd.f32 %v2367_v14, %v2346_v48  ;;  %v3611_v51 = vpop.f32.mrb[27].mxu0 }
 0xbea   : > { %2369 = vst.msk [vmem:[%s3946_s17 + $0x28] sm:$0xff] %vm4973_vm4, %v2368_v1 }
 0xbed   : > { %v2219_v29 = vpop.f32.mrb[28].mxu0 }
 0xbee   : > { %v2370_v18 = vmul.f32 0.25, %v2219_v29  ;;  %v2377_v27 = vmul.f32 0.75, %v2219_v29  ;;  %v3622_v2 = vpop.f32.mrb[29].mxu0 }
 0xbef   : > { %v2222_v32 = vpop.f32.mrb[30].mxu0 }
 0xbf0   : > { %v2371_v34 = vadd.f32 %v2370_v18, %v2367_v14  ;;  %v2378_v13 = vadd.f32 %v2377_v27, %v2360_v61  ;;  %v2385_v35 = vadd.f32 %v2384_v55, %v2377_v27  ;;  %v2392_v11 = vadd.f32 %v2391_v20, %v2370_v18  ;;  %v3623_v36 = vpop.f32.mrb[31].mxu0 }
 0xbf5   : > { %v4697_v39 = vpop.f32.mrb[32].mxu0 }
 0xbf6   : > { %v2398_v59 = vmul.f32 0.25, %v4697_v39  ;;  %v2405_v47 = vmul.f32 0.75, %v4697_v39  ;;  %v3634_v31 = vpop.f32.mrb[33].mxu0 }
 0xbf7   : > { %v2312_v5 = vpop.f32.mrb[34].mxu0 }
 0xbf8   : > { %v2399_v6 = vadd.f32 %v2398_v59, %v2391_v20  ;;  %v2406_v53 = vadd.f32 %v2405_v47, %v2384_v55  ;;  %v3635_v38 = vpop.f32.mrb[35].mxu0 }
 0xc71   : > { %v2695_v50 = vpop.f32.mrb[36].mxu0 }
 0xc72   : > { %v2696_v60 = vadd.f32 %v2695_v50, %v2642_v28  ;;  %v3662_v37 = vpop.f32.mrb[37].mxu0 }
 0xc73   : > { %v2698_v14 = vpop.f32.mrb[38].mxu0 }
 0xc74   : > { %v2702_v61 = vpack.c.bf16 %v2696_v60, %v2696_v60  ;;  %v3663_v48 = vpop.f32.mrb[39].mxu0 }
 0xc76   : > { %2800 = vrot.lane.b32.xlu0 %v2702_v61, %s4969_s20  ;;  %2755 = vrot.lane.b32.xlu1 %v2702_v61, %s3832_s18  ;;  %s3860_s18 = smov 48  }
 0xc77   : > { %3667 = vmatmul.mubr.msk.bf16.vlgmr.msra.gmra.mrb[48].mxu1 %vm1952_vm6, %v2702_v61 }
 0xc78   : > { %3677 = vmatpush3.bf16.msra.mxu1 %v4689_v19  ;;  %3678 = vmatprep.mubr.msk.bf16.mxu1 %vm3836_vm1, %v3831_v8 }
 0xc79   : > { %3688 = vmatprep.subr.bf16.mxu1 %v3831_v8 }
 0xc7a   : > { %2890 = vrot.lane.b32.xlu0 %v2702_v61, %s3851_s21  ;;  %2845 = vrot.lane.b32.xlu1 %v2702_v61, %s3855_s9 }
 0xc7e   : > { %2980 = vrot.lane.b32.xlu0 %v2702_v61, %s3853_s24  ;;  %2935 = vrot.lane.b32.xlu1 %v2702_v61, %s3856_s26 }
 0xc82   : > { %835 = vrot.lane.b32.xlu0 %v4229_v33, %s3844_s13  ;;  %3025 = vrot.lane.b32.xlu1 %v2702_v61, %s3857_s14 }
 0xc86   : > { %845 = vrot.lane.b32.xlu0 %v4229_v33, %s3860_s18  ;;  %840 = vrot.lane.b32.xlu1 %v4229_v33, %s3861_s10 }
 0xc8a   : > { %863 = vrot.lane.b32.xlu0 %v4319_v40, %s3853_s24  ;;  %854 = vrot.lane.b32.xlu1 %v4321_v41, %s3862_s29 }
 0xc8e   : > { %881 = vrot.lane.b32.xlu0 %v4323_v42, %s4969_s20  ;;  %872 = vrot.lane.b32.xlu1 %v4325_v43, %s3851_s21 }
 0xc92   : > { %902 = vrot.lane.b32.xlu0 %v4327_v44, %s3861_s10  ;;  %894 = vrot.lane.b32.xlu1 %v4329_v45, %s3844_s13 }
 0xc96   : > { %915 = vrot.lane.b32.xlu0 %v4305_v22, %s3862_s29  ;;  %910 = vrot.lane.b32.xlu1 %v4331_v46, %s3860_s18 }
 0xc9a   : > { %923 = vrot.lane.b32.xlu0 %v4305_v22, %s3851_s21  ;;  %919 = vrot.lane.b32.xlu1 %v4305_v22, %s3853_s24 }
 0xc9e   : > { %1499 = vrot.lane.b32.xlu0 %v4388_v25, %s3844_s13  ;;  %927 = vrot.lane.b32.xlu1 %v4305_v22, %s4969_s20 }
 0xca2   : > { %1515 = vrot.lane.b32.xlu0 %v4397_v63, %s3860_s18  ;;  %1507 = vrot.lane.b32.xlu1 %v4399_v0, %s3861_s10 }
 0xca6   : > { %1531 = vrot.lane.b32.xlu0 %v4401_v3, %s3853_s24  ;;  %1523 = vrot.lane.b32.xlu1 %v4403_v9, %s3862_s29 }
 0xcaa   : > { %1545 = vrot.lane.b32.xlu0 %v4405_v10, %s4969_s20  ;;  %1538 = vrot.lane.b32.xlu1 %v4407_v12, %s3851_s21 }
 0xcae   : > { %1562 = vrot.lane.b32.xlu0 %v4419_v21, %s3861_s10  ;;  %1555 = vrot.lane.b32.xlu1 %v4409_v4, %s3844_s13 }
 0xcb2   : > { %2320 = vrot.lane.b32.xlu0 %v4670_v54, %s3844_s13  ;;  %1569 = vrot.lane.b32.xlu1 %v4421_v23, %s3860_s18 }
 0xcb6   : > { %2328 = vrot.lane.b32.xlu0 %v4672_v57, %s3861_s10  ;;  %2373 = vrot.lane.b32.xlu1 %v2371_v34, %s3844_s13 }
 0xcba   : > { %2335 = vrot.lane.b32.xlu0 %v4674_v56, %s3860_s18  ;;  %2380 = vrot.lane.b32.xlu1 %v2378_v13, %s3861_s10 }
 0xcbe   : > { %1576 = vrot.lane.b32.xlu0 %v4423_v24, %s3862_s29  ;;  %2387 = vrot.lane.b32.xlu1 %v2385_v35, %s3860_s18 }
 0xcc2   : > { %2394 = vrot.lane.b32.xlu0 %v2392_v11, %s3862_s29  ;;  %2342 = vrot.lane.b32.xlu1 %v4676_v58, %s3862_s29 }
 0xcc6   : > { %2349 = vrot.lane.b32.xlu0 %v4680_v17, %s3853_s24  ;;  %1583 = vrot.lane.b32.xlu1 %v4425_v26, %s3853_s24 }
 0xcca   : > { %1588 = vrot.lane.b32.xlu0 %v4413_v16, %s3851_s21  ;;  %2401 = vrot.lane.b32.xlu1 %v2399_v6, %s3853_s24 }
 0xcce   : > { %2408 = vrot.lane.b32.xlu0 %v2406_v53, %s3851_s21  ;;  %2356 = vrot.lane.b32.xlu1 %v4682_v52, %s3851_s21 }
 0xcd2   : > { %2363 = vrot.lane.b32.xlu0 %v4684_v15, %s4969_s20  ;;  %1592 = vrot.lane.b32.xlu1 %v4413_v16, %s4969_s20 }
 0xcd6   : > { %2413 = vrot.lane.b32.xlu1 %v4697_v39, %s4969_s20 }
 0xce8   : > { %v2801_v33 = vpop.permute.xlu0 %2800  ;;  %v2756_v22 = vpop.permute.xlu1 %2755 }
 0xce9   : > { %3673 = vmatmul.mubr.msk.bf16.vlgmr.msra.gmra.mrb[40].mxu0 %vm1952_vm6, %v2756_v22  ;;  %3679 = vmatmul.mubr.msk.bf16.vlgmr.msra.gmra.mrb[52].mxu1 %vm1952_vm6, %v2801_v33 }
 0xcea   : > { %3683 = vmatpush3.bf16.msra.mxu0 %v4689_v19  ;;  %3689 = vmatpush3.bf16.msra.mxu1 %v4689_v19 }
 0xceb   : > { %3684 = vmatprep.mubr.msk.bf16.mxu0 %vm3836_vm1, %v3831_v8  ;;  %3694 = vmatprep.subr.bf16.mxu0 %v3831_v8 }
 0xcec   : > { %v2891_v40 = vpop.permute.xlu0 %2890  ;;  %v2846_v41 = vpop.permute.xlu1 %2845  ;;  %3690 = vmatprep.mubr.msk.bf16.mxu1 %vm3836_vm1, %v3831_v8  ;;  %3700 = vmatprep.subr.bf16.mxu1 %v3831_v8 }
 0xcf0   : > { %v2981_v42 = vpop.permute.xlu0 %2980  ;;  %v2936_v43 = vpop.permute.xlu1 %2935 }
 0xcf1   : > { %3685 = vmatmul.mubr.msk.bf16.vlgmr.msra.gmra.mrb[44].mxu0 %vm1952_vm6, %v2846_v41  ;;  %3691 = vmatmul.mubr.msk.bf16.vlgmr.msra.gmra.mrb[56].mxu1 %vm1952_vm6, %v2891_v40 }
 0xcf2   : > { %3695 = vmatpush3.bf16.msra.mxu0 %v4689_v19  ;;  %3701 = vmatpush3.bf16.msra.mxu1 %v4689_v19 }
 0xcf3   : > { %3696 = vmatprep.mubr.msk.bf16.mxu0 %vm3836_vm1, %v3831_v8  ;;  %3706 = vmatprep.subr.bf16.mxu0 %v3831_v8 }
 0xcf4   : > { %v836_v44 = vpop.permute.xlu0 %835  ;;  %v3026_v45 = vpop.permute.xlu1 %3025  ;;  %3702 = vmatprep.mubr.msk.bf16.mxu1 %vm3836_vm1, %v3831_v8 }
 0xcf5   : > { %839 = vst.msk [vmem:[%s3946_s17] sm:$0xff] %vm838_vm12, %v836_v44 }
 0xcf8   : > { %v846_v46 = vpop.permute.xlu0 %845  ;;  %v841_v25 = vpop.permute.xlu1 %840 }
 0xcf9   : > { %844 = vst.msk [vmem:[%s3946_s17] sm:$0xff] %vm843_vm8, %v841_v25  ;;  %3697 = vmatmul.mubr.msk.bf16.vlgmr.msra.gmra.mrb[48].mxu0 %vm1952_vm6, %v2936_v43  ;;  %3703 = vmatmul.mubr.msk.bf16.vlgmr.msra.gmra.mrb[60].mxu1 %vm1952_vm6, %v2981_v42 }
 0xcfa   : > { %3707 = vmatpush3.bf16.msra.mxu0 %v4689_v19  ;;  %849 = vst.msk [vmem:[%s3946_s17] sm:$0xff] %vm848_vm15, %v846_v46  ;;  %3708 = vmatprep.mubr.msk.bf16.mxu0 %vm3836_vm1, %v3831_v8  ;;  %vm4974_vm1 = vmmov %vm4973_vm4 }
 0xcfb   : > { %vm4975_vm3 = vmmov %vm4974_vm1 }
 0xcfc   : > { %v864_v63 = vpop.permute.xlu0 %863  ;;  %v855_v0 = vpop.permute.xlu1 %854 }
 0xcfd   : > { %858 = vst.msk [vmem:[%s3946_s17] sm:$0xff] %vm857_vm2, %v855_v0 }
 0xcfe   : > { %867 = vst.msk [vmem:[%s3946_s17] sm:$0xff] %vm866_vm11, %v864_v63 }
 0xd00   : > { %v882_v3 = vpop.permute.xlu0 %881  ;;  %v873_v9 = vpop.permute.xlu1 %872 }
 0xd01   : > { %876 = vst.msk [vmem:[%s3946_s17] sm:$0xff] %vm875_vm9, %v873_v9  ;;  %3709 = vmatmul.mubr.msk.bf16.vlgmr.msra.gmra.mrb[52].mxu0 %vm1952_vm6, %v3026_v45 }
 0xd02   : > { %885 = vst.msk [vmem:[%s3946_s17] sm:$0xff] %vm884_vm10, %v882_v3 }
 0xd04   : > { %v903_v8 = vpop.permute.xlu0 %902  ;;  %v895_v10 = vpop.permute.xlu1 %894 }
 0xd05   : > { %897 = vst.msk [vmem:[%s3946_s17 + $0x8] sm:$0xff] %vm838_vm12, %v895_v10 }
 0xd06   : > { %905 = vst.msk [vmem:[%s3946_s17 + $0x8] sm:$0xff] %vm843_vm8, %v903_v8 }
 0xd08   : > { %v916_v12 = vpop.permute.xlu0 %915  ;;  %v911_v4 = vpop.permute.xlu1 %910 }
 0xd09   : > { %913 = vst.msk [vmem:[%s3946_s17 + $0x8] sm:$0xff] %vm848_vm15, %v911_v4 }
 0xd0a   : > { %918 = vst.msk [vmem:[%s3946_s17 + $0x8] sm:$0xff] %vm857_vm2, %v916_v12 }
 0xd0c   : > { %v924_v16 = vpop.permute.xlu0 %923  ;;  %v920_v21 = vpop.permute.xlu1 %919 }
 0xd0d   : > { %922 = vst.msk [vmem:[%s3946_s17 + $0x8] sm:$0xff] %vm866_vm11, %v920_v21 }
 0xd0e   : > { %926 = vst.msk [vmem:[%s3946_s17 + $0x8] sm:$0xff] %vm875_vm9, %v924_v16 }
 0xd10   : > { %v1500_v23 = vpop.permute.xlu0 %1499  ;;  %v928_v24 = vpop.permute.xlu1 %927 }
 0xd11   : > { %1502 = vst.msk [vmem:[%s3946_s17 + $0x10] sm:$0xff] %vm838_vm12, %v1500_v23 }
 0xd12   : > { %930 = vst.msk [vmem:[%s3946_s17 + $0x8] sm:$0xff] %vm884_vm10, %v928_v24 }
 0xd14   : > { %v1516_v26 = vpop.permute.xlu0 %1515  ;;  %v1508_v54 = vpop.permute.xlu1 %1507 }
 0xd15   : > { %1510 = vst.msk [vmem:[%s3946_s17 + $0x10] sm:$0xff] %vm843_vm8, %v1508_v54 }
 0xd16   : > { %1518 = vst.msk [vmem:[%s3946_s17 + $0x10] sm:$0xff] %vm848_vm15, %v1516_v26 }
 0xd18   : > { %v1532_v57 = vpop.permute.xlu0 %1531  ;;  %v1524_v56 = vpop.permute.xlu1 %1523 }
 0xd19   : > { %1526 = vst.msk [vmem:[%s3946_s17 + $0x10] sm:$0xff] %vm857_vm2, %v1524_v56 }
 0xd1a   : > { %1534 = vst.msk [vmem:[%s3946_s17 + $0x10] sm:$0xff] %vm866_vm11, %v1532_v57 }
 0xd1c   : > { %v1546_v58 = vpop.permute.xlu0 %1545  ;;  %v1539_v49 = vpop.permute.xlu1 %1538 }
 0xd1d   : > { %1541 = vst.msk [vmem:[%s3946_s17 + $0x10] sm:$0xff] %vm875_vm9, %v1539_v49 }
 0xd1e   : > { %1548 = vst.msk [vmem:[%s3946_s17 + $0x10] sm:$0xff] %vm884_vm10, %v1546_v58 }
 0xd20   : > { %v1563_v62 = vpop.permute.xlu0 %1562  ;;  %v1556_v7 = vpop.permute.xlu1 %1555 }
 0xd21   : > { %1558 = vst.msk [vmem:[%s3946_s17 + $0x18] sm:$0xff] %vm838_vm12, %v1556_v7 }
 0xd22   : > { %1565 = vst.msk [vmem:[%s3946_s17 + $0x18] sm:$0xff] %vm843_vm8, %v1563_v62 }
 0xd24   : > { %v2321_v17 = vpop.permute.xlu0 %2320  ;;  %v1570_v52 = vpop.permute.xlu1 %1569 }
 0xd25   : > { %2323 = vst.msk [vmem:[%s3946_s17 + $0x20] sm:$0xff] %vm838_vm12, %v2321_v17 }
 0xd26   : > { %1572 = vst.msk [vmem:[%s3946_s17 + $0x18] sm:$0xff] %vm848_vm15, %v1570_v52 }
 0xd28   : > { %v2329_v15 = vpop.permute.xlu0 %2328  ;;  %v2374_v1 = vpop.permute.xlu1 %2373 }
 0xd29   : > { %2331 = vst.msk [vmem:[%s3946_s17 + $0x20] sm:$0xff] %vm843_vm8, %v2329_v15 }
 0xd2a   : > { %2376 = vst.msk [vmem:[%s3946_s17 + $0x28] sm:$0xff] %vm838_vm12, %v2374_v1 }
 0xd2c   : > { %v2336_v51 = vpop.permute.xlu0 %2335  ;;  %v2381_v30 = vpop.permute.xlu1 %2380 }
 0xd2d   : > { %2338 = vst.msk [vmem:[%s3946_s17 + $0x20] sm:$0xff] %vm848_vm15, %v2336_v51 }
 0xd2e   : > { %2383 = vst.msk [vmem:[%s3946_s17 + $0x28] sm:$0xff] %vm843_vm8, %v2381_v30 }
 0xd30   : > { %v1577_v29 = vpop.permute.xlu0 %1576  ;;  %v2388_v19 = vpop.permute.xlu1 %2387 }
 0xd31   : > { %1579 = vst.msk [vmem:[%s3946_s17 + $0x18] sm:$0xff] %vm857_vm2, %v1577_v29 }
 0xd32   : > { %2390 = vst.msk [vmem:[%s3946_s17 + $0x28] sm:$0xff] %vm848_vm15, %v2388_v19 }
 0xd34   : > { %v2395_v55 = vpop.permute.xlu0 %2394  ;;  %v2343_v20 = vpop.permute.xlu1 %2342 }
 0xd35   : > { %2397 = vst.msk [vmem:[%s3946_s17 + $0x28] sm:$0xff] %vm857_vm2, %v2395_v55  ;;  %2345 = vst.msk [vmem:[%s3946_s17 + $0x20] sm:$0xff] %vm857_vm2, %v2343_v20 }
 0xd38   : > { %v2350_v18 = vpop.permute.xlu0 %2349  ;;  %v1584_v27 = vpop.permute.xlu1 %1583 }
 0xd39   : > { %2352 = vst.msk [vmem:[%s3946_s17 + $0x20] sm:$0xff] %vm866_vm11, %v2350_v18  ;;  %1586 = vst.msk [vmem:[%s3946_s17 + $0x18] sm:$0xff] %vm866_vm11, %v1584_v27 }
 0xd3c   : > { %v1589_v2 = vpop.permute.xlu0 %1588  ;;  %v2402_v32 = vpop.permute.xlu1 %2401 }
 0xd3d   : > { %1591 = vst.msk [vmem:[%s3946_s17 + $0x18] sm:$0xff] %vm875_vm9, %v1589_v2 }
 0xd3e   : > { %2404 = vst.msk [vmem:[%s3946_s17 + $0x28] sm:$0xff] %vm866_vm11, %v2402_v32 }
 0xd40   : > { %v2409_v34 = vpop.permute.xlu0 %2408  ;;  %v2357_v13 = vpop.permute.xlu1 %2356 }
 0xd41   : > { %2411 = vst.msk [vmem:[%s3946_s17 + $0x28] sm:$0xff] %vm875_vm9, %v2409_v34  ;;  %2359 = vst.msk [vmem:[%s3946_s17 + $0x20] sm:$0xff] %vm875_vm9, %v2357_v13 }
 0xd44   : > { %v2364_v35 = vpop.permute.xlu0 %2363  ;;  %v1593_v11 = vpop.permute.xlu1 %1592 }
 0xd45   : > { %2366 = vst.msk [vmem:[%s3946_s17 + $0x20] sm:$0xff] %vm884_vm10, %v2364_v35  ;;  %1595 = vst.msk [vmem:[%s3946_s17 + $0x18] sm:$0xff] %vm884_vm10, %v1593_v11 }
 0xd48   : > { %v2414_v36 = vpop.permute.xlu1 %2413 }
 0xd49   : > { %2416 = vst.msk [vmem:[%s3946_s17 + $0x28] sm:$0xff] %vm884_vm10, %v2414_v36 }
 0xd4a   : > { %v2748_v39 = vpop.f32.mrb[48].mxu1 }
 0xd4b   : > { %3070 = vst.msk [vmem:[%s3946_s17 + $0x30] sm:$0xff] %vm4974_vm1, %v2748_v39  ;;  %v3668_v59 = vpop.f32.mrb[49].mxu1  ;;  %v3071_v5 = vmul.f32 0.75, %v2748_v39  ;;  %v3079_v6 = vmul.f32 0.25, %v2748_v39 }
 0xd4c   : > { %v2751_v47 = vpop.f32.mrb[50].mxu1 }
 0xd4d   : > { %v3669_v31 = vpop.f32.mrb[51].mxu1 }
 0xdbc   : > { %v2794_v53 = vpop.f32.mrb[40].mxu0  ;;  %v2839_v38 = vpop.f32.mrb[52].mxu1 }
 0xdbd   : > { %v3072_v28 = vmul.f32 0.25, %v2794_v53  ;;  %v3080_v50 = vmul.f32 0.75, %v2794_v53  ;;  %v3087_v60 = vmul.f32 0.25, %v2839_v38  ;;  %v3094_v37 = vmul.f32 0.75, %v2839_v38  ;;  %v3674_v14 = vpop.f32.mrb[41].mxu0  ;;  %v3680_v61 = vpop.f32.mrb[53].mxu1 }
 0xdbe   : > { %v2797_v48 = vpop.f32.mrb[42].mxu0  ;;  %v2842_v33 = vpop.f32.mrb[54].mxu1 }
 0xdbf   : > { %v3073_v22 = vadd.f32 %v3072_v28, %v3071_v5  ;;  %v3081_v40 = vadd.f32 %v3080_v50, %v3079_v6  ;;  %v3088_v41 = vadd.f32 %v3087_v60, %v3080_v50  ;;  %v3095_v42 = vadd.f32 %v3094_v37, %v3072_v28  ;;  %v3675_v43 = vpop.f32.mrb[43].mxu0  ;;  %v3681_v44 = vpop.f32.mrb[55].mxu1 }
 0xdc1   : > { %3075 = vrot.lane.b32.xlu0 %v3073_v22, %s3844_s13  ;;  %3097 = vrot.lane.b32.xlu1 %v3095_v42, %s3862_s29 }
 0xdc4   : > { %v2884_v45 = vpop.f32.mrb[44].mxu0  ;;  %v2929_v46 = vpop.f32.mrb[56].mxu1 }
 0xdc5   : > { %v3101_v25 = vmul.f32 0.25, %v2884_v45  ;;  %v3108_v63 = vmul.f32 0.75, %v2884_v45  ;;  %v3115_v0 = vmul.f32 0.25, %v2929_v46  ;;  %v3122_v3 = vmul.f32 0.75, %v2929_v46  ;;  %v3686_v9 = vpop.f32.mrb[45].mxu0  ;;  %3083 = vrot.lane.b32.xlu0 %v3081_v40, %s3861_s10  ;;  %v3692_v8 = vpop.f32.mrb[57].mxu1 }
 0xdc6   : > { %v2887_v10 = vpop.f32.mrb[46].mxu0  ;;  %v2932_v12 = vpop.f32.mrb[58].mxu1 }
 0xdc7   : > { %v3102_v4 = vadd.f32 %v3101_v25, %v3094_v37  ;;  %v3109_v16 = vadd.f32 %v3108_v63, %v3087_v60  ;;  %v3116_v21 = vadd.f32 %v3115_v0, %v3108_v63  ;;  %v3123_v23 = vadd.f32 %v3122_v3, %v3101_v25  ;;  %v3687_v24 = vpop.f32.mrb[47].mxu0  ;;  %v3693_v26 = vpop.f32.mrb[59].mxu1 }
 0xdc9   : > { %3124 = vst.msk [vmem:[%s3946_s17 + $0x38] sm:$0xff] %vm4975_vm3, %v3123_v23  ;;  %3111 = vrot.lane.b32.xlu1 %v3109_v16, %s3851_s21  ;;  %3090 = vrot.lane.b32.xlu0 %v3088_v41, %s3860_s18 }
 0xdcc   : > { %v2974_v54 = vpop.f32.mrb[48].mxu0  ;;  %v3019_v57 = vpop.f32.mrb[60].mxu1 }
 0xdcd   : > { %v3125_v56 = vmul.f32 0.25, %v2974_v54  ;;  %v3132_v58 = vmul.f32 0.75, %v2974_v54  ;;  %v3139_v49 = vmul.f32 0.25, %v3019_v57  ;;  %v3146_v62 = vmul.f32 0.75, %v3019_v57  ;;  %v3698_v7 = vpop.f32.mrb[49].mxu0  ;;  %3104 = vrot.lane.b32.xlu0 %v3102_v4, %s3853_s24  ;;  %v3704_v17 = vpop.f32.mrb[61].mxu1 }
 0xdce   : > { %v2977_v52 = vpop.f32.mrb[50].mxu0  ;;  %v3022_v15 = vpop.f32.mrb[62].mxu1 }
 0xdcf   : > { %v3126_v1 = vadd.f32 %v3125_v56, %v3122_v3  ;;  %v3133_v51 = vadd.f32 %v3132_v58, %v3115_v0  ;;  %v3140_v30 = vadd.f32 %v3139_v49, %v3132_v58  ;;  %v3147_v29 = vadd.f32 %v3146_v62, %v3125_v56  ;;  %v3699_v19 = vpop.f32.mrb[51].mxu0  ;;  %v3705_v55 = vpop.f32.mrb[63].mxu1 }
 0xdd1   : > { %3128 = vrot.lane.b32.xlu1 %v3126_v1, %s3844_s13  ;;  %3149 = vrot.lane.b32.xlu0 %v3147_v29, %s3862_s29 }
 0xdd4   : > { %v3064_v20 = vpop.f32.mrb[52].mxu0 }
 0xdd5   : > { %v3153_v18 = vmul.f32 0.25, %v3064_v20  ;;  %v3160_v27 = vmul.f32 0.75, %v3064_v20  ;;  %v3710_v2 = vpop.f32.mrb[53].mxu0  ;;  %3135 = vrot.lane.b32.xlu1 %v3133_v51, %s3861_s10 }
 0xdd6   : > { %v3067_v32 = vpop.f32.mrb[54].mxu0 }
 0xdd7   : > { %v3154_v34 = vadd.f32 %v3153_v18, %v3146_v62  ;;  %v3161_v13 = vadd.f32 %v3160_v27, %v3139_v49  ;;  %v3711_v35 = vpop.f32.mrb[55].mxu0 }
 0xdd9   : > { %3163 = vrot.lane.b32.xlu0 %v3161_v13, %s3851_s21  ;;  %3142 = vrot.lane.b32.xlu1 %v3140_v30, %s3860_s18 }
 0xddd   : > { %3118 = vrot.lane.b32.xlu0 %v3116_v21, %s4969_s20  ;;  %3156 = vrot.lane.b32.xlu1 %v3154_v34, %s3853_s24 }
 0xde1   : > { %3168 = vrot.lane.b32.xlu1 %v3064_v20, %s4969_s20 }
 0xe33   : > { %v3076_v11 = vpop.permute.xlu0 %3075  ;;  %v3098_v39 = vpop.permute.xlu1 %3097 }
 0xe34   : > { %3078 = vst.msk [vmem:[%s3946_s17 + $0x30] sm:$0xff] %vm838_vm12, %v3076_v11 }
 0xe37   : > { %v3084_v36 = vpop.permute.xlu0 %3083 }
 0xe38   : > { %3086 = vst.msk [vmem:[%s3946_s17 + $0x30] sm:$0xff] %vm843_vm8, %v3084_v36 }
 0xe3b   : > { %v3091_v59 = vpop.permute.xlu0 %3090  ;;  %v3112_v47 = vpop.permute.xlu1 %3111 }
 0xe3c   : > { %3093 = vst.msk [vmem:[%s3946_s17 + $0x30] sm:$0xff] %vm848_vm15, %v3091_v59 }
 0xe3d   : > { %3100 = vst.msk [vmem:[%s3946_s17 + $0x30] sm:$0xff] %vm857_vm2, %v3098_v39 }
 0xe3f   : > { %v3105_v31 = vpop.permute.xlu0 %3104 }
 0xe40   : > { %3107 = vst.msk [vmem:[%s3946_s17 + $0x30] sm:$0xff] %vm866_vm11, %v3105_v31 }
 0xe41   : > { %3114 = vst.msk [vmem:[%s3946_s17 + $0x30] sm:$0xff] %vm875_vm9, %v3112_v47 }
 0xe43   : > { %v3129_v5 = vpop.permute.xlu1 %3128  ;;  %v3150_v6 = vpop.permute.xlu0 %3149 }
 0xe44   : > { %3131 = vst.msk [vmem:[%s3946_s17 + $0x38] sm:$0xff] %vm838_vm12, %v3129_v5 }
 0xe47   : > { %v3136_v53 = vpop.permute.xlu1 %3135 }
 0xe48   : > { %3138 = vst.msk [vmem:[%s3946_s17 + $0x38] sm:$0xff] %vm843_vm8, %v3136_v53 }
 0xe4b   : > { %v3164_v38 = vpop.permute.xlu0 %3163  ;;  %v3143_v28 = vpop.permute.xlu1 %3142 }
 0xe4c   : > { %3145 = vst.msk [vmem:[%s3946_s17 + $0x38] sm:$0xff] %vm848_vm15, %v3143_v28 }
 0xe4d   : > { %3152 = vst.msk [vmem:[%s3946_s17 + $0x38] sm:$0xff] %vm857_vm2, %v3150_v6 }
 0xe4f   : > { %v3119_v50 = vpop.permute.xlu0 %3118  ;;  %v3157_v60 = vpop.permute.xlu1 %3156 }
 0xe50   : > { %3121 = vst.msk [vmem:[%s3946_s17 + $0x30] sm:$0xff] %vm884_vm10, %v3119_v50 }
 0xe51   : > { %3159 = vst.msk [vmem:[%s3946_s17 + $0x38] sm:$0xff] %vm866_vm11, %v3157_v60 }
 0xe52   : > { %3166 = vst.msk [vmem:[%s3946_s17 + $0x38] sm:$0xff] %vm875_vm9, %v3164_v38 }
 0xe53   : > { %v3169_v37 = vpop.permute.xlu1 %3168 }
 0xe54   : > { %3171 = vst.msk [vmem:[%s3946_s17 + $0x38] sm:$0xff] %vm884_vm10, %v3169_v37 }
 0xe55 PF: > { %s18_s27 = sadd.s32 1, %s3815_s27  }
 0xe56   : > { %p15_p4 = scmp.ge.s32.totalorder %s18_s27, 4  }
 0xe58   :  { %17 = sbr.rel (!%p15_p4) target bundleno = 1 (0x1), region = 94 }

</bundles_post_ra>
